<compile_context>
chip_gen: v7x
topology: tpu7x:2x2x1
jax: 0.10.0
libtpu: 0.0.40
codegen_flags: <defaults>
</compile_context>

<pallas_src>
import functools

import jax
import jax.numpy as jnp
from jax import lax
from jax.experimental import pallas as pl
from jax.experimental.pallas import tpu as pltpu

_SQRT_HALF = 0.7071067811865476


def _erf(x):
    # Abramowitz & Stegun 7.1.26 polynomial, |err| < 1.5e-7 (elementwise + EUP only).
    p = 0.3275911
    a1, a2, a3, a4, a5 = (0.254829592, -0.284496736, 1.421413741,
                          -1.453152027, 1.061405429)
    s = jnp.where(x >= 0.0, 1.0, -1.0)
    ax = jnp.abs(x)
    t = pl.reciprocal(1.0 + p * ax, approx=True)          # EUP slot
    poly = ((((a5 * t + a4) * t + a3) * t + a2) * t + a1) * t
    return s * (1.0 - poly * jnp.exp(-ax * ax))


def _gelu_exact(x):
    # nn.GELU() default (approximate='none'): 0.5*x*(1+erf(x/sqrt(2)))
    return 0.5 * x * (1.0 + _erf(x * _SQRT_HALF))


def _lrp_kernel(x_ref, w_ref, b_ref, o_ref, col_ref, *, n_layers, width, out_dim):
    # x_ref : (1, CP, S)        channel-padded input, S = H*W on the lane axis
    # w_ref : (L, CP, 9*CP)     per-layer packed weights, col k*CP+ci = tap k, chan ci
    # b_ref : (L, CP, 1)        per-layer padded bias
    # o_ref : (1, out_dim, S)   lane-dense output (reshape to NCHW is free)
    # col_ref: (9*CP, S)        VMEM im2col scratch
    cp, s = x_ref.shape[1], x_ref.shape[2]
    a = x_ref[0]                                            # (CP, S) activations

    lane = lax.broadcasted_iota(jnp.int32, (cp, s), 1)       # flattened spatial index
    xcol = lane % width                                      # x coordinate per lane

    for l in range(n_layers):
        # ---- im2col: 9 tap-shifted copies stacked along (aligned) sublane blocks ----
        for k in range(9):
            dy, dx = k // 3, k % 3
            off = (dy - 1) * width + (dx - 1)                # lane offset of this tap
            t = a if off == 0 else pltpu.roll(a, shift=(-off) % s, axis=1)
            conds = []
            if dy == 0:
                conds.append(lane >= width)                  # needs y-1 >= 0
            if dy == 2:
                conds.append(lane < s - width)               # needs y+1 <  H
            if dx == 0:
                conds.append(xcol >= 1)                      # needs x-1 >= 0
            if dx == 2:
                conds.append(xcol < width - 1)               # needs x+1 <  W
            if conds:
                m = conds[0]
                for c in conds[1:]:
                    m = jnp.logical_and(m, c)
                t = jnp.where(m, t, 0.0)                     # SAME-conv zero border
            col_ref[pl.ds(k * cp, cp), :] = t

        # ---- one fat-K MXU matmul per layer; tap accumulation happens in the MXU ----
        z = jnp.dot(w_ref[l], col_ref[...], preferred_element_type=jnp.float32)
        z = z + b_ref[l]                                     # (CP,1) lane-broadcast
        a = _gelu_exact(z) if l < n_layers - 1 else 0.5 * jnp.tanh(z)

    o_ref[0] = a[:out_dim, :]


@functools.partial(jax.jit, static_argnames=("out_dim",))
def latent_residual_prediction(x_nchw, w_all, b_all, *, out_dim):
    """Forward pass matching the PyTorch module (input/output NCHW)."""
    n, cin, h, w = x_nchw.shape
    n_layers, cp, _ = w_all.shape
    s = h * w
    x = x_nchw.reshape(n, cin, s)                            # free reshape, lane-dense
    if cin < cp:
        x = jnp.pad(x, ((0, 0), (0, cp - cin), (0, 0)))      # one-time channel pad

    kernel = functools.partial(_lrp_kernel, n_layers=n_layers, width=w,
                               out_dim=out_dim)
    out = pl.pallas_call(
        kernel,
        grid=(n,),
        out_shape=jax.ShapeDtypeStruct((n, out_dim, s), jnp.float32),
        in_specs=[
            pl.BlockSpec((1, cp, s), lambda i: (i, 0, 0)),
            pl.BlockSpec((n_layers, cp, 9 * cp), lambda i: (0, 0, 0)),
            pl.BlockSpec((n_layers, cp, 1), lambda i: (0, 0, 0)),
        ],
        out_specs=pl.BlockSpec((1, out_dim, s), lambda i: (i, 0, 0)),
        scratch_shapes=[pltpu.VMEM((9 * cp, s), jnp.float32)],
        compiler_params=pltpu.CompilerParams(
            dimension_semantics=("parallel",)),               # v7x: 2 TCs, 1 batch each
    )(x, w_all, b_all)
    return out.reshape(n, out_dim, h, w)


def init_params(key, in_dim, out_dim):
    """PyTorch-style synthetic params (Conv2d default uniform init), NCHW/OIHW layout."""
    diff = abs(out_dim - in_dim)
    dims = [in_dim,
            in_dim - diff // 4,
            in_dim - diff // 2,
            in_dim - diff * 3 // 4,
            out_dim]
    params = []
    for i in range(4):
        cin, cout = dims[i], dims[i + 1]
        key, kw, kb = jax.random.split(key, 3)
        bound = 1.0 / float((cin * 9) ** 0.5)
        w_pt = jax.random.uniform(kw, (cout, cin, 3, 3), jnp.float32, -bound, bound)
        b = jax.random.uniform(kb, (cout,), jnp.float32, -bound, bound)
        params.append((w_pt, b))
    return params


def pack_params(params):
    """Pack per-layer (Cout,Cin,3,3)/(Cout,) into channel-padded fat-K kernel layout."""
    dims = [params[0][0].shape[1]] + [w.shape[0] for (w, _) in params]
    cp = -(-max(dims) // 8) * 8                              # round up to multiple of 8
    n_layers = len(params)
    w_all = jnp.zeros((n_layers, cp, 9 * cp), jnp.float32)
    b_all = jnp.zeros((n_layers, cp, 1), jnp.float32)
    for l, (w_pt, b) in enumerate(params):
        cout, cin = w_pt.shape[0], w_pt.shape[1]
        # (Cout,Cin,3,3) -> (3,3,Cout,Cin) -> (9,Cout,Cin), k = dy*3 + dx
        w9 = jnp.transpose(w_pt, (2, 3, 0, 1)).reshape(9, cout, cin)
        w9p = jnp.zeros((9, cp, cp), jnp.float32).at[:, :cout, :cin].set(w9)
        # -> (CP, 9, CP) -> (CP, 9*CP):  W_fat[co, k*CP + ci] = W[co, ci, dy, dx]
        w_all = w_all.at[l].set(jnp.transpose(w9p, (1, 0, 2)).reshape(cp, 9 * cp))
        b_all = b_all.at[l, :cout, 0].set(b)
    return w_all, b_all, cp


def _reference(x_nchw, params):
    x = jnp.transpose(x_nchw, (0, 2, 3, 1))                  # NCHW -> NHWC
    for i, (w_pt, b) in enumerate(params):
        w_hwio = jnp.transpose(w_pt, (2, 3, 1, 0))
        x = lax.conv_general_dilated(
            x, w_hwio, (1, 1), "SAME",
            dimension_numbers=("NHWC", "HWIO", "NHWC"),
            precision=lax.Precision.HIGHEST) + b
        if i < len(params) - 1:
            x = jax.nn.gelu(x, approximate=False)
        else:
            x = 0.5 * jnp.tanh(x)
    return jnp.transpose(x, (0, 3, 1, 2))                    # NHWC -> NCHW


if __name__ == "__main__":
    in_dim, out_dim = 32, 16       # channel schedule: 32 -> 28 -> 24 -> 20 -> 16
    key = jax.random.PRNGKey(0)
    kx, kp = jax.random.split(key)
    x = jax.random.normal(kx, (2, in_dim, 16, 16), jnp.float32)   # NCHW like PyTorch
    params = init_params(kp, in_dim, out_dim)
    w_all, b_all, _ = pack_params(params)

    out = latent_residual_prediction(x, w_all, b_all, out_dim=out_dim)
    out = jax.block_until_ready(out)

    ref = _reference(x, params)
    assert out.shape == (2, out_dim, 16, 16)
    assert jnp.allclose(out, ref, atol=1e-3, rtol=1e-3)
    print("KERNEL_OK")
</pallas_src>

<mosaic_0001>
module attributes {stable_mosaic.version = 11 : i64} {
  func.func @_lrp_kernel(%arg0: i32, %arg1: memref<1x32x256xf32, #tpu.memory_space<vmem>>, %arg2: memref<4x32x288xf32, #tpu.memory_space<vmem>>, %arg3: memref<4x32x1xf32, #tpu.memory_space<vmem>>, %arg4: memref<1x16x256xf32, #tpu.memory_space<vmem>>, %arg5: memref<288x256xf32, #tpu.memory_space<vmem>>) attributes {dimension_semantics = [#tpu.dimension_semantics<parallel>], iteration_bounds = array<i64: 2>, scalar_prefetch = 0 : i64, scratch_operands = 1 : i64, tpu.core_type = #tpu.core_type<tc>, window_params = [{transform_indices = @transform_0, window_bounds = array<i64: 1, 32, 256>}, {pipeline_mode = #tpu.pipeline_mode<synchronous>, transform_indices = @transform_1, window_bounds = array<i64: 4, 32, 288>}, {pipeline_mode = #tpu.pipeline_mode<synchronous>, transform_indices = @transform_2, window_bounds = array<i64: 4, 32, 1>}, {transform_indices = @transform_3, window_bounds = array<i64: 1, 16, 256>}]} {
    %c0 = arith.constant 0 : index
    %c0_0 = arith.constant 0 : index
    %c0_1 = arith.constant 0 : index
    %0 = vector.load %arg1[%c0, %c0_0, %c0_1] : memref<1x32x256xf32, #tpu.memory_space<vmem>>, vector<1x32x256xf32>
    %1 = vector.shape_cast %0 : vector<1x32x256xf32> to vector<32x256xf32>
    %2 = tpu.iota {dimensions = array<i32: 1>} : vector<32x256xi32>
    %c16_i32 = arith.constant 16 : i32
    %c0_i32 = arith.constant 0 : i32
    %3 = arith.cmpi eq, %c16_i32, %c0_i32 : i32
    %c1_i32 = arith.constant 1 : i32
    %4 = arith.select %3, %c1_i32, %c16_i32 : i32
    %5 = vector.broadcast %4 : i32 to vector<32x256xi32>
    %6 = arith.remsi %2, %5 : vector<32x256xi32>
    %c0_i32_2 = arith.constant 0 : i32
    %7 = vector.broadcast %c0_i32_2 : i32 to vector<32x256xi32>
    %8 = arith.cmpi ne, %6, %7 : vector<32x256xi32>
    %c0_i32_3 = arith.constant 0 : i32
    %9 = vector.broadcast %c0_i32_3 : i32 to vector<32x256xi32>
    %10 = arith.cmpi slt, %6, %9 : vector<32x256xi32>
    %c0_i32_4 = arith.constant 0 : i32
    %11 = arith.cmpi slt, %4, %c0_i32_4 : i32
    %12 = vector.broadcast %11 : i1 to vector<32x256xi1>
    %13 = vector.broadcast %12 : vector<32x256xi1> to vector<32x256xi1>
    %14 = arith.xori %10, %13 : vector<32x256xi1>
    %15 = arith.andi %14, %8 : vector<32x256xi1>
    %16 = vector.broadcast %4 : i32 to vector<32x256xi32>
    %17 = arith.addi %6, %16 : vector<32x256xi32>
    %18 = arith.select %15, %17, %6 : vector<32x256xi1>, vector<32x256xi32>
    %c17_i32 = arith.constant 17 : i32
    %19 = tpu.dynamic_rotate %1 by %c17_i32 dim 1 : vector<32x256xf32>, i32 -> vector<32x256xf32>
    %c16_i32_5 = arith.constant 16 : i32
    %20 = vector.broadcast %c16_i32_5 : i32 to vector<32x256xi32>
    %21 = arith.cmpi sge, %2, %20 : vector<32x256xi32>
    %c1_i32_6 = arith.constant 1 : i32
    %22 = vector.broadcast %c1_i32_6 : i32 to vector<32x256xi32>
    %23 = arith.cmpi sge, %18, %22 : vector<32x256xi32>
    %24 = arith.andi %21, %23 : vector<32x256xi1>
    %cst = arith.constant 0.000000e+00 : f32
    %25 = vector.broadcast %cst : f32 to vector<32x256xf32>
    %26 = arith.select %24, %19, %25 : vector<32x256xi1>, vector<32x256xf32>
    %c0_7 = arith.constant 0 : index
    %c0_8 = arith.constant 0 : index
    %27 = vector.load %arg5[%c0_7, %c0_8] : memref<288x256xf32, #tpu.memory_space<vmem>>, vector<32x256xf32>
    tpu.vector_store %arg5[%c0_7, %c0_8], %26 {strides = array<i32>} : memref<288x256xf32, #tpu.memory_space<vmem>>, vector<32x256xf32>,
    %c16_i32_9 = arith.constant 16 : i32
    %28 = tpu.dynamic_rotate %1 by %c16_i32_9 dim 1 : vector<32x256xf32>, i32 -> vector<32x256xf32>
    %c16_i32_10 = arith.constant 16 : i32
    %29 = vector.broadcast %c16_i32_10 : i32 to vector<32x256xi32>
    %30 = arith.cmpi sge, %2, %29 : vector<32x256xi32>
    %cst_11 = arith.constant 0.000000e+00 : f32
    %31 = vector.broadcast %cst_11 : f32 to vector<32x256xf32>
    %32 = arith.select %30, %28, %31 : vector<32x256xi1>, vector<32x256xf32>
    %c32 = arith.constant 32 : index
    %c0_12 = arith.constant 0 : index
    %33 = vector.load %arg5[%c32, %c0_12] : memref<288x256xf32, #tpu.memory_space<vmem>>, vector<32x256xf32>
    tpu.vector_store %arg5[%c32, %c0_12], %32 {strides = array<i32>} : memref<288x256xf32, #tpu.memory_space<vmem>>, vector<32x256xf32>,
    %c15_i32 = arith.constant 15 : i32
    %34 = tpu.dynamic_rotate %1 by %c15_i32 dim 1 : vector<32x256xf32>, i32 -> vector<32x256xf32>
    %c16_i32_13 = arith.constant 16 : i32
    %35 = vector.broadcast %c16_i32_13 : i32 to vector<32x256xi32>
    %36 = arith.cmpi sge, %2, %35 : vector<32x256xi32>
    %c15_i32_14 = arith.constant 15 : i32
    %37 = vector.broadcast %c15_i32_14 : i32 to vector<32x256xi32>
    %38 = arith.cmpi slt, %18, %37 : vector<32x256xi32>
    %39 = arith.andi %36, %38 : vector<32x256xi1>
    %cst_15 = arith.constant 0.000000e+00 : f32
    %40 = vector.broadcast %cst_15 : f32 to vector<32x256xf32>
    %41 = arith.select %39, %34, %40 : vector<32x256xi1>, vector<32x256xf32>
    %c64 = arith.constant 64 : index
    %c0_16 = arith.constant 0 : index
    %42 = vector.load %arg5[%c64, %c0_16] : memref<288x256xf32, #tpu.memory_space<vmem>>, vector<32x256xf32>
    tpu.vector_store %arg5[%c64, %c0_16], %41 {strides = array<i32>} : memref<288x256xf32, #tpu.memory_space<vmem>>, vector<32x256xf32>,
    %c1_i32_17 = arith.constant 1 : i32
    %43 = tpu.dynamic_rotate %1 by %c1_i32_17 dim 1 : vector<32x256xf32>, i32 -> vector<32x256xf32>
    %c1_i32_18 = arith.constant 1 : i32
    %44 = vector.broadcast %c1_i32_18 : i32 to vector<32x256xi32>
    %45 = arith.cmpi sge, %18, %44 : vector<32x256xi32>
    %cst_19 = arith.constant 0.000000e+00 : f32
    %46 = vector.broadcast %cst_19 : f32 to vector<32x256xf32>
    %47 = arith.select %45, %43, %46 : vector<32x256xi1>, vector<32x256xf32>
    %c96 = arith.constant 96 : index
    %c0_20 = arith.constant 0 : index
    %48 = vector.load %arg5[%c96, %c0_20] : memref<288x256xf32, #tpu.memory_space<vmem>>, vector<32x256xf32>
    tpu.vector_store %arg5[%c96, %c0_20], %47 {strides = array<i32>} : memref<288x256xf32, #tpu.memory_space<vmem>>, vector<32x256xf32>,
    %c128 = arith.constant 128 : index
    %c0_21 = arith.constant 0 : index
    %49 = vector.load %arg5[%c128, %c0_21] : memref<288x256xf32, #tpu.memory_space<vmem>>, vector<32x256xf32>
    tpu.vector_store %arg5[%c128, %c0_21], %1 {strides = array<i32>} : memref<288x256xf32, #tpu.memory_space<vmem>>, vector<32x256xf32>,
    %c255_i32 = arith.constant 255 : i32
    %50 = tpu.dynamic_rotate %1 by %c255_i32 dim 1 : vector<32x256xf32>, i32 -> vector<32x256xf32>
    %c15_i32_22 = arith.constant 15 : i32
    %51 = vector.broadcast %c15_i32_22 : i32 to vector<32x256xi32>
    %52 = arith.cmpi slt, %18, %51 : vector<32x256xi32>
    %cst_23 = arith.constant 0.000000e+00 : f32
    %53 = vector.broadcast %cst_23 : f32 to vector<32x256xf32>
    %54 = arith.select %52, %50, %53 : vector<32x256xi1>, vector<32x256xf32>
    %c160 = arith.constant 160 : index
    %c0_24 = arith.constant 0 : index
    %55 = vector.load %arg5[%c160, %c0_24] : memref<288x256xf32, #tpu.memory_space<vmem>>, vector<32x256xf32>
    tpu.vector_store %arg5[%c160, %c0_24], %54 {strides = array<i32>} : memref<288x256xf32, #tpu.memory_space<vmem>>, vector<32x256xf32>,
    %c241_i32 = arith.constant 241 : i32
    %56 = tpu.dynamic_rotate %1 by %c241_i32 dim 1 : vector<32x256xf32>, i32 -> vector<32x256xf32>
    %c240_i32 = arith.constant 240 : i32
    %57 = vector.broadcast %c240_i32 : i32 to vector<32x256xi32>
    %58 = arith.cmpi slt, %2, %57 : vector<32x256xi32>
    %c1_i32_25 = arith.constant 1 : i32
    %59 = vector.broadcast %c1_i32_25 : i32 to vector<32x256xi32>
    %60 = arith.cmpi sge, %18, %59 : vector<32x256xi32>
    %61 = arith.andi %58, %60 : vector<32x256xi1>
    %cst_26 = arith.constant 0.000000e+00 : f32
    %62 = vector.broadcast %cst_26 : f32 to vector<32x256xf32>
    %63 = arith.select %61, %56, %62 : vector<32x256xi1>, vector<32x256xf32>
    %c192 = arith.constant 192 : index
    %c0_27 = arith.constant 0 : index
    %64 = vector.load %arg5[%c192, %c0_27] : memref<288x256xf32, #tpu.memory_space<vmem>>, vector<32x256xf32>
    tpu.vector_store %arg5[%c192, %c0_27], %63 {strides = array<i32>} : memref<288x256xf32, #tpu.memory_space<vmem>>, vector<32x256xf32>,
    %c240_i32_28 = arith.constant 240 : i32
    %65 = tpu.dynamic_rotate %1 by %c240_i32_28 dim 1 : vector<32x256xf32>, i32 -> vector<32x256xf32>
    %c240_i32_29 = arith.constant 240 : i32
    %66 = vector.broadcast %c240_i32_29 : i32 to vector<32x256xi32>
    %67 = arith.cmpi slt, %2, %66 : vector<32x256xi32>
    %cst_30 = arith.constant 0.000000e+00 : f32
    %68 = vector.broadcast %cst_30 : f32 to vector<32x256xf32>
    %69 = arith.select %67, %65, %68 : vector<32x256xi1>, vector<32x256xf32>
    %c224 = arith.constant 224 : index
    %c0_31 = arith.constant 0 : index
    %70 = vector.load %arg5[%c224, %c0_31] : memref<288x256xf32, #tpu.memory_space<vmem>>, vector<32x256xf32>
    tpu.vector_store %arg5[%c224, %c0_31], %69 {strides = array<i32>} : memref<288x256xf32, #tpu.memory_space<vmem>>, vector<32x256xf32>,
    %c239_i32 = arith.constant 239 : i32
    %71 = tpu.dynamic_rotate %1 by %c239_i32 dim 1 : vector<32x256xf32>, i32 -> vector<32x256xf32>
    %c240_i32_32 = arith.constant 240 : i32
    %72 = vector.broadcast %c240_i32_32 : i32 to vector<32x256xi32>
    %73 = arith.cmpi slt, %2, %72 : vector<32x256xi32>
    %c15_i32_33 = arith.constant 15 : i32
    %74 = vector.broadcast %c15_i32_33 : i32 to vector<32x256xi32>
    %75 = arith.cmpi slt, %18, %74 : vector<32x256xi32>
    %76 = arith.andi %73, %75 : vector<32x256xi1>
    %cst_34 = arith.constant 0.000000e+00 : f32
    %77 = vector.broadcast %cst_34 : f32 to vector<32x256xf32>
    %78 = arith.select %76, %71, %77 : vector<32x256xi1>, vector<32x256xf32>
    %c256 = arith.constant 256 : index
    %c0_35 = arith.constant 0 : index
    %79 = vector.load %arg5[%c256, %c0_35] : memref<288x256xf32, #tpu.memory_space<vmem>>, vector<32x256xf32>
    tpu.vector_store %arg5[%c256, %c0_35], %78 {strides = array<i32>} : memref<288x256xf32, #tpu.memory_space<vmem>>, vector<32x256xf32>,
    %c0_36 = arith.constant 0 : index
    %c0_37 = arith.constant 0 : index
    %c0_38 = arith.constant 0 : index
    %80 = vector.load %arg2[%c0_36, %c0_37, %c0_38] : memref<4x32x288xf32, #tpu.memory_space<vmem>>, vector<1x32x288xf32>
    %81 = vector.shape_cast %80 : vector<1x32x288xf32> to vector<32x288xf32>
    %c0_39 = arith.constant 0 : index
    %c0_40 = arith.constant 0 : index
    %82 = vector.load %arg5[%c0_39, %c0_40] : memref<288x256xf32, #tpu.memory_space<vmem>>, vector<288x256xf32>
    %cst_41 = arith.constant dense<0.000000e+00> : vector<32x256xf32>
    %83 = tpu.matmul %81, %82, %cst_41 {dimension_numbers = #tpu.dot_dimension_numbers<[1], [0], [0], [1], [0, 0, 1, 1], [], []>} : vector<32x288xf32>, vector<288x256xf32>, vector<32x256xf32> -> vector<32x256xf32>
    %c0_42 = arith.constant 0 : index
    %c0_43 = arith.constant 0 : index
    %c0_44 = arith.constant 0 : index
    %84 = vector.load %arg3[%c0_42, %c0_43, %c0_44] : memref<4x32x1xf32, #tpu.memory_space<vmem>>, vector<1x32x1xf32>
    %85 = vector.shape_cast %84 : vector<1x32x1xf32> to vector<32x1xf32>
    %86 = vector.broadcast %85 : vector<32x1xf32> to vector<32x256xf32>
    %87 = arith.addf %83, %86 : vector<32x256xf32>
    %cst_45 = arith.constant 5.000000e-01 : f32
    %88 = vector.broadcast %cst_45 : f32 to vector<32x256xf32>
    %89 = arith.mulf %88, %87 : vector<32x256xf32>
    %cst_46 = arith.constant 0.707106769 : f32
    %90 = vector.broadcast %cst_46 : f32 to vector<32x256xf32>
    %91 = arith.mulf %87, %90 : vector<32x256xf32>
    %cst_47 = arith.constant 0.000000e+00 : f32
    %92 = vector.broadcast %cst_47 : f32 to vector<32x256xf32>
    %93 = arith.cmpf oge, %91, %92 : vector<32x256xf32>
    %cst_48 = arith.constant 1.000000e+00 : f32
    %cst_49 = arith.constant -1.000000e+00 : f32
    %94 = vector.broadcast %cst_48 : f32 to vector<32x256xf32>
    %95 = vector.broadcast %cst_49 : f32 to vector<32x256xf32>
    %96 = arith.select %93, %94, %95 : vector<32x256xi1>, vector<32x256xf32>
    %97 = math.absf %91 : vector<32x256xf32>
    %cst_50 = arith.constant 0.327591091 : f32
    %98 = vector.broadcast %cst_50 : f32 to vector<32x256xf32>
    %99 = arith.mulf %98, %97 : vector<32x256xf32>
    %cst_51 = arith.constant 1.000000e+00 : f32
    %100 = vector.broadcast %cst_51 : f32 to vector<32x256xf32>
    %101 = arith.addf %100, %99 : vector<32x256xf32>
    %102 = tpu.reciprocal %101 {approx = true} : vector<32x256xf32> -> vector<32x256xf32>
    %cst_52 = arith.constant 1.06140542 : f32
    %103 = vector.broadcast %cst_52 : f32 to vector<32x256xf32>
    %104 = arith.mulf %103, %102 : vector<32x256xf32>
    %cst_53 = arith.constant -1.45315206 : f32
    %105 = vector.broadcast %cst_53 : f32 to vector<32x256xf32>
    %106 = arith.addf %104, %105 : vector<32x256xf32>
    %107 = arith.mulf %106, %102 : vector<32x256xf32>
    %cst_54 = arith.constant 1.42141378 : f32
    %108 = vector.broadcast %cst_54 : f32 to vector<32x256xf32>
    %109 = arith.addf %107, %108 : vector<32x256xf32>
    %110 = arith.mulf %109, %102 : vector<32x256xf32>
    %cst_55 = arith.constant -0.284496725 : f32
    %111 = vector.broadcast %cst_55 : f32 to vector<32x256xf32>
    %112 = arith.addf %110, %111 : vector<32x256xf32>
    %113 = arith.mulf %112, %102 : vector<32x256xf32>
    %cst_56 = arith.constant 0.254829586 : f32
    %114 = vector.broadcast %cst_56 : f32 to vector<32x256xf32>
    %115 = arith.addf %113, %114 : vector<32x256xf32>
    %116 = arith.mulf %115, %102 : vector<32x256xf32>
    %cst_57 = arith.constant 0.000000e+00 : f32
    %117 = vector.broadcast %cst_57 : f32 to vector<32x256xf32>
    %118 = arith.subf %117, %97 : vector<32x256xf32>
    %119 = arith.mulf %118, %97 : vector<32x256xf32>
    %120 = math.exp %119 : vector<32x256xf32>
    %121 = arith.mulf %116, %120 : vector<32x256xf32>
    %cst_58 = arith.constant 1.000000e+00 : f32
    %122 = vector.broadcast %cst_58 : f32 to vector<32x256xf32>
    %123 = arith.subf %122, %121 : vector<32x256xf32>
    %124 = arith.mulf %96, %123 : vector<32x256xf32>
    %cst_59 = arith.constant 1.000000e+00 : f32
    %125 = vector.broadcast %cst_59 : f32 to vector<32x256xf32>
    %126 = arith.addf %125, %124 : vector<32x256xf32>
    %127 = arith.mulf %89, %126 : vector<32x256xf32>
    %c17_i32_60 = arith.constant 17 : i32
    %128 = tpu.dynamic_rotate %127 by %c17_i32_60 dim 1 : vector<32x256xf32>, i32 -> vector<32x256xf32>
    %c16_i32_61 = arith.constant 16 : i32
    %129 = vector.broadcast %c16_i32_61 : i32 to vector<32x256xi32>
    %130 = arith.cmpi sge, %2, %129 : vector<32x256xi32>
    %c1_i32_62 = arith.constant 1 : i32
    %131 = vector.broadcast %c1_i32_62 : i32 to vector<32x256xi32>
    %132 = arith.cmpi sge, %18, %131 : vector<32x256xi32>
    %133 = arith.andi %130, %132 : vector<32x256xi1>
    %cst_63 = arith.constant 0.000000e+00 : f32
    %134 = vector.broadcast %cst_63 : f32 to vector<32x256xf32>
    %135 = arith.select %133, %128, %134 : vector<32x256xi1>, vector<32x256xf32>
    %c0_64 = arith.constant 0 : index
    %c0_65 = arith.constant 0 : index
    %136 = vector.load %arg5[%c0_64, %c0_65] : memref<288x256xf32, #tpu.memory_space<vmem>>, vector<32x256xf32>
    tpu.vector_store %arg5[%c0_64, %c0_65], %135 {strides = array<i32>} : memref<288x256xf32, #tpu.memory_space<vmem>>, vector<32x256xf32>,
    %c16_i32_66 = arith.constant 16 : i32
    %137 = tpu.dynamic_rotate %127 by %c16_i32_66 dim 1 : vector<32x256xf32>, i32 -> vector<32x256xf32>
    %c16_i32_67 = arith.constant 16 : i32
    %138 = vector.broadcast %c16_i32_67 : i32 to vector<32x256xi32>
    %139 = arith.cmpi sge, %2, %138 : vector<32x256xi32>
    %cst_68 = arith.constant 0.000000e+00 : f32
    %140 = vector.broadcast %cst_68 : f32 to vector<32x256xf32>
    %141 = arith.select %139, %137, %140 : vector<32x256xi1>, vector<32x256xf32>
    %c32_69 = arith.constant 32 : index
    %c0_70 = arith.constant 0 : index
    %142 = vector.load %arg5[%c32_69, %c0_70] : memref<288x256xf32, #tpu.memory_space<vmem>>, vector<32x256xf32>
    tpu.vector_store %arg5[%c32_69, %c0_70], %141 {strides = array<i32>} : memref<288x256xf32, #tpu.memory_space<vmem>>, vector<32x256xf32>,
    %c15_i32_71 = arith.constant 15 : i32
    %143 = tpu.dynamic_rotate %127 by %c15_i32_71 dim 1 : vector<32x256xf32>, i32 -> vector<32x256xf32>
    %c16_i32_72 = arith.constant 16 : i32
    %144 = vector.broadcast %c16_i32_72 : i32 to vector<32x256xi32>
    %145 = arith.cmpi sge, %2, %144 : vector<32x256xi32>
    %c15_i32_73 = arith.constant 15 : i32
    %146 = vector.broadcast %c15_i32_73 : i32 to vector<32x256xi32>
    %147 = arith.cmpi slt, %18, %146 : vector<32x256xi32>
    %148 = arith.andi %145, %147 : vector<32x256xi1>
    %cst_74 = arith.constant 0.000000e+00 : f32
    %149 = vector.broadcast %cst_74 : f32 to vector<32x256xf32>
    %150 = arith.select %148, %143, %149 : vector<32x256xi1>, vector<32x256xf32>
    %c64_75 = arith.constant 64 : index
    %c0_76 = arith.constant 0 : index
    %151 = vector.load %arg5[%c64_75, %c0_76] : memref<288x256xf32, #tpu.memory_space<vmem>>, vector<32x256xf32>
    tpu.vector_store %arg5[%c64_75, %c0_76], %150 {strides = array<i32>} : memref<288x256xf32, #tpu.memory_space<vmem>>, vector<32x256xf32>,
    %c1_i32_77 = arith.constant 1 : i32
    %152 = tpu.dynamic_rotate %127 by %c1_i32_77 dim 1 : vector<32x256xf32>, i32 -> vector<32x256xf32>
    %c1_i32_78 = arith.constant 1 : i32
    %153 = vector.broadcast %c1_i32_78 : i32 to vector<32x256xi32>
    %154 = arith.cmpi sge, %18, %153 : vector<32x256xi32>
    %cst_79 = arith.constant 0.000000e+00 : f32
    %155 = vector.broadcast %cst_79 : f32 to vector<32x256xf32>
    %156 = arith.select %154, %152, %155 : vector<32x256xi1>, vector<32x256xf32>
    %c96_80 = arith.constant 96 : index
    %c0_81 = arith.constant 0 : index
    %157 = vector.load %arg5[%c96_80, %c0_81] : memref<288x256xf32, #tpu.memory_space<vmem>>, vector<32x256xf32>
    tpu.vector_store %arg5[%c96_80, %c0_81], %156 {strides = array<i32>} : memref<288x256xf32, #tpu.memory_space<vmem>>, vector<32x256xf32>,
    %c128_82 = arith.constant 128 : index
    %c0_83 = arith.constant 0 : index
    %158 = vector.load %arg5[%c128_82, %c0_83] : memref<288x256xf32, #tpu.memory_space<vmem>>, vector<32x256xf32>
    tpu.vector_store %arg5[%c128_82, %c0_83], %127 {strides = array<i32>} : memref<288x256xf32, #tpu.memory_space<vmem>>, vector<32x256xf32>,
    %c255_i32_84 = arith.constant 255 : i32
    %159 = tpu.dynamic_rotate %127 by %c255_i32_84 dim 1 : vector<32x256xf32>, i32 -> vector<32x256xf32>
    %c15_i32_85 = arith.constant 15 : i32
    %160 = vector.broadcast %c15_i32_85 : i32 to vector<32x256xi32>
    %161 = arith.cmpi slt, %18, %160 : vector<32x256xi32>
    %cst_86 = arith.constant 0.000000e+00 : f32
    %162 = vector.broadcast %cst_86 : f32 to vector<32x256xf32>
    %163 = arith.select %161, %159, %162 : vector<32x256xi1>, vector<32x256xf32>
    %c160_87 = arith.constant 160 : index
    %c0_88 = arith.constant 0 : index
    %164 = vector.load %arg5[%c160_87, %c0_88] : memref<288x256xf32, #tpu.memory_space<vmem>>, vector<32x256xf32>
    tpu.vector_store %arg5[%c160_87, %c0_88], %163 {strides = array<i32>} : memref<288x256xf32, #tpu.memory_space<vmem>>, vector<32x256xf32>,
    %c241_i32_89 = arith.constant 241 : i32
    %165 = tpu.dynamic_rotate %127 by %c241_i32_89 dim 1 : vector<32x256xf32>, i32 -> vector<32x256xf32>
    %c240_i32_90 = arith.constant 240 : i32
    %166 = vector.broadcast %c240_i32_90 : i32 to vector<32x256xi32>
    %167 = arith.cmpi slt, %2, %166 : vector<32x256xi32>
    %c1_i32_91 = arith.constant 1 : i32
    %168 = vector.broadcast %c1_i32_91 : i32 to vector<32x256xi32>
    %169 = arith.cmpi sge, %18, %168 : vector<32x256xi32>
    %170 = arith.andi %167, %169 : vector<32x256xi1>
    %cst_92 = arith.constant 0.000000e+00 : f32
    %171 = vector.broadcast %cst_92 : f32 to vector<32x256xf32>
    %172 = arith.select %170, %165, %171 : vector<32x256xi1>, vector<32x256xf32>
    %c192_93 = arith.constant 192 : index
    %c0_94 = arith.constant 0 : index
    %173 = vector.load %arg5[%c192_93, %c0_94] : memref<288x256xf32, #tpu.memory_space<vmem>>, vector<32x256xf32>
    tpu.vector_store %arg5[%c192_93, %c0_94], %172 {strides = array<i32>} : memref<288x256xf32, #tpu.memory_space<vmem>>, vector<32x256xf32>,
    %c240_i32_95 = arith.constant 240 : i32
    %174 = tpu.dynamic_rotate %127 by %c240_i32_95 dim 1 : vector<32x256xf32>, i32 -> vector<32x256xf32>
    %c240_i32_96 = arith.constant 240 : i32
    %175 = vector.broadcast %c240_i32_96 : i32 to vector<32x256xi32>
    %176 = arith.cmpi slt, %2, %175 : vector<32x256xi32>
    %cst_97 = arith.constant 0.000000e+00 : f32
    %177 = vector.broadcast %cst_97 : f32 to vector<32x256xf32>
    %178 = arith.select %176, %174, %177 : vector<32x256xi1>, vector<32x256xf32>
    %c224_98 = arith.constant 224 : index
    %c0_99 = arith.constant 0 : index
    %179 = vector.load %arg5[%c224_98, %c0_99] : memref<288x256xf32, #tpu.memory_space<vmem>>, vector<32x256xf32>
    tpu.vector_store %arg5[%c224_98, %c0_99], %178 {strides = array<i32>} : memref<288x256xf32, #tpu.memory_space<vmem>>, vector<32x256xf32>,
    %c239_i32_100 = arith.constant 239 : i32
    %180 = tpu.dynamic_rotate %127 by %c239_i32_100 dim 1 : vector<32x256xf32>, i32 -> vector<32x256xf32>
    %c240_i32_101 = arith.constant 240 : i32
    %181 = vector.broadcast %c240_i32_101 : i32 to vector<32x256xi32>
    %182 = arith.cmpi slt, %2, %181 : vector<32x256xi32>
    %c15_i32_102 = arith.constant 15 : i32
    %183 = vector.broadcast %c15_i32_102 : i32 to vector<32x256xi32>
    %184 = arith.cmpi slt, %18, %183 : vector<32x256xi32>
    %185 = arith.andi %182, %184 : vector<32x256xi1>
    %cst_103 = arith.constant 0.000000e+00 : f32
    %186 = vector.broadcast %cst_103 : f32 to vector<32x256xf32>
    %187 = arith.select %185, %180, %186 : vector<32x256xi1>, vector<32x256xf32>
    %c256_104 = arith.constant 256 : index
    %c0_105 = arith.constant 0 : index
    %188 = vector.load %arg5[%c256_104, %c0_105] : memref<288x256xf32, #tpu.memory_space<vmem>>, vector<32x256xf32>
    tpu.vector_store %arg5[%c256_104, %c0_105], %187 {strides = array<i32>} : memref<288x256xf32, #tpu.memory_space<vmem>>, vector<32x256xf32>,
    %c1 = arith.constant 1 : index
    %c0_106 = arith.constant 0 : index
    %c0_107 = arith.constant 0 : index
    %189 = vector.load %arg2[%c1, %c0_106, %c0_107] : memref<4x32x288xf32, #tpu.memory_space<vmem>>, vector<1x32x288xf32>
    %190 = vector.shape_cast %189 : vector<1x32x288xf32> to vector<32x288xf32>
    %c0_108 = arith.constant 0 : index
    %c0_109 = arith.constant 0 : index
    %191 = vector.load %arg5[%c0_108, %c0_109] : memref<288x256xf32, #tpu.memory_space<vmem>>, vector<288x256xf32>
    %cst_110 = arith.constant dense<0.000000e+00> : vector<32x256xf32>
    %192 = tpu.matmul %190, %191, %cst_110 {dimension_numbers = #tpu.dot_dimension_numbers<[1], [0], [0], [1], [0, 0, 1, 1], [], []>} : vector<32x288xf32>, vector<288x256xf32>, vector<32x256xf32> -> vector<32x256xf32>
    %c1_111 = arith.constant 1 : index
    %c0_112 = arith.constant 0 : index
    %c0_113 = arith.constant 0 : index
    %193 = vector.load %arg3[%c1_111, %c0_112, %c0_113] : memref<4x32x1xf32, #tpu.memory_space<vmem>>, vector<1x32x1xf32>
    %194 = vector.shape_cast %193 : vector<1x32x1xf32> to vector<32x1xf32>
    %195 = vector.broadcast %194 : vector<32x1xf32> to vector<32x256xf32>
    %196 = arith.addf %192, %195 : vector<32x256xf32>
    %cst_114 = arith.constant 5.000000e-01 : f32
    %197 = vector.broadcast %cst_114 : f32 to vector<32x256xf32>
    %198 = arith.mulf %197, %196 : vector<32x256xf32>
    %cst_115 = arith.constant 0.707106769 : f32
    %199 = vector.broadcast %cst_115 : f32 to vector<32x256xf32>
    %200 = arith.mulf %196, %199 : vector<32x256xf32>
    %cst_116 = arith.constant 0.000000e+00 : f32
    %201 = vector.broadcast %cst_116 : f32 to vector<32x256xf32>
    %202 = arith.cmpf oge, %200, %201 : vector<32x256xf32>
    %cst_117 = arith.constant 1.000000e+00 : f32
    %cst_118 = arith.constant -1.000000e+00 : f32
    %203 = vector.broadcast %cst_117 : f32 to vector<32x256xf32>
    %204 = vector.broadcast %cst_118 : f32 to vector<32x256xf32>
    %205 = arith.select %202, %203, %204 : vector<32x256xi1>, vector<32x256xf32>
    %206 = math.absf %200 : vector<32x256xf32>
    %cst_119 = arith.constant 0.327591091 : f32
    %207 = vector.broadcast %cst_119 : f32 to vector<32x256xf32>
    %208 = arith.mulf %207, %206 : vector<32x256xf32>
    %cst_120 = arith.constant 1.000000e+00 : f32
    %209 = vector.broadcast %cst_120 : f32 to vector<32x256xf32>
    %210 = arith.addf %209, %208 : vector<32x256xf32>
    %211 = tpu.reciprocal %210 {approx = true} : vector<32x256xf32> -> vector<32x256xf32>
    %cst_121 = arith.constant 1.06140542 : f32
    %212 = vector.broadcast %cst_121 : f32 to vector<32x256xf32>
    %213 = arith.mulf %212, %211 : vector<32x256xf32>
    %cst_122 = arith.constant -1.45315206 : f32
    %214 = vector.broadcast %cst_122 : f32 to vector<32x256xf32>
    %215 = arith.addf %213, %214 : vector<32x256xf32>
    %216 = arith.mulf %215, %211 : vector<32x256xf32>
    %cst_123 = arith.constant 1.42141378 : f32
    %217 = vector.broadcast %cst_123 : f32 to vector<32x256xf32>
    %218 = arith.addf %216, %217 : vector<32x256xf32>
    %219 = arith.mulf %218, %211 : vector<32x256xf32>
    %cst_124 = arith.constant -0.284496725 : f32
    %220 = vector.broadcast %cst_124 : f32 to vector<32x256xf32>
    %221 = arith.addf %219, %220 : vector<32x256xf32>
    %222 = arith.mulf %221, %211 : vector<32x256xf32>
    %cst_125 = arith.constant 0.254829586 : f32
    %223 = vector.broadcast %cst_125 : f32 to vector<32x256xf32>
    %224 = arith.addf %222, %223 : vector<32x256xf32>
    %225 = arith.mulf %224, %211 : vector<32x256xf32>
    %cst_126 = arith.constant 0.000000e+00 : f32
    %226 = vector.broadcast %cst_126 : f32 to vector<32x256xf32>
    %227 = arith.subf %226, %206 : vector<32x256xf32>
    %228 = arith.mulf %227, %206 : vector<32x256xf32>
    %229 = math.exp %228 : vector<32x256xf32>
    %230 = arith.mulf %225, %229 : vector<32x256xf32>
    %cst_127 = arith.constant 1.000000e+00 : f32
    %231 = vector.broadcast %cst_127 : f32 to vector<32x256xf32>
    %232 = arith.subf %231, %230 : vector<32x256xf32>
    %233 = arith.mulf %205, %232 : vector<32x256xf32>
    %cst_128 = arith.constant 1.000000e+00 : f32
    %234 = vector.broadcast %cst_128 : f32 to vector<32x256xf32>
    %235 = arith.addf %234, %233 : vector<32x256xf32>
    %236 = arith.mulf %198, %235 : vector<32x256xf32>
    %c17_i32_129 = arith.constant 17 : i32
    %237 = tpu.dynamic_rotate %236 by %c17_i32_129 dim 1 : vector<32x256xf32>, i32 -> vector<32x256xf32>
    %c16_i32_130 = arith.constant 16 : i32
    %238 = vector.broadcast %c16_i32_130 : i32 to vector<32x256xi32>
    %239 = arith.cmpi sge, %2, %238 : vector<32x256xi32>
    %c1_i32_131 = arith.constant 1 : i32
    %240 = vector.broadcast %c1_i32_131 : i32 to vector<32x256xi32>
    %241 = arith.cmpi sge, %18, %240 : vector<32x256xi32>
    %242 = arith.andi %239, %241 : vector<32x256xi1>
    %cst_132 = arith.constant 0.000000e+00 : f32
    %243 = vector.broadcast %cst_132 : f32 to vector<32x256xf32>
    %244 = arith.select %242, %237, %243 : vector<32x256xi1>, vector<32x256xf32>
    %c0_133 = arith.constant 0 : index
    %c0_134 = arith.constant 0 : index
    %245 = vector.load %arg5[%c0_133, %c0_134] : memref<288x256xf32, #tpu.memory_space<vmem>>, vector<32x256xf32>
    tpu.vector_store %arg5[%c0_133, %c0_134], %244 {strides = array<i32>} : memref<288x256xf32, #tpu.memory_space<vmem>>, vector<32x256xf32>,
    %c16_i32_135 = arith.constant 16 : i32
    %246 = tpu.dynamic_rotate %236 by %c16_i32_135 dim 1 : vector<32x256xf32>, i32 -> vector<32x256xf32>
    %c16_i32_136 = arith.constant 16 : i32
    %247 = vector.broadcast %c16_i32_136 : i32 to vector<32x256xi32>
    %248 = arith.cmpi sge, %2, %247 : vector<32x256xi32>
    %cst_137 = arith.constant 0.000000e+00 : f32
    %249 = vector.broadcast %cst_137 : f32 to vector<32x256xf32>
    %250 = arith.select %248, %246, %249 : vector<32x256xi1>, vector<32x256xf32>
    %c32_138 = arith.constant 32 : index
    %c0_139 = arith.constant 0 : index
    %251 = vector.load %arg5[%c32_138, %c0_139] : memref<288x256xf32, #tpu.memory_space<vmem>>, vector<32x256xf32>
    tpu.vector_store %arg5[%c32_138, %c0_139], %250 {strides = array<i32>} : memref<288x256xf32, #tpu.memory_space<vmem>>, vector<32x256xf32>,
    %c15_i32_140 = arith.constant 15 : i32
    %252 = tpu.dynamic_rotate %236 by %c15_i32_140 dim 1 : vector<32x256xf32>, i32 -> vector<32x256xf32>
    %c16_i32_141 = arith.constant 16 : i32
    %253 = vector.broadcast %c16_i32_141 : i32 to vector<32x256xi32>
    %254 = arith.cmpi sge, %2, %253 : vector<32x256xi32>
    %c15_i32_142 = arith.constant 15 : i32
    %255 = vector.broadcast %c15_i32_142 : i32 to vector<32x256xi32>
    %256 = arith.cmpi slt, %18, %255 : vector<32x256xi32>
    %257 = arith.andi %254, %256 : vector<32x256xi1>
    %cst_143 = arith.constant 0.000000e+00 : f32
    %258 = vector.broadcast %cst_143 : f32 to vector<32x256xf32>
    %259 = arith.select %257, %252, %258 : vector<32x256xi1>, vector<32x256xf32>
    %c64_144 = arith.constant 64 : index
    %c0_145 = arith.constant 0 : index
    %260 = vector.load %arg5[%c64_144, %c0_145] : memref<288x256xf32, #tpu.memory_space<vmem>>, vector<32x256xf32>
    tpu.vector_store %arg5[%c64_144, %c0_145], %259 {strides = array<i32>} : memref<288x256xf32, #tpu.memory_space<vmem>>, vector<32x256xf32>,
    %c1_i32_146 = arith.constant 1 : i32
    %261 = tpu.dynamic_rotate %236 by %c1_i32_146 dim 1 : vector<32x256xf32>, i32 -> vector<32x256xf32>
    %c1_i32_147 = arith.constant 1 : i32
    %262 = vector.broadcast %c1_i32_147 : i32 to vector<32x256xi32>
    %263 = arith.cmpi sge, %18, %262 : vector<32x256xi32>
    %cst_148 = arith.constant 0.000000e+00 : f32
    %264 = vector.broadcast %cst_148 : f32 to vector<32x256xf32>
    %265 = arith.select %263, %261, %264 : vector<32x256xi1>, vector<32x256xf32>
    %c96_149 = arith.constant 96 : index
    %c0_150 = arith.constant 0 : index
    %266 = vector.load %arg5[%c96_149, %c0_150] : memref<288x256xf32, #tpu.memory_space<vmem>>, vector<32x256xf32>
    tpu.vector_store %arg5[%c96_149, %c0_150], %265 {strides = array<i32>} : memref<288x256xf32, #tpu.memory_space<vmem>>, vector<32x256xf32>,
    %c128_151 = arith.constant 128 : index
    %c0_152 = arith.constant 0 : index
    %267 = vector.load %arg5[%c128_151, %c0_152] : memref<288x256xf32, #tpu.memory_space<vmem>>, vector<32x256xf32>
    tpu.vector_store %arg5[%c128_151, %c0_152], %236 {strides = array<i32>} : memref<288x256xf32, #tpu.memory_space<vmem>>, vector<32x256xf32>,
    %c255_i32_153 = arith.constant 255 : i32
    %268 = tpu.dynamic_rotate %236 by %c255_i32_153 dim 1 : vector<32x256xf32>, i32 -> vector<32x256xf32>
    %c15_i32_154 = arith.constant 15 : i32
    %269 = vector.broadcast %c15_i32_154 : i32 to vector<32x256xi32>
    %270 = arith.cmpi slt, %18, %269 : vector<32x256xi32>
    %cst_155 = arith.constant 0.000000e+00 : f32
    %271 = vector.broadcast %cst_155 : f32 to vector<32x256xf32>
    %272 = arith.select %270, %268, %271 : vector<32x256xi1>, vector<32x256xf32>
    %c160_156 = arith.constant 160 : index
    %c0_157 = arith.constant 0 : index
    %273 = vector.load %arg5[%c160_156, %c0_157] : memref<288x256xf32, #tpu.memory_space<vmem>>, vector<32x256xf32>
    tpu.vector_store %arg5[%c160_156, %c0_157], %272 {strides = array<i32>} : memref<288x256xf32, #tpu.memory_space<vmem>>, vector<32x256xf32>,
    %c241_i32_158 = arith.constant 241 : i32
    %274 = tpu.dynamic_rotate %236 by %c241_i32_158 dim 1 : vector<32x256xf32>, i32 -> vector<32x256xf32>
    %c240_i32_159 = arith.constant 240 : i32
    %275 = vector.broadcast %c240_i32_159 : i32 to vector<32x256xi32>
    %276 = arith.cmpi slt, %2, %275 : vector<32x256xi32>
    %c1_i32_160 = arith.constant 1 : i32
    %277 = vector.broadcast %c1_i32_160 : i32 to vector<32x256xi32>
    %278 = arith.cmpi sge, %18, %277 : vector<32x256xi32>
    %279 = arith.andi %276, %278 : vector<32x256xi1>
    %cst_161 = arith.constant 0.000000e+00 : f32
    %280 = vector.broadcast %cst_161 : f32 to vector<32x256xf32>
    %281 = arith.select %279, %274, %280 : vector<32x256xi1>, vector<32x256xf32>
    %c192_162 = arith.constant 192 : index
    %c0_163 = arith.constant 0 : index
    %282 = vector.load %arg5[%c192_162, %c0_163] : memref<288x256xf32, #tpu.memory_space<vmem>>, vector<32x256xf32>
    tpu.vector_store %arg5[%c192_162, %c0_163], %281 {strides = array<i32>} : memref<288x256xf32, #tpu.memory_space<vmem>>, vector<32x256xf32>,
    %c240_i32_164 = arith.constant 240 : i32
    %283 = tpu.dynamic_rotate %236 by %c240_i32_164 dim 1 : vector<32x256xf32>, i32 -> vector<32x256xf32>
    %c240_i32_165 = arith.constant 240 : i32
    %284 = vector.broadcast %c240_i32_165 : i32 to vector<32x256xi32>
    %285 = arith.cmpi slt, %2, %284 : vector<32x256xi32>
    %cst_166 = arith.constant 0.000000e+00 : f32
    %286 = vector.broadcast %cst_166 : f32 to vector<32x256xf32>
    %287 = arith.select %285, %283, %286 : vector<32x256xi1>, vector<32x256xf32>
    %c224_167 = arith.constant 224 : index
    %c0_168 = arith.constant 0 : index
    %288 = vector.load %arg5[%c224_167, %c0_168] : memref<288x256xf32, #tpu.memory_space<vmem>>, vector<32x256xf32>
    tpu.vector_store %arg5[%c224_167, %c0_168], %287 {strides = array<i32>} : memref<288x256xf32, #tpu.memory_space<vmem>>, vector<32x256xf32>,
    %c239_i32_169 = arith.constant 239 : i32
    %289 = tpu.dynamic_rotate %236 by %c239_i32_169 dim 1 : vector<32x256xf32>, i32 -> vector<32x256xf32>
    %c240_i32_170 = arith.constant 240 : i32
    %290 = vector.broadcast %c240_i32_170 : i32 to vector<32x256xi32>
    %291 = arith.cmpi slt, %2, %290 : vector<32x256xi32>
    %c15_i32_171 = arith.constant 15 : i32
    %292 = vector.broadcast %c15_i32_171 : i32 to vector<32x256xi32>
    %293 = arith.cmpi slt, %18, %292 : vector<32x256xi32>
    %294 = arith.andi %291, %293 : vector<32x256xi1>
    %cst_172 = arith.constant 0.000000e+00 : f32
    %295 = vector.broadcast %cst_172 : f32 to vector<32x256xf32>
    %296 = arith.select %294, %289, %295 : vector<32x256xi1>, vector<32x256xf32>
    %c256_173 = arith.constant 256 : index
    %c0_174 = arith.constant 0 : index
    %297 = vector.load %arg5[%c256_173, %c0_174] : memref<288x256xf32, #tpu.memory_space<vmem>>, vector<32x256xf32>
    tpu.vector_store %arg5[%c256_173, %c0_174], %296 {strides = array<i32>} : memref<288x256xf32, #tpu.memory_space<vmem>>, vector<32x256xf32>,
    %c2 = arith.constant 2 : index
    %c0_175 = arith.constant 0 : index
    %c0_176 = arith.constant 0 : index
    %298 = vector.load %arg2[%c2, %c0_175, %c0_176] : memref<4x32x288xf32, #tpu.memory_space<vmem>>, vector<1x32x288xf32>
    %299 = vector.shape_cast %298 : vector<1x32x288xf32> to vector<32x288xf32>
    %c0_177 = arith.constant 0 : index
    %c0_178 = arith.constant 0 : index
    %300 = vector.load %arg5[%c0_177, %c0_178] : memref<288x256xf32, #tpu.memory_space<vmem>>, vector<288x256xf32>
    %cst_179 = arith.constant dense<0.000000e+00> : vector<32x256xf32>
    %301 = tpu.matmul %299, %300, %cst_179 {dimension_numbers = #tpu.dot_dimension_numbers<[1], [0], [0], [1], [0, 0, 1, 1], [], []>} : vector<32x288xf32>, vector<288x256xf32>, vector<32x256xf32> -> vector<32x256xf32>
    %c2_180 = arith.constant 2 : index
    %c0_181 = arith.constant 0 : index
    %c0_182 = arith.constant 0 : index
    %302 = vector.load %arg3[%c2_180, %c0_181, %c0_182] : memref<4x32x1xf32, #tpu.memory_space<vmem>>, vector<1x32x1xf32>
    %303 = vector.shape_cast %302 : vector<1x32x1xf32> to vector<32x1xf32>
    %304 = vector.broadcast %303 : vector<32x1xf32> to vector<32x256xf32>
    %305 = arith.addf %301, %304 : vector<32x256xf32>
    %cst_183 = arith.constant 5.000000e-01 : f32
    %306 = vector.broadcast %cst_183 : f32 to vector<32x256xf32>
    %307 = arith.mulf %306, %305 : vector<32x256xf32>
    %cst_184 = arith.constant 0.707106769 : f32
    %308 = vector.broadcast %cst_184 : f32 to vector<32x256xf32>
    %309 = arith.mulf %305, %308 : vector<32x256xf32>
    %cst_185 = arith.constant 0.000000e+00 : f32
    %310 = vector.broadcast %cst_185 : f32 to vector<32x256xf32>
    %311 = arith.cmpf oge, %309, %310 : vector<32x256xf32>
    %cst_186 = arith.constant 1.000000e+00 : f32
    %cst_187 = arith.constant -1.000000e+00 : f32
    %312 = vector.broadcast %cst_186 : f32 to vector<32x256xf32>
    %313 = vector.broadcast %cst_187 : f32 to vector<32x256xf32>
    %314 = arith.select %311, %312, %313 : vector<32x256xi1>, vector<32x256xf32>
    %315 = math.absf %309 : vector<32x256xf32>
    %cst_188 = arith.constant 0.327591091 : f32
    %316 = vector.broadcast %cst_188 : f32 to vector<32x256xf32>
    %317 = arith.mulf %316, %315 : vector<32x256xf32>
    %cst_189 = arith.constant 1.000000e+00 : f32
    %318 = vector.broadcast %cst_189 : f32 to vector<32x256xf32>
    %319 = arith.addf %318, %317 : vector<32x256xf32>
    %320 = tpu.reciprocal %319 {approx = true} : vector<32x256xf32> -> vector<32x256xf32>
    %cst_190 = arith.constant 1.06140542 : f32
    %321 = vector.broadcast %cst_190 : f32 to vector<32x256xf32>
    %322 = arith.mulf %321, %320 : vector<32x256xf32>
    %cst_191 = arith.constant -1.45315206 : f32
    %323 = vector.broadcast %cst_191 : f32 to vector<32x256xf32>
    %324 = arith.addf %322, %323 : vector<32x256xf32>
    %325 = arith.mulf %324, %320 : vector<32x256xf32>
    %cst_192 = arith.constant 1.42141378 : f32
    %326 = vector.broadcast %cst_192 : f32 to vector<32x256xf32>
    %327 = arith.addf %325, %326 : vector<32x256xf32>
    %328 = arith.mulf %327, %320 : vector<32x256xf32>
    %cst_193 = arith.constant -0.284496725 : f32
    %329 = vector.broadcast %cst_193 : f32 to vector<32x256xf32>
    %330 = arith.addf %328, %329 : vector<32x256xf32>
    %331 = arith.mulf %330, %320 : vector<32x256xf32>
    %cst_194 = arith.constant 0.254829586 : f32
    %332 = vector.broadcast %cst_194 : f32 to vector<32x256xf32>
    %333 = arith.addf %331, %332 : vector<32x256xf32>
    %334 = arith.mulf %333, %320 : vector<32x256xf32>
    %cst_195 = arith.constant 0.000000e+00 : f32
    %335 = vector.broadcast %cst_195 : f32 to vector<32x256xf32>
    %336 = arith.subf %335, %315 : vector<32x256xf32>
    %337 = arith.mulf %336, %315 : vector<32x256xf32>
    %338 = math.exp %337 : vector<32x256xf32>
    %339 = arith.mulf %334, %338 : vector<32x256xf32>
    %cst_196 = arith.constant 1.000000e+00 : f32
    %340 = vector.broadcast %cst_196 : f32 to vector<32x256xf32>
    %341 = arith.subf %340, %339 : vector<32x256xf32>
    %342 = arith.mulf %314, %341 : vector<32x256xf32>
    %cst_197 = arith.constant 1.000000e+00 : f32
    %343 = vector.broadcast %cst_197 : f32 to vector<32x256xf32>
    %344 = arith.addf %343, %342 : vector<32x256xf32>
    %345 = arith.mulf %307, %344 : vector<32x256xf32>
    %c17_i32_198 = arith.constant 17 : i32
    %346 = tpu.dynamic_rotate %345 by %c17_i32_198 dim 1 : vector<32x256xf32>, i32 -> vector<32x256xf32>
    %c16_i32_199 = arith.constant 16 : i32
    %347 = vector.broadcast %c16_i32_199 : i32 to vector<32x256xi32>
    %348 = arith.cmpi sge, %2, %347 : vector<32x256xi32>
    %c1_i32_200 = arith.constant 1 : i32
    %349 = vector.broadcast %c1_i32_200 : i32 to vector<32x256xi32>
    %350 = arith.cmpi sge, %18, %349 : vector<32x256xi32>
    %351 = arith.andi %348, %350 : vector<32x256xi1>
    %cst_201 = arith.constant 0.000000e+00 : f32
    %352 = vector.broadcast %cst_201 : f32 to vector<32x256xf32>
    %353 = arith.select %351, %346, %352 : vector<32x256xi1>, vector<32x256xf32>
    %c0_202 = arith.constant 0 : index
    %c0_203 = arith.constant 0 : index
    %354 = vector.load %arg5[%c0_202, %c0_203] : memref<288x256xf32, #tpu.memory_space<vmem>>, vector<32x256xf32>
    tpu.vector_store %arg5[%c0_202, %c0_203], %353 {strides = array<i32>} : memref<288x256xf32, #tpu.memory_space<vmem>>, vector<32x256xf32>,
    %c16_i32_204 = arith.constant 16 : i32
    %355 = tpu.dynamic_rotate %345 by %c16_i32_204 dim 1 : vector<32x256xf32>, i32 -> vector<32x256xf32>
    %c16_i32_205 = arith.constant 16 : i32
    %356 = vector.broadcast %c16_i32_205 : i32 to vector<32x256xi32>
    %357 = arith.cmpi sge, %2, %356 : vector<32x256xi32>
    %cst_206 = arith.constant 0.000000e+00 : f32
    %358 = vector.broadcast %cst_206 : f32 to vector<32x256xf32>
    %359 = arith.select %357, %355, %358 : vector<32x256xi1>, vector<32x256xf32>
    %c32_207 = arith.constant 32 : index
    %c0_208 = arith.constant 0 : index
    %360 = vector.load %arg5[%c32_207, %c0_208] : memref<288x256xf32, #tpu.memory_space<vmem>>, vector<32x256xf32>
    tpu.vector_store %arg5[%c32_207, %c0_208], %359 {strides = array<i32>} : memref<288x256xf32, #tpu.memory_space<vmem>>, vector<32x256xf32>,
    %c15_i32_209 = arith.constant 15 : i32
    %361 = tpu.dynamic_rotate %345 by %c15_i32_209 dim 1 : vector<32x256xf32>, i32 -> vector<32x256xf32>
    %c16_i32_210 = arith.constant 16 : i32
    %362 = vector.broadcast %c16_i32_210 : i32 to vector<32x256xi32>
    %363 = arith.cmpi sge, %2, %362 : vector<32x256xi32>
    %c15_i32_211 = arith.constant 15 : i32
    %364 = vector.broadcast %c15_i32_211 : i32 to vector<32x256xi32>
    %365 = arith.cmpi slt, %18, %364 : vector<32x256xi32>
    %366 = arith.andi %363, %365 : vector<32x256xi1>
    %cst_212 = arith.constant 0.000000e+00 : f32
    %367 = vector.broadcast %cst_212 : f32 to vector<32x256xf32>
    %368 = arith.select %366, %361, %367 : vector<32x256xi1>, vector<32x256xf32>
    %c64_213 = arith.constant 64 : index
    %c0_214 = arith.constant 0 : index
    %369 = vector.load %arg5[%c64_213, %c0_214] : memref<288x256xf32, #tpu.memory_space<vmem>>, vector<32x256xf32>
    tpu.vector_store %arg5[%c64_213, %c0_214], %368 {strides = array<i32>} : memref<288x256xf32, #tpu.memory_space<vmem>>, vector<32x256xf32>,
    %c1_i32_215 = arith.constant 1 : i32
    %370 = tpu.dynamic_rotate %345 by %c1_i32_215 dim 1 : vector<32x256xf32>, i32 -> vector<32x256xf32>
    %c1_i32_216 = arith.constant 1 : i32
    %371 = vector.broadcast %c1_i32_216 : i32 to vector<32x256xi32>
    %372 = arith.cmpi sge, %18, %371 : vector<32x256xi32>
    %cst_217 = arith.constant 0.000000e+00 : f32
    %373 = vector.broadcast %cst_217 : f32 to vector<32x256xf32>
    %374 = arith.select %372, %370, %373 : vector<32x256xi1>, vector<32x256xf32>
    %c96_218 = arith.constant 96 : index
    %c0_219 = arith.constant 0 : index
    %375 = vector.load %arg5[%c96_218, %c0_219] : memref<288x256xf32, #tpu.memory_space<vmem>>, vector<32x256xf32>
    tpu.vector_store %arg5[%c96_218, %c0_219], %374 {strides = array<i32>} : memref<288x256xf32, #tpu.memory_space<vmem>>, vector<32x256xf32>,
    %c128_220 = arith.constant 128 : index
    %c0_221 = arith.constant 0 : index
    %376 = vector.load %arg5[%c128_220, %c0_221] : memref<288x256xf32, #tpu.memory_space<vmem>>, vector<32x256xf32>
    tpu.vector_store %arg5[%c128_220, %c0_221], %345 {strides = array<i32>} : memref<288x256xf32, #tpu.memory_space<vmem>>, vector<32x256xf32>,
    %c255_i32_222 = arith.constant 255 : i32
    %377 = tpu.dynamic_rotate %345 by %c255_i32_222 dim 1 : vector<32x256xf32>, i32 -> vector<32x256xf32>
    %c15_i32_223 = arith.constant 15 : i32
    %378 = vector.broadcast %c15_i32_223 : i32 to vector<32x256xi32>
    %379 = arith.cmpi slt, %18, %378 : vector<32x256xi32>
    %cst_224 = arith.constant 0.000000e+00 : f32
    %380 = vector.broadcast %cst_224 : f32 to vector<32x256xf32>
    %381 = arith.select %379, %377, %380 : vector<32x256xi1>, vector<32x256xf32>
    %c160_225 = arith.constant 160 : index
    %c0_226 = arith.constant 0 : index
    %382 = vector.load %arg5[%c160_225, %c0_226] : memref<288x256xf32, #tpu.memory_space<vmem>>, vector<32x256xf32>
    tpu.vector_store %arg5[%c160_225, %c0_226], %381 {strides = array<i32>} : memref<288x256xf32, #tpu.memory_space<vmem>>, vector<32x256xf32>,
    %c241_i32_227 = arith.constant 241 : i32
    %383 = tpu.dynamic_rotate %345 by %c241_i32_227 dim 1 : vector<32x256xf32>, i32 -> vector<32x256xf32>
    %c240_i32_228 = arith.constant 240 : i32
    %384 = vector.broadcast %c240_i32_228 : i32 to vector<32x256xi32>
    %385 = arith.cmpi slt, %2, %384 : vector<32x256xi32>
    %c1_i32_229 = arith.constant 1 : i32
    %386 = vector.broadcast %c1_i32_229 : i32 to vector<32x256xi32>
    %387 = arith.cmpi sge, %18, %386 : vector<32x256xi32>
    %388 = arith.andi %385, %387 : vector<32x256xi1>
    %cst_230 = arith.constant 0.000000e+00 : f32
    %389 = vector.broadcast %cst_230 : f32 to vector<32x256xf32>
    %390 = arith.select %388, %383, %389 : vector<32x256xi1>, vector<32x256xf32>
    %c192_231 = arith.constant 192 : index
    %c0_232 = arith.constant 0 : index
    %391 = vector.load %arg5[%c192_231, %c0_232] : memref<288x256xf32, #tpu.memory_space<vmem>>, vector<32x256xf32>
    tpu.vector_store %arg5[%c192_231, %c0_232], %390 {strides = array<i32>} : memref<288x256xf32, #tpu.memory_space<vmem>>, vector<32x256xf32>,
    %c240_i32_233 = arith.constant 240 : i32
    %392 = tpu.dynamic_rotate %345 by %c240_i32_233 dim 1 : vector<32x256xf32>, i32 -> vector<32x256xf32>
    %c240_i32_234 = arith.constant 240 : i32
    %393 = vector.broadcast %c240_i32_234 : i32 to vector<32x256xi32>
    %394 = arith.cmpi slt, %2, %393 : vector<32x256xi32>
    %cst_235 = arith.constant 0.000000e+00 : f32
    %395 = vector.broadcast %cst_235 : f32 to vector<32x256xf32>
    %396 = arith.select %394, %392, %395 : vector<32x256xi1>, vector<32x256xf32>
    %c224_236 = arith.constant 224 : index
    %c0_237 = arith.constant 0 : index
    %397 = vector.load %arg5[%c224_236, %c0_237] : memref<288x256xf32, #tpu.memory_space<vmem>>, vector<32x256xf32>
    tpu.vector_store %arg5[%c224_236, %c0_237], %396 {strides = array<i32>} : memref<288x256xf32, #tpu.memory_space<vmem>>, vector<32x256xf32>,
    %c239_i32_238 = arith.constant 239 : i32
    %398 = tpu.dynamic_rotate %345 by %c239_i32_238 dim 1 : vector<32x256xf32>, i32 -> vector<32x256xf32>
    %c240_i32_239 = arith.constant 240 : i32
    %399 = vector.broadcast %c240_i32_239 : i32 to vector<32x256xi32>
    %400 = arith.cmpi slt, %2, %399 : vector<32x256xi32>
    %c15_i32_240 = arith.constant 15 : i32
    %401 = vector.broadcast %c15_i32_240 : i32 to vector<32x256xi32>
    %402 = arith.cmpi slt, %18, %401 : vector<32x256xi32>
    %403 = arith.andi %400, %402 : vector<32x256xi1>
    %cst_241 = arith.constant 0.000000e+00 : f32
    %404 = vector.broadcast %cst_241 : f32 to vector<32x256xf32>
    %405 = arith.select %403, %398, %404 : vector<32x256xi1>, vector<32x256xf32>
    %c256_242 = arith.constant 256 : index
    %c0_243 = arith.constant 0 : index
    %406 = vector.load %arg5[%c256_242, %c0_243] : memref<288x256xf32, #tpu.memory_space<vmem>>, vector<32x256xf32>
    tpu.vector_store %arg5[%c256_242, %c0_243], %405 {strides = array<i32>} : memref<288x256xf32, #tpu.memory_space<vmem>>, vector<32x256xf32>,
    %c3 = arith.constant 3 : index
    %c0_244 = arith.constant 0 : index
    %c0_245 = arith.constant 0 : index
    %407 = vector.load %arg2[%c3, %c0_244, %c0_245] : memref<4x32x288xf32, #tpu.memory_space<vmem>>, vector<1x32x288xf32>
    %408 = vector.shape_cast %407 : vector<1x32x288xf32> to vector<32x288xf32>
    %c0_246 = arith.constant 0 : index
    %c0_247 = arith.constant 0 : index
    %409 = vector.load %arg5[%c0_246, %c0_247] : memref<288x256xf32, #tpu.memory_space<vmem>>, vector<288x256xf32>
    %cst_248 = arith.constant dense<0.000000e+00> : vector<32x256xf32>
    %410 = tpu.matmul %408, %409, %cst_248 {dimension_numbers = #tpu.dot_dimension_numbers<[1], [0], [0], [1], [0, 0, 1, 1], [], []>} : vector<32x288xf32>, vector<288x256xf32>, vector<32x256xf32> -> vector<32x256xf32>
    %c3_249 = arith.constant 3 : index
    %c0_250 = arith.constant 0 : index
    %c0_251 = arith.constant 0 : index
    %411 = vector.load %arg3[%c3_249, %c0_250, %c0_251] : memref<4x32x1xf32, #tpu.memory_space<vmem>>, vector<1x32x1xf32>
    %412 = vector.shape_cast %411 : vector<1x32x1xf32> to vector<32x1xf32>
    %413 = vector.broadcast %412 : vector<32x1xf32> to vector<32x256xf32>
    %414 = arith.addf %410, %413 : vector<32x256xf32>
    %415 = math.tanh %414 : vector<32x256xf32>
    %cst_252 = arith.constant 5.000000e-01 : f32
    %416 = vector.broadcast %cst_252 : f32 to vector<32x256xf32>
    %417 = arith.mulf %416, %415 : vector<32x256xf32>
    %418 = vector.extract_strided_slice %417 {offsets = [0, 0], sizes = [16, 256], strides = [1, 1]} : vector<32x256xf32> to vector<16x256xf32>
    %c0_253 = arith.constant 0 : index
    %c0_254 = arith.constant 0 : index
    %c0_255 = arith.constant 0 : index
    %419 = vector.load %arg4[%c0_253, %c0_254, %c0_255] : memref<1x16x256xf32, #tpu.memory_space<vmem>>, vector<1x16x256xf32>
    %420 = vector.shape_cast %419 : vector<1x16x256xf32> to vector<16x256xf32>
    %421 = vector.shape_cast %418 : vector<16x256xf32> to vector<1x16x256xf32>
    tpu.vector_store %arg4[%c0_253, %c0_254, %c0_255], %421 {strides = array<i32>} : memref<1x16x256xf32, #tpu.memory_space<vmem>>, vector<1x16x256xf32>,
    return
  }
  func.func @transform_0(%arg0: i32) -> (i32, i32, i32) {
    %c0_i32 = arith.constant 0 : i32
    %c0_i32_0 = arith.constant 0 : i32
    %c0_i32_1 = arith.constant 0 : i32
    return %arg0, %c0_i32, %c0_i32_0 : i32, i32, i32
  }
  func.func @transform_1(%arg0: i32) -> (i32, i32, i32) {
    %c0_i32 = arith.constant 0 : i32
    %c0_i32_0 = arith.constant 0 : i32
    %c0_i32_1 = arith.constant 0 : i32
    %c0_i32_2 = arith.constant 0 : i32
    return %c0_i32, %c0_i32_0, %c0_i32_1 : i32, i32, i32
  }
  func.func @transform_2(%arg0: i32) -> (i32, i32, i32) {
    %c0_i32 = arith.constant 0 : i32
    %c0_i32_0 = arith.constant 0 : i32
    %c0_i32_1 = arith.constant 0 : i32
    %c0_i32_2 = arith.constant 0 : i32
    return %c0_i32, %c0_i32_0, %c0_i32_1 : i32, i32, i32
  }
  func.func @transform_3(%arg0: i32) -> (i32, i32, i32) {
    %c0_i32 = arith.constant 0 : i32
    %c0_i32_0 = arith.constant 0 : i32
    %c0_i32_1 = arith.constant 0 : i32
    return %arg0, %c0_i32, %c0_i32_0 : i32, i32, i32
  }
}

</mosaic_0001>

<bundles_post_ra>
// kernel: latent_residual_prediction.1
= control target key start
LH: loop header
LB: loop body
LE: loop exit
PB: predicated region body
PF: predicated region fallthrough
CT: control target
= control target key end

     0   :  { %s4983_s12 = smov 0   ;;  %s6813_s0 = inlined_call_operand.vmem [shape: f32[2,32,256], index: 0, kind: input, shape index: {}]   ;;  %s6814_s1 = inlined_call_operand.vmem [shape: f32[4,32,288], index: 1, kind: input, shape index: {}]   ;;  %s6815_s2 = inlined_call_operand.vmem [shape: f32[4,32,1], index: 2, kind: input, shape index: {}]   ;;  %s6816_s3 = inlined_call_operand.vmem [shape: f32[2,16,256], index: 3, kind: output, shape index: {}]  }
   0x1 LB: > { %s3422_s13 = sadd.s32 4294967295, %s4950_s12   ;;  %p3426_p0 = scmp.ge.s32.totalorder %s4950_s12, 1  ;;  %s4950_s12 = sphi %s4983_s12, %s13_s12  }
   0x2   : > { %p137_p1 = scmp.lt.s32.totalorder %s4950_s12, 3 }
   0x4   : > { %p138_p2 = pnand %p3426_p0, %p137_p1 }
   0x5   : > { %p161_p3 = scmp.lt.s32.totalorder (!%p138_p2), %s3422_s13, 1  ;;  %s4952_s18 = smov (!%p138_p2), 17   ;;  %v559_v16 = vld [vmem:[%s6814_s1 + $0x8] sm:$0xff] (!%p138_p2)  ;;  %v642_v17 = vld [vmem:[%s6815_s2] sm:$0xff] (!%p138_p2)  ;;  %v4960_v19 = vmov (!%p138_p2), 0   ;;  %v644_v20 = vld [vmem:[%s6815_s2 + $0x10] sm:$0xff] (!%p138_p2)  ;;  %v179_v22 = vlaneseq (!%p138_p2) }
   0x6   : > { %141 = sbr.rel (%p138_p2) target bundleno = 1894 (0x766), region = 32  ;;  %s4953_s19 = smov (!%p138_p2), 16   ;;  %743 = vmatprep.mubr.f32.mxu0 (!%p138_p2), %v559_v16  ;;  %v643_v18 = vld [vmem:[%s6815_s2 + $0x8] sm:$0xff] (!%p138_p2)  ;;  %4358 = vset.pattern.permute.xlu0 (!%p138_p2), %v4960_v19  ;;  %v645_v21 = vld [vmem:[%s6815_s2 + $0x18] sm:$0xff] (!%p138_p2) }
   0x7   : > { %s4954_s20 = smov (!%p138_p2), 15   ;;  %s4955_s21 = smov (!%p138_p2), 1   ;;  %4359 = vset.pattern.permute.xlu1 (!%p138_p2), %v4960_v19  ;;  %v5076_v23 = vand.u32 (!%p138_p2), 127, %v179_v22 }
   0x8   : > { %s4956_s22 = smov (!%p138_p2), 127   ;;  %s4957_s23 = smov (!%p138_p2), 113  }
   0x9   : > { %s4958_s24 = smov (!%p138_p2), 112   ;;  %s4959_s25 = smov (!%p138_p2), 111   ;;  %v5079_v24 = vadd.s32 (!%p138_p2), 128, %v5076_v23  ;;  %v186_v25 = vand.u32 (!%p138_p2), 15, %v5076_v23  ;;  %vm231_vm0 = vcmp.ge.s32.totalorder (!%p138_p2), %v5076_v23, 16  ;;  %vm222_vm2 = vcmp.lt.s32.totalorder (!%p138_p2), %v5076_v23, 17 }
   0xa   : > { %vm6823_vm5 = vcmp.lt.s32.totalorder (!%p138_p2), %v5076_v23, 16  ;;  %vm6820_vm8 = vcmp.lt.s32.totalorder (!%p138_p2), %v5076_v23, 15  ;;  %vm5157_vm9 = vmpackc.low (!%p138_p2), %vm231_vm0, %vm231_vm0  ;;  %vm6817_vm14 = vcmp.lt.s32.totalorder (!%p138_p2), %v5076_v23, 1 }
   0xb   : > { %v193_v28 = vand.u32 (!%p138_p2), 15, %v5079_v24  ;;  %vm5086_vm1 = vcmp.ge.s32.totalorder (!%p138_p2), %v186_v25, 1  ;;  %vm5169_vm11 = vcmp.lt.s32.totalorder (!%p138_p2), %v186_v25, 15 }
   0xc   : > { %vm235_vm4 = vmand (!%p138_p2), %vm231_vm0, %vm5086_vm1 }
   0xd   : > { %s6991_s13 = smov (!%p161_p3, %s3422_s13), 1  ;;  %vm5093_vm3 = vcmp.ge.s32.totalorder %v193_v28, 1  ;;  %vm5121_vm7 = vmpackc.low %vm235_vm4, %vm235_vm4  ;;  %vm5163_vm10 = vcmp.lt.s32.totalorder %v193_v28, 15  ;;  %vm6819_vm4 = vcmp.lt.s32.totalorder %v5076_v23, 113 }
   0xe   : > { %s3497_s14 = sshll.u32 %s6991_s13, 6  ;;  %vm5113_vm6 = vmpackc.low %vm5093_vm3, %vm5093_vm3 }
   0xf   : > { %s165_s17 = scalar_lea.vmem %s6813_s0, %s3497_s14  ;;  %vm5186_vm12 = vmpackc.low %vm5163_vm10, %vm5163_vm10 }
  0x10   : > { %v4997_v0 = vld [vmem:[%s165_s17 + $0x20] sm:$0xff]  ;;  %v4999_v1 = vld [vmem:[%s165_s17 + $0x30] sm:$0xff]  ;;  %v5007_v5 = vld [vmem:[%s165_s17 + $0x28] sm:$0xff] }
  0x11   : > { %v5001_v2 = vld [vmem:[%s165_s17] sm:$0xff]  ;;  %v4208_v3 = vpack.i.bf16 %v4999_v1, %v4997_v0  ;;  %v5005_v4 = vld [vmem:[%s165_s17 + $0x10] sm:$0xff]  ;;  %v5009_v6 = vld [vmem:[%s165_s17 + $0x38] sm:$0xff]  ;;  %v3775_v15 = vpack.c.bf16 %v4999_v1, %v4997_v0 }
  0x12   : > { %v4198_v7 = vpack.i.bf16 %v5005_v4, %v5001_v2  ;;  %v5013_v8 = vld [vmem:[%s165_s17 + $0x8] sm:$0xff]  ;;  %v5015_v9 = vld [vmem:[%s165_s17 + $0x18] sm:$0xff]  ;;  %v4213_v10 = vpack.i.bf16 %v5009_v6, %v5007_v5  ;;  %v3771_v13 = vpack.c.bf16 %v5005_v4, %v5001_v2  ;;  %v3773_v14 = vpack.c.bf16 %v5009_v6, %v5007_v5  ;;  %vm321_vm13 = vmand %vm231_vm0, %vm5169_vm11 }
  0x13   : > { %4209 = vrot.lane.b32.xlu1 %v4208_v3, %s4952_s18  ;;  %v4203_v11 = vpack.i.bf16 %v5015_v9, %v5013_v8  ;;  %v3769_v12 = vpack.c.bf16 %v5015_v9, %v5013_v8  ;;  %vm5207_vm15 = vmpackc.low %vm321_vm13, %vm321_vm13  ;;  %vm455_vm13 = vcmp.lt.s32.totalorder %v5079_v24, 240 }
  0x14   : > { %4199 = vrot.lane.b32.xlu0 %v4198_v7, %s4952_s18  ;;  %vm5232_vm0 = vmpackc.low %vm5086_vm1, %vm5086_vm1  ;;  %vm6818_vm1 = vcmp.lt.s32.totalorder %v5076_v23, 127 }
  0x17   : > { %4214 = vrot.lane.b32.xlu1 %v4213_v10, %s4952_s18 }
  0x18   : > { %4204 = vrot.lane.b32.xlu0 %v4203_v11, %s4952_s18 }
  0x1b   : > { %4224 = vrot.lane.b32.xlu1 %v4203_v11, %s4953_s19 }
  0x1c   : > { %4219 = vrot.lane.b32.xlu0 %v4198_v7, %s4953_s19 }
  0x1f   : > { %4234 = vrot.lane.b32.xlu1 %v4213_v10, %s4953_s19 }
  0x20   : > { %4229 = vrot.lane.b32.xlu0 %v4208_v3, %s4953_s19 }
  0x23   : > { %4244 = vrot.lane.b32.xlu1 %v4203_v11, %s4954_s20 }
  0x24   : > { %4239 = vrot.lane.b32.xlu0 %v4198_v7, %s4954_s20 }
  0x27   : > { %4254 = vrot.lane.b32.xlu1 %v4213_v10, %s4954_s20 }
  0x28   : > { %4249 = vrot.lane.b32.xlu0 %v4208_v3, %s4954_s20 }
  0x2b   : > { %4264 = vrot.lane.b32.xlu1 %v4203_v11, %s4955_s21 }
  0x2c   : > { %4259 = vrot.lane.b32.xlu0 %v4198_v7, %s4955_s21 }
  0x2f   : > { %4274 = vrot.lane.b32.xlu1 %v4213_v10, %s4955_s21 }
  0x30   : > { %4269 = vrot.lane.b32.xlu0 %v4208_v3, %s4955_s21 }
  0x33   : > { %4284 = vrot.lane.b32.xlu1 %v4203_v11, %s4956_s22 }
  0x34   : > { %4279 = vrot.lane.b32.xlu0 %v4198_v7, %s4956_s22 }
  0x37   : > { %4294 = vrot.lane.b32.xlu1 %v4213_v10, %s4956_s22 }
  0x38   : > { %4289 = vrot.lane.b32.xlu0 %v4208_v3, %s4956_s22 }
  0x3b   : > { %4304 = vrot.lane.b32.xlu1 %v4203_v11, %s4957_s23 }
  0x3c   : > { %4299 = vrot.lane.b32.xlu0 %v4198_v7, %s4957_s23 }
  0x3f   : > { %4314 = vrot.lane.b32.xlu1 %v4213_v10, %s4957_s23 }
  0x40   : > { %4309 = vrot.lane.b32.xlu0 %v4208_v3, %s4957_s23 }
  0x43   : > { %4324 = vrot.lane.b32.xlu1 %v4203_v11, %s4958_s24 }
  0x44   : > { %4319 = vrot.lane.b32.xlu0 %v4198_v7, %s4958_s24 }
  0x47   : > { %4334 = vrot.lane.b32.xlu1 %v4213_v10, %s4958_s24 }
  0x48   : > { %4329 = vrot.lane.b32.xlu0 %v4208_v3, %s4958_s24 }
  0x4b   : > { %4344 = vrot.lane.b32.xlu1 %v4203_v11, %s4959_s25 }
  0x4c   : > { %4339 = vrot.lane.b32.xlu0 %v4198_v7, %s4959_s25 }
  0x4f   : > { %4354 = vrot.lane.b32.xlu1 %v4213_v10, %s4959_s25 }
  0x50   : > { %4349 = vrot.lane.b32.xlu0 %v4208_v3, %s4959_s25 }
  0x53   : > { %653 = vperm.xlu1 %4359, %v643_v18  }
  0x54   : > { %648 = vperm.xlu0 %4358, %v642_v17  }
  0x57   : > { %658 = vperm.xlu1 %4359, %v644_v20  }
  0x58   : > { %663 = vperm.xlu0 %4358, %v645_v21  }
  0x85   : > { %v4210_v26 = vpop.permute.xlu1 %4209 }
  0x86   : > { %v4200_v27 = vpop.permute.xlu0 %4199  ;;  %v4212_v29 = vunpack.i.h.bf16 %v4210_v26  ;;  %v4211_v30 = vunpack.i.l.bf16 %v4210_v26 }
  0x87   : > { %v4202_v37 = vunpack.i.h.bf16 %v4200_v27  ;;  %v4201_v38 = vunpack.i.l.bf16 %v4200_v27 }
  0x89   : > { %v4215_v32 = vpop.permute.xlu1 %4214 }
  0x8a   : > { %v4217_v33 = vunpack.i.h.bf16 %v4215_v32  ;;  %v4216_v34 = vunpack.i.l.bf16 %v4215_v32  ;;  %v4205_v35 = vpop.permute.xlu0 %4204 }
  0x8b   : > { %v4207_v39 = vunpack.i.h.bf16 %v4205_v35  ;;  %v4206_v40 = vunpack.i.l.bf16 %v4205_v35 }
  0x8c   : > { %v225_v41 = vsel %vm222_vm2, %v4211_v30, %v4216_v34  ;;  %v226_v42 = vsel %vm222_vm2, %v4212_v29, %v4217_v33  ;;  %v229_v57 = vsel %vm222_vm2, %v4216_v34, %v4211_v30  ;;  %v230_v58 = vsel %vm222_vm2, %v4217_v33, %v4212_v29 }
  0x8d   : > { %v223_v43 = vsel %vm222_vm2, %v4201_v38, %v4206_v40  ;;  %v224_v44 = vsel %vm222_vm2, %v4202_v37, %v4207_v39  ;;  %v227_v46 = vsel %vm222_vm2, %v4206_v40, %v4201_v38  ;;  %v228_v47 = vsel %vm222_vm2, %v4207_v39, %v4202_v37  ;;  %v4225_v48 = vpop.permute.xlu1 %4224 }
  0x8e   : > { %v3723_v49 = vpack.c.bf16 %v224_v44, %v223_v43  ;;  %v3726_v50 = vpack.c.bf16 %v228_v47, %v227_v46  ;;  %v4227_v52 = vunpack.i.h.bf16 %v4225_v48  ;;  %v4226_v53 = vunpack.i.l.bf16 %v4225_v48  ;;  %v4220_v54 = vpop.permute.xlu0 %4219 }
  0x8f   : > { %v4222_v55 = vunpack.i.h.bf16 %v4220_v54  ;;  %v4221_v56 = vunpack.i.l.bf16 %v4220_v54  ;;  %v3729_v59 = vpack.c.bf16 %v226_v42, %v225_v41  ;;  %v3732_v17 = vpack.c.bf16 %v230_v58, %v229_v57 }
  0x90   : > { %3725 = vmatprep.subr.msk.bf16.mxu0 %vm5113_vm6, %v3723_v49 }
  0x91   : > { %3728 = vmatpush1.bf16.msk.msra.mxu0 %vm5121_vm7, %v3726_v50  ;;  %v275_v60 = vsel %vm6823_vm5, %v4227_v52, %v4222_v55  ;;  %v4235_v61 = vpop.permute.xlu1 %4234  ;;  %v270_v62 = vsel %vm6823_vm5, %v4221_v56, %v4226_v53  ;;  %v271_v63 = vsel %vm6823_vm5, %v4222_v55, %v4227_v52  ;;  %v274_v3 = vsel %vm6823_vm5, %v4226_v53, %v4221_v56 }
  0x92   : > { %3731 = vmatprep.subr.msk.bf16.mxu0 %vm5113_vm6, %v3729_v59  ;;  %v4237_v7 = vunpack.i.h.bf16 %v4235_v61  ;;  %v4236_v10 = vunpack.i.l.bf16 %v4235_v61  ;;  %v4230_v11 = vpop.permute.xlu0 %4229  ;;  %v3735_v16 = vpack.c.bf16 %v271_v63, %v270_v62  ;;  %v3737_v21 = vpack.c.bf16 %v275_v60, %v274_v3 }
  0x93   : > { %v4232_v18 = vunpack.i.h.bf16 %v4230_v11  ;;  %v4231_v19 = vunpack.i.l.bf16 %v4230_v11 }
  0x95   : > { %3734 = vmatpush1.bf16.msk.msra.mxu0 %vm5121_vm7, %v3732_v17  ;;  %v277_v20 = vsel %vm6823_vm5, %v4237_v7, %v4232_v18  ;;  %v4245_v22 = vpop.permute.xlu1 %4244  ;;  %v272_v26 = vsel %vm6823_vm5, %v4231_v19, %v4236_v10  ;;  %v273_v27 = vsel %vm6823_vm5, %v4232_v18, %v4237_v7  ;;  %v276_v29 = vsel %vm6823_vm5, %v4236_v10, %v4231_v19 }
  0x96   : > { %3736 = vmatprep.subr.bf16.mxu0 %v3735_v16  ;;  %v4247_v32 = vunpack.i.h.bf16 %v4245_v22  ;;  %v4246_v33 = vunpack.i.l.bf16 %v4245_v22  ;;  %v4240_v34 = vpop.permute.xlu0 %4239  ;;  %v3740_v35 = vpack.c.bf16 %v273_v27, %v272_v26  ;;  %v3742_v43 = vpack.c.bf16 %v277_v20, %v276_v29 }
  0x97   : > { %v4242_v37 = vunpack.i.h.bf16 %v4240_v34  ;;  %v4241_v38 = vunpack.i.l.bf16 %v4240_v34 }
  0x99   : > { %3739 = vmatpush1.bf16.msk.msra.mxu0 %vm5157_vm9, %v3737_v21  ;;  %v312_v41 = vsel %vm6820_vm8, %v4242_v37, %v4247_v32  ;;  %v316_v42 = vsel %vm6820_vm8, %v4247_v32, %v4242_v37  ;;  %v311_v28 = vsel %vm6820_vm8, %v4241_v38, %v4246_v33  ;;  %v4255_v44 = vpop.permute.xlu1 %4254  ;;  %v315_v25 = vsel %vm6820_vm8, %v4246_v33, %v4241_v38 }
  0x9a   : > { %3741 = vmatprep.subr.bf16.mxu0 %v3740_v35  ;;  %v4257_v46 = vunpack.i.h.bf16 %v4255_v44  ;;  %v4256_v47 = vunpack.i.l.bf16 %v4255_v44  ;;  %v4250_v48 = vpop.permute.xlu0 %4249  ;;  %v3745_v49 = vpack.c.bf16 %v312_v41, %v311_v28  ;;  %v3748_v57 = vpack.c.bf16 %v316_v42, %v315_v25 }
  0x9b   : > { %v4252_v52 = vunpack.i.h.bf16 %v4250_v48  ;;  %v4251_v53 = vunpack.i.l.bf16 %v4250_v48 }
  0x9d   : > { %3744 = vmatpush1.bf16.msk.msra.mxu0 %vm5157_vm9, %v3742_v43  ;;  %v314_v54 = vsel %vm6820_vm8, %v4252_v52, %v4257_v46  ;;  %v318_v55 = vsel %vm6820_vm8, %v4257_v46, %v4252_v52  ;;  %v313_v56 = vsel %vm6820_vm8, %v4251_v53, %v4256_v47  ;;  %v4265_v58 = vpop.permute.xlu1 %4264  ;;  %v317_v59 = vsel %vm6820_vm8, %v4256_v47, %v4251_v53  ;;  %vm541_vm8 = vmand %vm455_vm13, %vm5163_vm10 }
  0x9e   : > { %3747 = vmatprep.subr.msk.bf16.mxu0 %vm5186_vm12, %v3745_v49  ;;  %v4267_v61 = vunpack.i.h.bf16 %v4265_v58  ;;  %v4266_v62 = vunpack.i.l.bf16 %v4265_v58  ;;  %v4260_v63 = vpop.permute.xlu0 %4259  ;;  %v3751_v3 = vpack.c.bf16 %v314_v54, %v313_v56  ;;  %v3754_v18 = vpack.c.bf16 %v318_v55, %v317_v59 }
  0x9f   : > { %v4262_v7 = vunpack.i.h.bf16 %v4260_v63  ;;  %v4261_v10 = vunpack.i.l.bf16 %v4260_v63 }
  0xa1   : > { %3750 = vmatpush1.bf16.msk.msra.mxu0 %vm5207_vm15, %v3748_v57  ;;  %v357_v11 = vsel %vm6817_vm14, %v4262_v7, %v4267_v61  ;;  %v361_v16 = vsel %vm6817_vm14, %v4267_v61, %v4262_v7  ;;  %v356_v17 = vsel %vm6817_vm14, %v4261_v10, %v4266_v62  ;;  %v4275_v19 = vpop.permute.xlu1 %4274  ;;  %v360_v20 = vsel %vm6817_vm14, %v4266_v62, %v4261_v10 }
  0xa2   : > { %3753 = vmatprep.subr.msk.bf16.mxu0 %vm5186_vm12, %v3751_v3  ;;  %v4277_v21 = vunpack.i.h.bf16 %v4275_v19  ;;  %v4276_v22 = vunpack.i.l.bf16 %v4275_v19  ;;  %v4270_v26 = vpop.permute.xlu0 %4269  ;;  %v3757_v27 = vpack.c.bf16 %v357_v11, %v356_v17  ;;  %v3760_v35 = vpack.c.bf16 %v361_v16, %v360_v20 }
  0xa3   : > { %v4272_v29 = vunpack.i.h.bf16 %v4270_v26  ;;  %v4271_v32 = vunpack.i.l.bf16 %v4270_v26 }
  0xa5   : > { %3756 = vmatpush1.bf16.msk.msra.mxu0 %vm5207_vm15, %v3754_v18  ;;  %v359_v33 = vsel %vm6817_vm14, %v4272_v29, %v4277_v21  ;;  %v358_v34 = vsel %vm6817_vm14, %v4271_v32, %v4276_v22  ;;  %v4285_v37 = vpop.permute.xlu1 %4284  ;;  %v363_v41 = vsel %vm6817_vm14, %v4277_v21, %v4272_v29  ;;  %v362_v42 = vsel %vm6817_vm14, %v4276_v22, %v4271_v32  ;;  %vm5280_vm14 = vmpackc.low %vm5169_vm11, %vm5169_vm11 }
  0xa6   : > { %3759 = vmatprep.subr.msk.bf16.mxu0 %vm5113_vm6, %v3757_v27  ;;  %v3763_v28 = vpack.c.bf16 %v359_v33, %v358_v34  ;;  %v4280_v43 = vpop.permute.xlu0 %4279  ;;  %v3766_v31 = vpack.c.bf16 %v363_v41, %v362_v42  ;;  %v4287_v25 = vunpack.i.h.bf16 %v4285_v37  ;;  %v4286_v46 = vunpack.i.l.bf16 %v4285_v37  ;;  %vm5296_vm11 = vmand %vm455_vm13, %vm5093_vm3 }
  0xa7   : > { %v4282_v47 = vunpack.i.h.bf16 %v4280_v43  ;;  %v4281_v48 = vunpack.i.l.bf16 %v4280_v43  ;;  %vm6821_vm3 = vcmp.lt.s32.totalorder %v5076_v23, 112 }
  0xa9   : > { %3762 = vmatpush1.bf16.msk.msra.mxu0 %vm5232_vm0, %v3760_v35  ;;  %v4295_v44 = vpop.permute.xlu1 %4294  ;;  %v410_v53 = vsel %vm6818_vm1, %v4287_v25, %v4282_v47  ;;  %v409_v54 = vsel %vm6818_vm1, %v4286_v46, %v4281_v48  ;;  %v406_v61 = vsel %vm6818_vm1, %v4282_v47, %v4287_v25  ;;  %v405_v8 = vsel %vm6818_vm1, %v4281_v48, %v4286_v46 }
  0xaa   : > { %3765 = vmatprep.subr.msk.bf16.mxu0 %vm5113_vm6, %v3763_v28  ;;  %v4290_v49 = vpop.permute.xlu0 %4289  ;;  %v4297_v56 = vunpack.i.h.bf16 %v4295_v44  ;;  %v4296_v57 = vunpack.i.l.bf16 %v4295_v44  ;;  %v3777_v9 = vpack.c.bf16 %v410_v53, %v409_v54  ;;  %v3780_v6 = vpack.c.bf16 %v406_v61, %v405_v8 }
  0xab   : > { %v4292_v58 = vunpack.i.h.bf16 %v4290_v49  ;;  %v4291_v59 = vunpack.i.l.bf16 %v4290_v49 }
  0xad   : > { %3768 = vmatpush1.bf16.msk.msra.mxu0 %vm5232_vm0, %v3766_v31  ;;  %v4305_v52 = vpop.permute.xlu1 %4304  ;;  %v412_v2 = vsel %vm6818_vm1, %v4297_v56, %v4292_v58  ;;  %v411_v4 = vsel %vm6818_vm1, %v4296_v57, %v4291_v59  ;;  %v408_v5 = vsel %vm6818_vm1, %v4292_v58, %v4297_v56  ;;  %v407_v11 = vsel %vm6818_vm1, %v4291_v59, %v4296_v57  ;;  %vm5316_vm1 = vmpackc.low %vm5296_vm11, %vm5296_vm11 }
  0xae   : > { %3770 = vmatprep.subr.bf16.mxu0 %v3769_v12  ;;  %v4300_v55 = vpop.permute.xlu0 %4299  ;;  %v4307_v62 = vunpack.i.h.bf16 %v4305_v52  ;;  %v4306_v63 = vunpack.i.l.bf16 %v4305_v52  ;;  %v3786_v26 = vpack.c.bf16 %v408_v5, %v407_v11  ;;  %vm531_vm11 = vcmp.lt.s32.totalorder %v5076_v23, 111 }
  0xaf   : > { %v4302_v3 = vunpack.i.h.bf16 %v4300_v55  ;;  %v4301_v7 = vunpack.i.l.bf16 %v4300_v55 }
  0xb1   : > { %3772 = vmatpush1.bf16.msra.mxu0 %v3771_v13  ;;  %v4315_v12 = vpop.permute.xlu1 %4314  ;;  %v451_v0 = vsel %vm6819_vm4, %v4307_v62, %v4302_v3  ;;  %v450_v1 = vsel %vm6819_vm4, %v4306_v63, %v4301_v7  ;;  %v447_v21 = vsel %vm6819_vm4, %v4302_v3, %v4307_v62  ;;  %v446_v22 = vsel %vm6819_vm4, %v4301_v7, %v4306_v63  ;;  %v3475_v63 = vld [vmem:[%s6814_s1 + $0x120] sm:$0xff] }
  0xb2   : > { %3774 = vmatprep.subr.bf16.mxu0 %v3773_v14  ;;  %v4310_v10 = vpop.permute.xlu0 %4309  ;;  %v4317_v40 = vunpack.i.h.bf16 %v4315_v12  ;;  %v4316_v17 = vunpack.i.l.bf16 %v4315_v12  ;;  %v3789_v27 = vpack.c.bf16 %v451_v0, %v450_v1  ;;  %v3792_v43 = vpack.c.bf16 %v447_v21, %v446_v22  ;;  %v558_v21 = vld [vmem:[%s6814_s1] sm:$0xff]  ;;  %v3477_v14 = vld [vmem:[%s6814_s1 + $0x130] sm:$0xff] }
  0xb3   : > { %v4312_v18 = vunpack.i.h.bf16 %v4310_v10  ;;  %v4311_v19 = vunpack.i.l.bf16 %v4310_v10 }
  0xb5   : > { %3776 = vmatpush1.bf16.msra.mxu0 %v3775_v15  ;;  %v4325_v13 = vpop.permute.xlu1 %4324  ;;  %v3783_v15 = vpack.c.bf16 %v412_v2, %v411_v4  ;;  %v453_v37 = vsel %vm6819_vm4, %v4317_v40, %v4312_v18  ;;  %v452_v41 = vsel %vm6819_vm4, %v4316_v17, %v4311_v19  ;;  %v449_v28 = vsel %vm6819_vm4, %v4312_v18, %v4317_v40 }
  0xb6   : > { %3779 = vmatprep.subr.msk.bf16.mxu0 %vm5186_vm12, %v3777_v9  ;;  %v4320_v16 = vpop.permute.xlu0 %4319  ;;  %v4327_v36 = vunpack.i.h.bf16 %v4325_v13  ;;  %v4326_v29 = vunpack.i.l.bf16 %v4325_v13  ;;  %v448_v31 = vsel %vm6819_vm4, %v4311_v19, %v4316_v17  ;;  %v3795_v46 = vpack.c.bf16 %v453_v37, %v452_v41  ;;  %vm5348_vm4 = vmpackc.low %vm455_vm13, %vm455_vm13  ;;  %v567_v37 = vld [vmem:[%s6814_s1 + $0x48] sm:$0xff] }
  0xb7   : > { %v4322_v32 = vunpack.i.h.bf16 %v4320_v16  ;;  %v4321_v33 = vunpack.i.l.bf16 %v4320_v16  ;;  %v3798_v55 = vpack.c.bf16 %v449_v28, %v448_v31  ;;  %v4961_v41 = vmov 0.0   ;;  %v560_v28 = vld [vmem:[%s6814_s1 + $0x10] sm:$0xff]  ;;  %v566_v31 = vld [vmem:[%s6814_s1 + $0x40] sm:$0xff]  ;;  %v3484_v19 = vld [vmem:[%s6814_s1 + $0x168] sm:$0xff] }
  0xb9   : > { %3782 = vmatpush1.bf16.msk.msra.mxu0 %vm5280_vm14, %v3780_v6  ;;  %v4335_v34 = vpop.permute.xlu1 %4334  ;;  %v496_v44 = vsel %vm6821_vm3, %v4327_v36, %v4322_v32  ;;  %v495_v25 = vsel %vm6821_vm3, %v4326_v29, %v4321_v33  ;;  %v491_v57 = vsel %vm6821_vm3, %v4321_v33, %v4326_v29  ;;  %v492_v58 = vsel %vm6821_vm3, %v4322_v32, %v4327_v36  ;;  %v561_v32 = vld [vmem:[%s6814_s1 + $0x18] sm:$0xff] }
  0xba   : > { %3785 = vmatprep.subr.msk.bf16.mxu0 %vm5186_vm12, %v3783_v15  ;;  %v4330_v35 = vpop.permute.xlu0 %4329  ;;  %v4337_v49 = vunpack.i.h.bf16 %v4335_v34  ;;  %v4336_v52 = vunpack.i.l.bf16 %v4335_v34  ;;  %v3801_v56 = vpack.c.bf16 %v496_v44, %v495_v25  ;;  %v3804_v10 = vpack.c.bf16 %v492_v58, %v491_v57  ;;  %v565_v33 = vld [vmem:[%s6814_s1 + $0x38] sm:$0xff]  ;;  %v564_v34 = vld [vmem:[%s6814_s1 + $0x30] sm:$0xff] }
  0xbb   : > { %v4332_v53 = vunpack.i.h.bf16 %v4330_v35  ;;  %v4331_v54 = vunpack.i.l.bf16 %v4330_v35  ;;  %v568_v35 = vld [vmem:[%s6814_s1 + $0x50] sm:$0xff]  ;;  %v569_v44 = vld [vmem:[%s6814_s1 + $0x58] sm:$0xff] }
  0xbd   : > { %3788 = vmatpush1.bf16.msk.msra.mxu0 %vm5280_vm14, %v3786_v26  ;;  %v4345_v47 = vpop.permute.xlu1 %4344  ;;  %v498_v12 = vsel %vm6821_vm3, %v4337_v49, %v4332_v53  ;;  %v497_v62 = vsel %vm6821_vm3, %v4336_v52, %v4331_v54  ;;  %v493_v2 = vsel %vm6821_vm3, %v4331_v54, %v4336_v52  ;;  %v494_v13 = vsel %vm6821_vm3, %v4332_v53, %v4337_v49  ;;  %vm5374_vm3 = vmpackc.low %vm541_vm8, %vm541_vm8 }
  0xbe   : > { %3791 = vmatprep.subr.msk.bf16.mxu0 %vm5316_vm1, %v3789_v27  ;;  %v4340_v48 = vpop.permute.xlu0 %4339  ;;  %v4347_v59 = vunpack.i.h.bf16 %v4345_v47  ;;  %v4346_v61 = vunpack.i.l.bf16 %v4345_v47  ;;  %v3806_v6 = vpack.c.bf16 %v498_v12, %v497_v62  ;;  %v3809_v16 = vpack.c.bf16 %v494_v13, %v493_v2  ;;  %v562_v27 = vld [vmem:[%s6814_s1 + $0x20] sm:$0xff] }
  0xbf   : > { %v4342_v8 = vunpack.i.h.bf16 %v4340_v48  ;;  %v4341_v9 = vunpack.i.l.bf16 %v4340_v48  ;;  %vm6822_vm8 = vcmask 261120  }
  0xc1   : > { %3794 = vmatpush1.bf16.msk.msra.mxu0 %vm5232_vm0, %v3792_v43  ;;  %v4355_v3 = vpop.permute.xlu1 %4354  ;;  %v537_v4 = vsel %vm531_vm11, %v4347_v59, %v4342_v8  ;;  %v536_v5 = vsel %vm531_vm11, %v4346_v61, %v4341_v9  ;;  %v533_v40 = vsel %vm531_vm11, %v4342_v8, %v4347_v59  ;;  %v532_v17 = vsel %vm531_vm11, %v4341_v9, %v4346_v61  ;;  %v563_v43 = vld [vmem:[%s6814_s1 + $0x28] sm:$0xff] }
  0xc2   : > { %3797 = vmatprep.subr.msk.bf16.mxu0 %vm5316_vm1, %v3795_v46  ;;  %v4350_v7 = vpop.permute.xlu0 %4349  ;;  %v4357_v11 = vunpack.i.h.bf16 %v4355_v3  ;;  %v4356_v0 = vunpack.i.l.bf16 %v4355_v3  ;;  %v3811_v18 = vpack.c.bf16 %v537_v4, %v536_v5  ;;  %v3814_v20 = vpack.c.bf16 %v533_v40, %v532_v17 }
  0xc3   : > { %v4352_v1 = vunpack.i.h.bf16 %v4350_v7  ;;  %v4351_v15 = vunpack.i.l.bf16 %v4350_v7 }
  0xc5   : > { %3800 = vmatpush1.bf16.msk.msra.mxu0 %vm5232_vm0, %v3798_v55  ;;  %v539_v24 = vsel %vm531_vm11, %v4357_v11, %v4352_v1  ;;  %v538_v39 = vsel %vm531_vm11, %v4356_v0, %v4351_v15  ;;  %v535_v22 = vsel %vm531_vm11, %v4352_v1, %v4357_v11  ;;  %v534_v26 = vsel %vm531_vm11, %v4351_v15, %v4356_v0 }
  0xc6   : > { %3803 = vmatprep.subr.msk.bf16.mxu0 %vm5348_vm4, %v3801_v56  ;;  %v3817_v36 = vpack.c.bf16 %v539_v24, %v538_v39  ;;  %v3820_v29 = vpack.c.bf16 %v535_v22, %v534_v26 }
  0xc9   : > { %3805 = vmatpush1.bf16.msra.mxu0 %v3804_v10 }
  0xca   : > { %3808 = vmatprep.subr.msk.bf16.mxu0 %vm5348_vm4, %v3806_v6 }
  0xcd   : > { %3810 = vmatpush1.bf16.msra.mxu0 %v3809_v16 }
  0xce   : > { %3813 = vmatprep.subr.msk.bf16.mxu0 %vm5374_vm3, %v3811_v18 }
  0xd0   : > { %744 = vmatmul.mubr.f32.vlgmr.msra.gmra.mrb[0].mxu0 %v558_v21 }
  0xd1   : > { %3816 = vmatpush1.bf16.msk.msra.mxu0 %vm5280_vm14, %v3814_v20  ;;  %749 = vmatprep.mubr.f32.mxu0 %v562_v27 }
  0xd2   : > { %3819 = vmatprep.subr.msk.bf16.mxu0 %vm5374_vm3, %v3817_v36  ;;  %v654_v52 = vpop.permute.xlu1 %653  ;;  %v4962_v36 = vmov -1.0  }
  0xd3   : > { %v649_v25 = vpop.permute.xlu0 %648 }
  0xd4   : > { %750 = vmatmul.mubr.f32.gmra.mrb[2].mxu0 %v561_v32 }
  0xd5   : > { %755 = vmatprep.mubr.f32.mxu0 %v565_v33  ;;  %3822 = vmatpush1.bf16.msk.msra.mxu0 %vm5280_vm14, %v3820_v29 }
  0xd6   : > { %v659_v4 = vpop.permute.xlu1 %658 }
  0xd8   : > { %756 = vmatmul.mubr.f32.gmra.mrb[4].mxu0 %v564_v34 }
  0xd9   : > { %761 = vmatprep.mubr.f32.mxu0 %v568_v35 }
  0xdc   : > { %762 = vmatmul.mubr.f32.gmra.mrb[6].mxu0 %v567_v37 }
  0xdd   : > { %832 = vmatprep.mubr.f32.mxu0 %v4961_v41 }
  0xe0   : > { %3431 = vmatmul.mubr.msk.f32.vlgmr.msra.gmra.mrb[0].mxu0 %vm6822_vm8, %v560_v28  ;;  %v664_v28 = vpop.permute.xlu0 %663 }
  0xe1   : > { %838 = vmatprep.mubr.f32.mxu0 %v4961_v41 }
  0xe4   : > { %3432 = vmatmul.mubr.msk.f32.gmra.mrb[2].mxu0 %vm6822_vm8, %v563_v43 }
  0xe5   : > { %844 = vmatprep.mubr.f32.mxu0 %v4961_v41 }
  0xe8   : > { %3433 = vmatmul.mubr.msk.f32.gmra.mrb[4].mxu0 %vm6822_vm8, %v566_v31 }
  0xe9   : > { %850 = vmatprep.mubr.f32.mxu0 %v4961_v41 }
  0xec   : > { %3434 = vmatmul.mubr.msk.f32.gmra.mrb[6].mxu0 %vm6822_vm8, %v569_v44 }
 0x1b3   : > { %v834_v46 = vpop.f32.mrb[0].mxu0 }
 0x1b4   : > { %v4123_v47 = vadd.f32 %v834_v46, %v649_v25  ;;  %v836_v48 = vpop.f32.mrb[1].mxu0 }
 0x1b5   : > { %v4124_v49 = vadd.f32 %v836_v48, %v649_v25 }
 0x1b6   : > { %v865_v53 = vmul.f32 0.70710677, %v4123_v47  ;;  %v5442_v17 = vmul.f32 0.5, %v4123_v47 }
 0x1b7   : > { %v866_v54 = vmul.f32 0.70710677, %v4124_v49  ;;  %v840_v55 = vpop.f32.mrb[2].mxu0  ;;  %v5447_v39 = vmul.f32 0.5, %v4124_v49 }
 0x1b8   : > { %v889_v56 = vand.u32 2147483647, %v865_v53  ;;  %v4125_v57 = vadd.f32 %v840_v55, %v654_v52  ;;  %v842_v58 = vpop.f32.mrb[3].mxu0  ;;  %vm873_vm10 = vcmp.ge.f32.partialorder %v865_v53, 0.0 }
 0x1b9   : > { %v890_v59 = vand.u32 2147483647, %v866_v54  ;;  %v4126_v61 = vadd.f32 %v842_v58, %v654_v52  ;;  %vm874_vm13 = vcmp.ge.f32.partialorder %v866_v54, 0.0  ;;  %v5454_v29 = vsel %vm873_vm10, 1.0, %v4962_v36 }
 0x1ba   : > { %v897_v8 = vmul.f32 0.3275911, %v889_v56  ;;  %v867_v12 = vmul.f32 0.70710677, %v4125_v57  ;;  %v993_v11 = vsub.f32 0.0, %v889_v56  ;;  %v5458_v34 = vsel %vm874_vm13, 1.0, %v4962_v36 }
 0x1bb   : > { %v898_v9 = vmul.f32 0.3275911, %v890_v59  ;;  %v5435_v3 = vmul.f32 0.70710677, %v4126_v61  ;;  %v846_v7 = vpop.f32.mrb[4].mxu0  ;;  %v994_v22 = vsub.f32 0.0, %v890_v59 }
 0x1bc   : > { %v905_v62 = vadd.f32 1.0, %v897_v8  ;;  %v891_v2 = vand.u32 2147483647, %v867_v12  ;;  %v848_v5 = vpop.f32.mrb[5].mxu0  ;;  %v5438_v1 = vadd.f32 %v846_v7, %v659_v4  ;;  %v1001_v21 = vmul.f32 %v993_v11, %v889_v56 }
 0x1bd   : > { %v906_v10 = vadd.f32 1.0, %v898_v9  ;;  %v892_v0 = vand.u32 2147483647, %v5435_v3  ;;  %v5440_v40 = vadd.f32 %v848_v5, %v659_v4  ;;  %vm875_vm8 = vcmp.ge.f32.partialorder %v867_v12, 0.0 }
 0x1be   : > { %4840 = vrcp.f32 %v905_v62  ;;  %v899_v6 = vmul.f32 0.3275911, %v891_v2  ;;  %v5445_v24 = vmul.f32 0.70710677, %v5438_v1  ;;  %v995_v32 = vsub.f32 0.0, %v891_v2 }
 0x1bf   : > { %4842 = vrcp.f32 %v906_v10  ;;  %v852_v13 = vpop.f32.mrb[6].mxu0  ;;  %v900_v18 = vmul.f32 0.3275911, %v892_v0  ;;  %v5450_v20 = vmul.f32 0.70710677, %v5440_v40  ;;  %v5460_v35 = vmul.f32 0.5, %v4125_v57 }
 0x1c0   : > { %v854_v15 = vpop.f32.mrb[7].mxu0  ;;  %v907_v16 = vadd.f32 1.0, %v899_v6  ;;  %v893_v27 = vand.u32 2147483647, %v5445_v24  ;;  %v5462_v43 = vmul.f32 0.5, %v4126_v61  ;;  %v996_v31 = vsub.f32 0.0, %v892_v0 }
 0x1c1   : > { %v908_v26 = vadd.f32 1.0, %v900_v18  ;;  %v894_v33 = vand.u32 2147483647, %v5450_v20  ;;  %v5464_v25 = vadd.f32 %v852_v13, %v664_v28  ;;  %v1009_v47 = vmul.f32 1.442695, %v1001_v21 }
 0x1c2   : > { %4844 = vrcp.f32 %v907_v16  ;;  %v901_v37 = vmul.f32 0.3275911, %v893_v27  ;;  %v1002_v48 = vmul.f32 %v994_v22, %v890_v59  ;;  %v5469_v49 = vsel %vm875_vm8, 1.0, %v4962_v36 }
 0x1c3   : > { %4846 = vrcp.f32 %v908_v26  ;;  %v902_v44 = vmul.f32 0.3275911, %v894_v33  ;;  %v1003_v55 = vmul.f32 %v995_v32, %v891_v2  ;;  %v5474_v57 = vadd.f32 %v854_v15, %v664_v28 }
 0x1c4   : > { %v909_v52 = vadd.f32 1.0, %v901_v37  ;;  %v997_v61 = vsub.f32 0.0, %v893_v27  ;;  %v5478_v8 = vmul.f32 0.70710677, %v5464_v25  ;;  %vm876_vm8 = vcmp.ge.f32.partialorder %v5435_v3, 0.0 }
 0x1c5   : > { %v910_v56 = vadd.f32 1.0, %v902_v44  ;;  %v1004_v9 = vmul.f32 %v996_v31, %v892_v0  ;;  %v1011_v62 = vmul.f32 1.442695, %v1002_v48  ;;  %v1013_v4 = vmul.f32 1.442695, %v1003_v55 }
 0x1c6   : > { %4848 = vrcp.f32 %v909_v52  ;;  %v895_v7 = vand.u32 2147483647, %v5478_v8  ;;  %v998_v5 = vsub.f32 0.0, %v894_v33  ;;  %v5486_v6 = vmul.f32 0.70710677, %v5474_v57 }
 0x1c7   : > { %4850 = vrcp.f32 %v910_v56  ;;  %v1005_v15 = vmul.f32 %v997_v61, %v893_v27  ;;  %v1015_v18 = vmul.f32 1.442695, %v1004_v9  ;;  %v5503_v55 = vsel %vm876_vm8, 1.0, %v4962_v36 }
 0x1c8   : > { %v5466_v46 = vpop.eup %4840  ;;  %v903_v0 = vmul.f32 0.3275911, %v895_v7  ;;  %4852 = vpow2.f32 %v1009_v47  ;;  %v5491_v21 = vand.u32 2147483647, %v5486_v6  ;;  %v1006_v44 = vmul.f32 %v998_v5, %v894_v33 }
 0x1c9   : > { %v5471_v53 = vpop.eup %4842  ;;  %v921_v54 = vmul.f32 1.0614054, %v5466_v46  ;;  %4854 = vpow2.f32 %v1011_v62  ;;  %v1017_v52 = vmul.f32 1.442695, %v1005_v15  ;;  %v999_v9 = vsub.f32 0.0, %v895_v7 }
 0x1ca   : > { %v922_v58 = vmul.f32 1.0614054, %v5471_v53  ;;  %v911_v37 = vadd.f32 1.0, %v903_v0  ;;  %v904_v27 = vmul.f32 0.3275911, %v5491_v21  ;;  %vm877_vm10 = vcmp.ge.f32.partialorder %v5445_v24, 0.0 }
 0x1cb   : > { %v929_v59 = vadd.f32 -1.4531521, %v921_v54  ;;  %v1019_v15 = vmul.f32 1.442695, %v1006_v44  ;;  %vm878_vm13 = vcmp.ge.f32.partialorder %v5450_v20, 0.0  ;;  %vm879_vm8 = vcmp.ge.f32.partialorder %v5478_v8, 0.0 }
 0x1cc   : > { %v930_v12 = vadd.f32 -1.4531521, %v922_v58  ;;  %v5482_v10 = vpop.eup %4844  ;;  %4856 = vrcp.f32 %v911_v37  ;;  %v912_v58 = vadd.f32 1.0, %v904_v27 }
 0x1cd   : > { %v937_v2 = vmul.f32 %v5466_v46, %v929_v59  ;;  %v923_v11 = vmul.f32 1.0614054, %v5482_v10  ;;  %v5493_v22 = vpop.eup %4846  ;;  %4858 = vpow2.f32 %v1013_v4 }
 0x1ce   : > { %v938_v13 = vmul.f32 %v5471_v53, %v930_v12  ;;  %v924_v31 = vmul.f32 1.0614054, %v5493_v22  ;;  %4860 = vrcp.f32 %v912_v58 }
 0x1cf   : > { %v945_v16 = vadd.f32 1.4214138, %v937_v2  ;;  %v931_v32 = vadd.f32 -1.4531521, %v923_v11  ;;  %4862 = vpow2.f32 %v1015_v18 }
 0x1d0   : > { %v946_v26 = vadd.f32 1.4214138, %v938_v13  ;;  %v932_v56 = vadd.f32 -1.4531521, %v924_v31  ;;  %v5505_v61 = vpop.eup %4848  ;;  %4864 = vpow2.f32 %v1017_v52 }
 0x1d1   : > { %v953_v28 = vmul.f32 %v5466_v46, %v945_v16  ;;  %v939_v47 = vmul.f32 %v5482_v10, %v931_v32  ;;  %v5507_v12 = vpop.eup %4850  ;;  %v925_v5 = vmul.f32 1.0614054, %v5505_v61  ;;  %4866 = vpow2.f32 %v1019_v15 }
 0x1d2   : > { %v954_v48 = vmul.f32 %v5471_v53, %v946_v26  ;;  %v940_v2 = vmul.f32 %v5493_v22, %v932_v56  ;;  %v926_v11 = vmul.f32 1.0614054, %v5507_v12  ;;  %v4853_v31 = vpop.eup %4852 }
 0x1d3   : > { %v961_v54 = vadd.f32 -0.28449672, %v953_v28  ;;  %v947_v33 = vadd.f32 1.4214138, %v939_v47  ;;  %v933_v4 = vadd.f32 -1.4531521, %v925_v5  ;;  %v1007_v28 = vmul.f32 %v999_v9, %v895_v7 }
 0x1d4   : > { %v962_v59 = vadd.f32 -0.28449672, %v954_v48  ;;  %v948_v16 = vadd.f32 1.4214138, %v940_v2  ;;  %v934_v37 = vadd.f32 -1.4531521, %v926_v11 }
 0x1d5   : > { %v969_v62 = vmul.f32 %v5466_v46, %v961_v54  ;;  %v955_v13 = vmul.f32 %v5482_v10, %v947_v33  ;;  %v941_v47 = vmul.f32 %v5505_v61, %v933_v4  ;;  %v4855_v54 = vpop.eup %4854  ;;  %v1000_v7 = vsub.f32 0.0, %v5491_v21 }
 0x1d6   : > { %v970_v3 = vmul.f32 %v5471_v53, %v962_v59  ;;  %v956_v48 = vmul.f32 %v5493_v22, %v948_v16  ;;  %v942_v18 = vmul.f32 %v5507_v12, %v934_v37  ;;  %v5522_v9 = vpop.eup %4856  ;;  %v1021_v5 = vmul.f32 1.442695, %v1007_v28 }
 0x1d7   : > { %v977_v0 = vadd.f32 0.2548296, %v969_v62  ;;  %v963_v32 = vadd.f32 -0.28449672, %v955_v13  ;;  %v949_v33 = vadd.f32 1.4214138, %v941_v47  ;;  %v4859_v11 = vpop.eup %4858  ;;  %v1008_v28 = vmul.f32 %v1000_v7, %v5491_v21 }
 0x1d8   : > { %v978_v26 = vadd.f32 0.2548296, %v970_v3  ;;  %v964_v59 = vadd.f32 -0.28449672, %v956_v48  ;;  %v950_v2 = vadd.f32 1.4214138, %v942_v18  ;;  %v5530_v4 = vpop.eup %4860  ;;  %4868 = vpow2.f32 %v1021_v5 }
 0x1d9   : > { %v985_v27 = vmul.f32 %v5466_v46, %v977_v0  ;;  %v971_v44 = vmul.f32 %v5482_v10, %v963_v32  ;;  %v927_v13 = vmul.f32 1.0614054, %v5522_v9  ;;  %v928_v47 = vmul.f32 1.0614054, %v5530_v4 }
 0x1da   : > { %v986_v56 = vmul.f32 %v5471_v53, %v978_v26  ;;  %v972_v3 = vmul.f32 %v5493_v22, %v964_v59  ;;  %v957_v53 = vmul.f32 %v5505_v61, %v949_v33  ;;  %v958_v16 = vmul.f32 %v5507_v12, %v950_v2 }
 0x1db   : > { %v1025_v58 = vmul.f32 %v4853_v31, %v985_v27  ;;  %v979_v62 = vadd.f32 0.2548296, %v971_v44  ;;  %v935_v37 = vadd.f32 -1.4531521, %v927_v13  ;;  %v936_v21 = vadd.f32 -1.4531521, %v928_v47 }
 0x1dc   : > { %v1026_v46 = vmul.f32 %v4855_v54, %v986_v56  ;;  %v980_v26 = vadd.f32 0.2548296, %v972_v3  ;;  %v965_v32 = vadd.f32 -0.28449672, %v957_v53  ;;  %v966_v48 = vadd.f32 -0.28449672, %v958_v16  ;;  %v4863_v54 = vpop.eup %4862 }
 0x1dd   : > { %v1033_v52 = vsub.f32 1.0, %v1025_v58  ;;  %v987_v0 = vmul.f32 %v5482_v10, %v979_v62  ;;  %v943_v44 = vmul.f32 %v5522_v9, %v935_v37  ;;  %v4865_v33 = vpop.eup %4864  ;;  %v1023_v62 = vmul.f32 1.442695, %v1008_v28 }
 0x1de   : > { %v1034_v15 = vsub.f32 1.0, %v1026_v46  ;;  %v988_v10 = vmul.f32 %v5493_v22, %v980_v26  ;;  %v973_v56 = vmul.f32 %v5505_v61, %v965_v32  ;;  %v974_v59 = vmul.f32 %v5507_v12, %v966_v48  ;;  %v4867_v2 = vpop.eup %4866 }
 0x1df   : > { %v1041_v31 = vmul.f32 %v1033_v52, %v5454_v29  ;;  %v1027_v27 = vmul.f32 %v4859_v11, %v987_v0  ;;  %v951_v46 = vadd.f32 1.4214138, %v943_v44  ;;  %v944_v53 = vmul.f32 %v5530_v4, %v936_v21 }
 0x1e0   : > { %v1042_v18 = vmul.f32 %v1034_v15, %v5458_v34  ;;  %v1028_v29 = vmul.f32 %v4863_v54, %v988_v10  ;;  %v981_v7 = vadd.f32 0.2548296, %v973_v56  ;;  %v982_v3 = vadd.f32 0.2548296, %v974_v59 }
 0x1e1   : > { %v1035_v58 = vsub.f32 1.0, %v1027_v27  ;;  %v1049_v52 = vadd.f32 1.0, %v1041_v31  ;;  %v885_v34 = vsel %vm877_vm10, 1.0, %v4962_v36  ;;  %v959_v11 = vmul.f32 %v5522_v9, %v951_v46 }
 0x1e2   : > { %v1036_v13 = vsub.f32 1.0, %v1028_v29  ;;  %v989_v5 = vmul.f32 %v5505_v61, %v981_v7  ;;  %v1050_v15 = vadd.f32 1.0, %v1042_v18  ;;  %v990_v16 = vmul.f32 %v5507_v12, %v982_v3 }
 0x1e3   : > { %v1043_v22 = vmul.f32 %v1035_v58, %v5469_v49  ;;  %v952_v26 = vadd.f32 1.4214138, %v944_v53  ;;  %v967_v37 = vadd.f32 -0.28449672, %v959_v11  ;;  %4870 = vpow2.f32 %v1023_v62 }
 0x1e4   : > { %v1044_v32 = vmul.f32 %v1036_v13, %v5503_v55  ;;  %v1029_v49 = vmul.f32 %v4865_v33, %v989_v5  ;;  %v5550_v28 = vmul.f32 %v1049_v52, %v5442_v17  ;;  %v1030_v31 = vmul.f32 %v4867_v2, %v990_v16 }
 0x1e5   : > { %v1051_v0 = vadd.f32 1.0, %v1043_v22  ;;  %v960_v61 = vmul.f32 %v5530_v4, %v952_v26  ;;  %v975_v12 = vmul.f32 %v5522_v9, %v967_v37  ;;  %v5560_v55 = vmul.f32 %v1050_v15, %v5447_v39  ;;  %v3447_v37 = vld [vmem:[%s6815_s2 + $0x20] sm:$0xff] }
 0x1e6   : > { %v1052_v27 = vadd.f32 1.0, %v1044_v32  ;;  %v1037_v54 = vsub.f32 1.0, %v1029_v49  ;;  %v1038_v56 = vsub.f32 1.0, %v1030_v31  ;;  %v886_v39 = vsel %vm878_vm13, 1.0, %v4962_v36  ;;  %v3448_v31 = vld [vmem:[%s6815_s2 + $0x28] sm:$0xff] }
 0x1e7   : > { %v5553_v24 = vmul.f32 %v1051_v0, %v5460_v35  ;;  %v968_v48 = vadd.f32 -0.28449672, %v960_v61  ;;  %v4869_v35 = vpop.eup %4868  ;;  %v983_v10 = vadd.f32 0.2548296, %v975_v12  ;;  %v887_v18 = vsel %vm879_vm8, 1.0, %v4962_v36  ;;  %v3449_v61 = vld [vmem:[%s6815_s2 + $0x30] sm:$0xff] }
 0x1e8   : > { %v5567_v47 = vmul.f32 %v1052_v27, %v5462_v43  ;;  %v1045_v43 = vmul.f32 %v1037_v54, %v885_v34  ;;  %v1046_v21 = vmul.f32 %v1038_v56, %v886_v39  ;;  %vm880_vm10 = vcmp.ge.f32.partialorder %v5486_v6, 0.0  ;;  %v3450_v27 = vld [vmem:[%s6815_s2 + $0x38] sm:$0xff] }
 0x1e9   : > { %v5564_v17 = vpack.i.bf16 %v5553_v24, %v5550_v28  ;;  %v976_v20 = vmul.f32 %v5530_v4, %v968_v48  ;;  %v991_v8 = vmul.f32 %v5522_v9, %v983_v10  ;;  %v3871_v62 = vpack.c.bf16 %v5553_v24, %v5550_v28 }
 0x1ea   : > { %v4365_v44 = vpack.i.bf16 %v5567_v47, %v5560_v55  ;;  %v3869_v9 = vpack.c.bf16 %v5567_v47, %v5560_v55  ;;  %v1053_v2 = vadd.f32 1.0, %v1045_v43  ;;  %v1054_v22 = vadd.f32 1.0, %v1046_v21 }
 0x1eb   : > { %4361 = vrot.lane.b32.xlu1 %v5564_v17, %s4952_s18  ;;  %v984_v58 = vadd.f32 0.2548296, %v976_v20  ;;  %v1031_v59 = vmul.f32 %v4869_v35, %v991_v8  ;;  %v861_v53 = vmul.f32 0.5, %v5438_v1  ;;  %v863_v13 = vmul.f32 0.5, %v5464_v25 }
 0x1ec   : > { %4366 = vrot.lane.b32.xlu0 %v4365_v44, %s4952_s18  ;;  %v888_v34 = vsel %vm880_vm10, 1.0, %v4962_v36  ;;  %v862_v6 = vmul.f32 0.5, %v5440_v40  ;;  %v864_v16 = vmul.f32 0.5, %v5474_v57  ;;  %v3436_v57 = vld [vmem:[%s6814_s1 + $0x68] sm:$0xff]  ;;  %vm6854_vm13 = vcmp.lt.s32.totalorder %v5076_v23, 15 }
 0x1ed   : > { %v992_v33 = vmul.f32 %v5530_v4, %v984_v58  ;;  %v4871_v29 = vpop.eup %4870  ;;  %v1039_v7 = vsub.f32 1.0, %v1031_v59  ;;  %v5588_v11 = vmul.f32 %v1053_v2, %v861_v53  ;;  %1579 = vmatprep.mubr.f32.mxu1 %v3436_v57  ;;  %vm6855_vm8 = vmmov %vm6854_vm13 }
 0x1ee   : > { %v5592_v0 = vmul.f32 %v1054_v22, %v862_v6  ;;  %vm6856_vm10 = vmmov %vm6855_vm8 }
 0x1ef   : > { %v1032_v46 = vmul.f32 %v4871_v29, %v992_v33  ;;  %v1047_v52 = vmul.f32 %v1039_v7, %v887_v18 }
 0x1f1   : > { %v1040_v3 = vsub.f32 1.0, %v1032_v46  ;;  %v1055_v4 = vadd.f32 1.0, %v1047_v52 }
 0x1f3   : > { %v1048_v5 = vmul.f32 %v1040_v3, %v888_v34  ;;  %v5590_v15 = vmul.f32 %v1055_v4, %v863_v13 }
 0x1f5   : > { %v1056_v26 = vadd.f32 1.0, %v1048_v5  ;;  %v4370_v1 = vpack.i.bf16 %v5590_v15, %v5588_v11  ;;  %v3875_v40 = vpack.c.bf16 %v5590_v15, %v5588_v11 }
 0x1f7   : > { %v5597_v32 = vmul.f32 %v1056_v26, %v864_v16  ;;  %4371 = vrot.lane.b32.xlu1 %v4370_v1, %s4952_s18 }
 0x1f9   : > { %v4380_v25 = vpack.i.bf16 %v5597_v32, %v5592_v0  ;;  %v3873_v49 = vpack.c.bf16 %v5597_v32, %v5592_v0 }
 0x1fb   : > { %4381 = vrot.lane.b32.xlu0 %v4380_v25, %s4952_s18  ;;  %4376 = vrot.lane.b32.xlu1 %v5564_v17, %s4953_s19 }
 0x1ff   : > { %4386 = vrot.lane.b32.xlu0 %v4365_v44, %s4953_s19  ;;  %4391 = vrot.lane.b32.xlu1 %v4370_v1, %s4953_s19 }
 0x203   : > { %4401 = vrot.lane.b32.xlu0 %v4380_v25, %s4953_s19  ;;  %4396 = vrot.lane.b32.xlu1 %v5564_v17, %s4954_s20 }
 0x207   : > { %4406 = vrot.lane.b32.xlu0 %v4365_v44, %s4954_s20  ;;  %4411 = vrot.lane.b32.xlu1 %v4370_v1, %s4954_s20 }
 0x20b   : > { %4421 = vrot.lane.b32.xlu0 %v4380_v25, %s4954_s20  ;;  %4416 = vrot.lane.b32.xlu1 %v5564_v17, %s4955_s21 }
 0x20f   : > { %4426 = vrot.lane.b32.xlu0 %v4365_v44, %s4955_s21  ;;  %4431 = vrot.lane.b32.xlu1 %v4370_v1, %s4955_s21 }
 0x213   : > { %4436 = vrot.lane.b32.xlu0 %v4380_v25, %s4955_s21  ;;  %4441 = vrot.lane.b32.xlu1 %v5564_v17, %s4956_s22 }
 0x217   : > { %4446 = vrot.lane.b32.xlu0 %v4365_v44, %s4956_s22  ;;  %4451 = vrot.lane.b32.xlu1 %v4370_v1, %s4956_s22 }
 0x21b   : > { %4461 = vrot.lane.b32.xlu0 %v4380_v25, %s4956_s22  ;;  %4456 = vrot.lane.b32.xlu1 %v5564_v17, %s4957_s23 }
 0x21f   : > { %4466 = vrot.lane.b32.xlu0 %v4365_v44, %s4957_s23  ;;  %4471 = vrot.lane.b32.xlu1 %v4370_v1, %s4957_s23 }
 0x223   : > { %4481 = vrot.lane.b32.xlu0 %v4380_v25, %s4957_s23  ;;  %4476 = vrot.lane.b32.xlu1 %v5564_v17, %s4958_s24 }
 0x227   : > { %4486 = vrot.lane.b32.xlu0 %v4365_v44, %s4958_s24  ;;  %4491 = vrot.lane.b32.xlu1 %v4370_v1, %s4958_s24 }
 0x22b   : > { %4496 = vrot.lane.b32.xlu0 %v4380_v25, %s4958_s24  ;;  %4501 = vrot.lane.b32.xlu1 %v5564_v17, %s4959_s25 }
 0x22f   : > { %4506 = vrot.lane.b32.xlu0 %v4365_v44, %s4959_s25  ;;  %4511 = vrot.lane.b32.xlu1 %v4370_v1, %s4959_s25 }
 0x233   : > { %4516 = vrot.lane.b32.xlu0 %v4380_v25, %s4959_s25  ;;  %1485 = vperm.xlu1 %4359, %v3447_v37  }
 0x237   : > { %1490 = vperm.xlu0 %4358, %v3448_v31   ;;  %1495 = vperm.xlu1 %4359, %v3449_v61  }
 0x23b   : > { %1500 = vperm.xlu0 %4358, %v3450_v27  }
 0x25d   : > { %v4362_v12 = vpop.permute.xlu1 %4361 }
 0x25e   : > { %v4364_v48 = vunpack.i.h.bf16 %v4362_v12  ;;  %v4363_v17 = vunpack.i.l.bf16 %v4362_v12  ;;  %v4367_v35 = vpop.permute.xlu0 %4366 }
 0x25f   : > { %v4369_v54 = vunpack.i.h.bf16 %v4367_v35  ;;  %v4368_v10 = vunpack.i.l.bf16 %v4367_v35 }
 0x261   : > { %v1081_v56 = vsel %vm222_vm2, %v4363_v17, %v4368_v10  ;;  %v1082_v20 = vsel %vm222_vm2, %v4364_v48, %v4369_v54  ;;  %v1085_v39 = vsel %vm222_vm2, %v4368_v10, %v4363_v17  ;;  %v1086_v8 = vsel %vm222_vm2, %v4369_v54, %v4364_v48 }
 0x262   : > { %v3823_v44 = vpack.c.bf16 %v1082_v20, %v1081_v56  ;;  %v3826_v18 = vpack.c.bf16 %v1086_v8, %v1085_v39 }
 0x264   : > { %3825 = vmatprep.subr.msk.bf16.mxu1 %vm5113_vm6, %v3823_v44 }
 0x265   : > { %3828 = vmatpush1.bf16.msk.msra.mxu1 %vm5121_vm7, %v3826_v18 }
 0x269   : > { %v4372_v58 = vpop.permute.xlu1 %4371 }
 0x26a   : > { %v4374_v43 = vunpack.i.h.bf16 %v4372_v58  ;;  %v4373_v59 = vunpack.i.l.bf16 %v4372_v58 }
 0x26d   : > { %v4382_v21 = vpop.permute.xlu0 %4381  ;;  %v4377_v7 = vpop.permute.xlu1 %4376 }
 0x26e   : > { %v4384_v33 = vunpack.i.h.bf16 %v4382_v21  ;;  %v4383_v29 = vunpack.i.l.bf16 %v4382_v21  ;;  %v4379_v46 = vunpack.i.h.bf16 %v4377_v7  ;;  %v4378_v2 = vunpack.i.l.bf16 %v4377_v7 }
 0x270   : > { %v1083_v52 = vsel %vm222_vm2, %v4373_v59, %v4383_v29  ;;  %v1084_v22 = vsel %vm222_vm2, %v4374_v43, %v4384_v33  ;;  %v1087_v3 = vsel %vm222_vm2, %v4383_v29, %v4373_v59  ;;  %v1088_v53 = vsel %vm222_vm2, %v4384_v33, %v4374_v43 }
 0x271   : > { %v4387_v13 = vpop.permute.xlu0 %4386  ;;  %v3829_v4 = vpack.c.bf16 %v1084_v22, %v1083_v52  ;;  %v3832_v34 = vpack.c.bf16 %v1088_v53, %v1087_v3  ;;  %v4392_v16 = vpop.permute.xlu1 %4391 }
 0x272   : > { %v4389_v6 = vunpack.i.h.bf16 %v4387_v13  ;;  %v4388_v5 = vunpack.i.l.bf16 %v4387_v13  ;;  %v4394_v26 = vunpack.i.h.bf16 %v4392_v16  ;;  %v4393_v1 = vunpack.i.l.bf16 %v4392_v16 }
 0x273   : > { %3831 = vmatprep.subr.msk.bf16.mxu1 %vm5113_vm6, %v3829_v4 }
 0x274   : > { %v1125_v25 = vsel %vm6823_vm5, %v4388_v5, %v4378_v2  ;;  %v1126_v57 = vsel %vm6823_vm5, %v4389_v6, %v4379_v46  ;;  %3834 = vmatpush1.bf16.msk.msra.mxu1 %vm5121_vm7, %v3832_v34  ;;  %v1121_v37 = vsel %vm6823_vm5, %v4378_v2, %v4388_v5  ;;  %v1122_v31 = vsel %vm6823_vm5, %v4379_v46, %v4389_v6 }
 0x275   : > { %v4402_v61 = vpop.permute.xlu0 %4401  ;;  %v3835_v27 = vpack.c.bf16 %v1122_v31, %v1121_v37  ;;  %v3837_v12 = vpack.c.bf16 %v1126_v57, %v1125_v25  ;;  %v4397_v35 = vpop.permute.xlu1 %4396 }
 0x276   : > { %v4404_v48 = vunpack.i.h.bf16 %v4402_v61  ;;  %v4403_v17 = vunpack.i.l.bf16 %v4402_v61  ;;  %v4399_v54 = vunpack.i.h.bf16 %v4397_v35  ;;  %v4398_v10 = vunpack.i.l.bf16 %v4397_v35 }
 0x277   : > { %3836 = vmatprep.subr.bf16.mxu1 %v3835_v27 }
 0x278   : > { %v1127_v56 = vsel %vm6823_vm5, %v4403_v17, %v4393_v1  ;;  %v1128_v20 = vsel %vm6823_vm5, %v4404_v48, %v4394_v26  ;;  %3839 = vmatpush1.bf16.msk.msra.mxu1 %vm5157_vm9, %v3837_v12  ;;  %v1123_v39 = vsel %vm6823_vm5, %v4393_v1, %v4403_v17  ;;  %v1124_v8 = vsel %vm6823_vm5, %v4394_v26, %v4404_v48  ;;  %vm6857_vm5 = vmmov %vm6855_vm8 }
 0x279   : > { %v4407_v44 = vpop.permute.xlu0 %4406  ;;  %v3840_v18 = vpack.c.bf16 %v1124_v8, %v1123_v39  ;;  %v3842_v58 = vpack.c.bf16 %v1128_v20, %v1127_v56  ;;  %v4412_v21 = vpop.permute.xlu1 %4411 }
 0x27a   : > { %v4409_v43 = vunpack.i.h.bf16 %v4407_v44  ;;  %v4408_v59 = vunpack.i.l.bf16 %v4407_v44  ;;  %v4414_v33 = vunpack.i.h.bf16 %v4412_v21  ;;  %v4413_v29 = vunpack.i.l.bf16 %v4412_v21 }
 0x27b   : > { %3841 = vmatprep.subr.bf16.mxu1 %v3840_v18 }
 0x27c   : > { %v1161_v7 = vsel %vm6854_vm13, %v4398_v10, %v4408_v59  ;;  %v1162_v46 = vsel %vm6855_vm8, %v4399_v54, %v4409_v43  ;;  %v1165_v2 = vsel %vm6856_vm10, %v4408_v59, %v4398_v10  ;;  %v1166_v52 = vsel %vm6857_vm5, %v4409_v43, %v4399_v54  ;;  %3844 = vmatpush1.bf16.msk.msra.mxu1 %vm5157_vm9, %v3842_v58  ;;  %vm6858_vm13 = vmmov %vm6857_vm5 }
 0x27d   : > { %v3845_v22 = vpack.c.bf16 %v1162_v46, %v1161_v7  ;;  %v3848_v3 = vpack.c.bf16 %v1166_v52, %v1165_v2  ;;  %v4422_v53 = vpop.permute.xlu0 %4421  ;;  %v4417_v34 = vpop.permute.xlu1 %4416  ;;  %vm6859_vm8 = vmmov %vm6857_vm5 }
 0x27e   : > { %v4424_v13 = vunpack.i.h.bf16 %v4422_v53  ;;  %v4423_v4 = vunpack.i.l.bf16 %v4422_v53  ;;  %v4419_v6 = vunpack.i.h.bf16 %v4417_v34  ;;  %v4418_v5 = vunpack.i.l.bf16 %v4417_v34  ;;  %vm6860_vm10 = vmmov %vm6857_vm5 }
 0x27f   : > { %3847 = vmatprep.subr.msk.bf16.mxu1 %vm5186_vm12, %v3845_v22 }
 0x280   : > { %v1163_v16 = vsel %vm6858_vm13, %v4413_v29, %v4423_v4  ;;  %v1164_v26 = vsel %vm6859_vm8, %v4414_v33, %v4424_v13  ;;  %v1167_v1 = vsel %vm6857_vm5, %v4423_v4, %v4413_v29  ;;  %v1168_v25 = vsel %vm6860_vm10, %v4424_v13, %v4414_v33  ;;  %3850 = vmatpush1.bf16.msk.msra.mxu1 %vm5207_vm15, %v3848_v3 }
 0x281   : > { %v3851_v57 = vpack.c.bf16 %v1164_v26, %v1163_v16  ;;  %v3854_v37 = vpack.c.bf16 %v1168_v25, %v1167_v1  ;;  %v4427_v31 = vpop.permute.xlu0 %4426  ;;  %v4432_v12 = vpop.permute.xlu1 %4431  ;;  %vm6861_vm13 = vcmp.lt.s32.totalorder %v5076_v23, 1 }
 0x282   : > { %v4429_v61 = vunpack.i.h.bf16 %v4427_v31  ;;  %v4428_v27 = vunpack.i.l.bf16 %v4427_v31  ;;  %v4434_v48 = vunpack.i.h.bf16 %v4432_v12  ;;  %v4433_v17 = vunpack.i.l.bf16 %v4432_v12  ;;  %vm6862_vm8 = vmmov %vm6861_vm13 }
 0x283   : > { %3853 = vmatprep.subr.msk.bf16.mxu1 %vm5186_vm12, %v3851_v57  ;;  %vm6863_vm5 = vmmov %vm6862_vm8 }
 0x284   : > { %v1201_v35 = vsel %vm6861_vm13, %v4418_v5, %v4428_v27  ;;  %v1202_v54 = vsel %vm6862_vm8, %v4419_v6, %v4429_v61  ;;  %v1205_v10 = vsel %vm6863_vm5, %v4428_v27, %v4418_v5  ;;  %vm6864_vm10 = vmmov %vm6863_vm5  ;;  %3856 = vmatpush1.bf16.msk.msra.mxu1 %vm5207_vm15, %v3854_v37 }
 0x285   : > { %v1206_v56 = vsel %vm6864_vm10, %v4429_v61, %v4419_v6  ;;  %v3857_v20 = vpack.c.bf16 %v1202_v54, %v1201_v35  ;;  %v4437_v8 = vpop.permute.xlu0 %4436  ;;  %v4442_v58 = vpop.permute.xlu1 %4441  ;;  %vm6865_vm13 = vmmov %vm6863_vm5 }
 0x286   : > { %v3860_v39 = vpack.c.bf16 %v1206_v56, %v1205_v10  ;;  %v4439_v44 = vunpack.i.h.bf16 %v4437_v8  ;;  %v4438_v18 = vunpack.i.l.bf16 %v4437_v8  ;;  %vm6866_vm8 = vmmov %vm6863_vm5  ;;  %v4444_v52 = vunpack.i.h.bf16 %v4442_v58 }
 0x287   : > { %3859 = vmatprep.subr.msk.bf16.mxu1 %vm5113_vm6, %v3857_v20  ;;  %vm6867_vm10 = vmmov %vm6863_vm5  ;;  %v4443_v22 = vunpack.i.l.bf16 %v4442_v58 }
 0x288   : > { %v1203_v43 = vsel %vm6865_vm13, %v4433_v17, %v4438_v18  ;;  %v1204_v59 = vsel %vm6866_vm8, %v4434_v48, %v4439_v44  ;;  %v1207_v21 = vsel %vm6863_vm5, %v4438_v18, %v4433_v17  ;;  %v1208_v33 = vsel %vm6867_vm10, %v4439_v44, %v4434_v48  ;;  %3862 = vmatpush1.bf16.msk.msra.mxu1 %vm5232_vm0, %v3860_v39 }
 0x289   : > { %v3863_v29 = vpack.c.bf16 %v1204_v59, %v1203_v43  ;;  %v3866_v7 = vpack.c.bf16 %v1208_v33, %v1207_v21  ;;  %v4447_v46 = vpop.permute.xlu0 %4446  ;;  %v4452_v2 = vpop.permute.xlu1 %4451  ;;  %vm6868_vm13 = vcmp.lt.s32.totalorder %v5076_v23, 127 }
 0x28a   : > { %v4449_v3 = vunpack.i.h.bf16 %v4447_v46  ;;  %v4448_v53 = vunpack.i.l.bf16 %v4447_v46  ;;  %v4454_v34 = vunpack.i.h.bf16 %v4452_v2  ;;  %v4453_v6 = vunpack.i.l.bf16 %v4452_v2  ;;  %vm6869_vm8 = vmmov %vm6868_vm13 }
 0x28b   : > { %3865 = vmatprep.subr.msk.bf16.mxu1 %vm5113_vm6, %v3863_v29  ;;  %vm6870_vm5 = vmmov %vm6869_vm8 }
 0x28c   : > { %3868 = vmatpush1.bf16.msk.msra.mxu1 %vm5232_vm0, %v3866_v7  ;;  %v1253_v5 = vsel %vm6868_vm13, %v4448_v53, %v4443_v22  ;;  %v1254_v16 = vsel %vm6869_vm8, %v4449_v3, %v4444_v52  ;;  %v1249_v55 = vsel %vm6870_vm5, %v4443_v22, %v4448_v53  ;;  %vm6871_vm10 = vmmov %vm6870_vm5 }
 0x28d   : > { %v4462_v13 = vpop.permute.xlu0 %4461  ;;  %3870 = vmatprep.subr.bf16.mxu1 %v3869_v9  ;;  %v4457_v4 = vpop.permute.xlu1 %4456  ;;  %v1250_v9 = vsel %vm6871_vm10, %v4444_v52, %v4449_v3  ;;  %v3877_v57 = vpack.c.bf16 %v1254_v16, %v1253_v5  ;;  %vm6872_vm13 = vmmov %vm6870_vm5 }
 0x28e   : > { %v4464_v26 = vunpack.i.h.bf16 %v4462_v13  ;;  %v4463_v1 = vunpack.i.l.bf16 %v4462_v13  ;;  %v4459_v37 = vunpack.i.h.bf16 %v4457_v4  ;;  %v4458_v31 = vunpack.i.l.bf16 %v4457_v4  ;;  %vm6873_vm8 = vmmov %vm6870_vm5 }
 0x28f   : > { %v3880_v32 = vpack.c.bf16 %v1250_v9, %v1249_v55  ;;  %vm6874_vm10 = vmmov %vm6870_vm5 }
 0x290   : > { %3872 = vmatpush1.bf16.msra.mxu1 %v3871_v62  ;;  %v1255_v61 = vsel %vm6872_vm13, %v4463_v1, %v4453_v6  ;;  %v1256_v28 = vsel %vm6873_vm8, %v4464_v26, %v4454_v34  ;;  %v1252_v12 = vsel %vm6874_vm10, %v4454_v34, %v4464_v26  ;;  %vm6875_vm13 = vcmp.lt.s32.totalorder %v5076_v23, 113 }
 0x291   : > { %v4467_v25 = vpop.permute.xlu0 %4466  ;;  %3874 = vmatprep.subr.bf16.mxu1 %v3873_v49  ;;  %v4472_v47 = vpop.permute.xlu1 %4471  ;;  %v1251_v49 = vsel %vm6870_vm5, %v4453_v6, %v4463_v1  ;;  %v3883_v48 = vpack.c.bf16 %v1256_v28, %v1255_v61  ;;  %vm6876_vm8 = vmmov %vm6875_vm13 }
 0x292   : > { %v4469_v24 = vunpack.i.h.bf16 %v4467_v25  ;;  %v4468_v62 = vunpack.i.l.bf16 %v4467_v25  ;;  %v4474_v17 = vunpack.i.h.bf16 %v4472_v47  ;;  %v4473_v35 = vunpack.i.l.bf16 %v4472_v47  ;;  %vm6877_vm5 = vmmov %vm6876_vm8 }
 0x293   : > { %v3886_v56 = vpack.c.bf16 %v1252_v12, %v1251_v49  ;;  %vm6878_vm10 = vmmov %vm6877_vm5 }
 0x294   : > { %3876 = vmatpush1.bf16.msra.mxu1 %v3875_v40  ;;  %v1293_v54 = vsel %vm6875_vm13, %v4468_v62, %v4458_v31  ;;  %v1294_v11 = vsel %vm6876_vm8, %v4469_v24, %v4459_v37  ;;  %v1289_v20 = vsel %vm6877_vm5, %v4458_v31, %v4468_v62  ;;  %v1290_v8 = vsel %vm6878_vm10, %v4459_v37, %v4469_v24  ;;  %vm6879_vm13 = vmmov %vm6877_vm5 }
 0x295   : > { %v4482_v0 = vpop.permute.xlu0 %4481  ;;  %3879 = vmatprep.subr.msk.bf16.mxu1 %vm5186_vm12, %v3877_v57  ;;  %v4477_v27 = vpop.permute.xlu1 %4476  ;;  %v3889_v44 = vpack.c.bf16 %v1294_v11, %v1293_v54  ;;  %vm6880_vm8 = vmmov %vm6877_vm5  ;;  %v3892_v7 = vpack.c.bf16 %v1290_v8, %v1289_v20  ;;  %v3435_v20 = vld [vmem:[%s6814_s1 + $0x60] sm:$0xff] }
 0x296   : > { %v4484_v15 = vunpack.i.h.bf16 %v4482_v0  ;;  %v4483_v40 = vunpack.i.l.bf16 %v4482_v0  ;;  %v4479_v18 = vunpack.i.h.bf16 %v4477_v27  ;;  %v4478_v58 = vunpack.i.l.bf16 %v4477_v27  ;;  %vm6881_vm10 = vmmov %vm6877_vm5 }
 0x298   : > { %3882 = vmatpush1.bf16.msk.msra.mxu1 %vm5280_vm14, %v3880_v32  ;;  %v1295_v43 = vsel %vm6879_vm13, %v4483_v40, %v4473_v35  ;;  %v1296_v59 = vsel %vm6880_vm8, %v4484_v15, %v4474_v17  ;;  %v1291_v46 = vsel %vm6877_vm5, %v4473_v35, %v4483_v40  ;;  %v1292_v52 = vsel %vm6881_vm10, %v4474_v17, %v4484_v15 }
 0x299   : > { %v4487_v10 = vpop.permute.xlu0 %4486  ;;  %3885 = vmatprep.subr.msk.bf16.mxu1 %vm5186_vm12, %v3883_v48  ;;  %v4492_v39 = vpop.permute.xlu1 %4491  ;;  %v3895_v22 = vpack.c.bf16 %v1296_v59, %v1295_v43  ;;  %vm6882_vm13 = vcmp.lt.s32.totalorder %v5076_v23, 112  ;;  %v3898_v16 = vpack.c.bf16 %v1292_v52, %v1291_v46  ;;  %v3438_v43 = vld [vmem:[%s6814_s1 + $0x78] sm:$0xff]  ;;  %v3437_v46 = vld [vmem:[%s6814_s1 + $0x70] sm:$0xff]  ;;  %v3443_v52 = vld [vmem:[%s6814_s1 + $0xa0] sm:$0xff] }
 0x29a   : > { %v4489_v21 = vunpack.i.h.bf16 %v4487_v10  ;;  %v4488_v33 = vunpack.i.l.bf16 %v4487_v10  ;;  %v4494_v3 = vunpack.i.h.bf16 %v4492_v39  ;;  %v4493_v53 = vunpack.i.l.bf16 %v4492_v39  ;;  %vm6883_vm8 = vmmov %vm6882_vm13  ;;  %v3439_v39 = vld [vmem:[%s6814_s1 + $0x80] sm:$0xff]  ;;  %v3442_v59 = vld [vmem:[%s6814_s1 + $0x98] sm:$0xff] }
 0x29b   : > { %vm6884_vm5 = vmmov %vm6883_vm8 }
 0x29c   : > { %3888 = vmatpush1.bf16.msk.msra.mxu1 %vm5280_vm14, %v3886_v56  ;;  %v1333_v13 = vsel %vm6882_vm13, %v4488_v33, %v4478_v58  ;;  %v1334_v4 = vsel %vm6883_vm8, %v4489_v21, %v4479_v18  ;;  %v1329_v26 = vsel %vm6884_vm5, %v4478_v58, %v4488_v33  ;;  %vm6885_vm10 = vmmov %vm6884_vm5  ;;  %v3441_v33 = vld [vmem:[%s6814_s1 + $0x90] sm:$0xff] }
 0x29d   : > { %v4497_v29 = vpop.permute.xlu0 %4496  ;;  %3891 = vmatprep.subr.msk.bf16.mxu1 %vm5316_vm1, %v3889_v44  ;;  %v4502_v2 = vpop.permute.xlu1 %4501  ;;  %v3901_v1 = vpack.c.bf16 %v1334_v4, %v1333_v13  ;;  %v1330_v47 = vsel %vm6885_vm10, %v4479_v18, %v4489_v21  ;;  %vm6886_vm13 = vmmov %vm6884_vm5 }
 0x29e   : > { %v4499_v34 = vunpack.i.h.bf16 %v4497_v29  ;;  %v4498_v6 = vunpack.i.l.bf16 %v4497_v29  ;;  %v4504_v25 = vunpack.i.h.bf16 %v4502_v2  ;;  %v4503_v55 = vunpack.i.l.bf16 %v4502_v2  ;;  %vm6887_vm8 = vmmov %vm6884_vm5  ;;  %v3445_v29 = vld [vmem:[%s6814_s1 + $0xb0] sm:$0xff]  ;;  %v3440_v2 = vld [vmem:[%s6814_s1 + $0x88] sm:$0xff] }
 0x29f   : > { %v3904_v24 = vpack.c.bf16 %v1330_v47, %v1329_v26  ;;  %vm6888_vm10 = vmmov %vm6884_vm5 }
 0x2a0   : > { %3894 = vmatpush1.bf16.msk.msra.mxu1 %vm5232_vm0, %v3892_v7  ;;  %v1335_v9 = vsel %vm6886_vm13, %v4498_v6, %v4493_v53  ;;  %v1336_v57 = vsel %vm6887_vm8, %v4499_v34, %v4494_v3  ;;  %v1331_v62 = vsel %vm6884_vm5, %v4493_v53, %v4498_v6  ;;  %v1332_v27 = vsel %vm6888_vm10, %v4494_v3, %v4499_v34  ;;  %v3444_v7 = vld [vmem:[%s6814_s1 + $0xa8] sm:$0xff] }
 0x2a1   : > { %v4507_v5 = vpop.permute.xlu0 %4506  ;;  %3897 = vmatprep.subr.msk.bf16.mxu1 %vm5316_vm1, %v3895_v22  ;;  %v4512_v61 = vpop.permute.xlu1 %4511  ;;  %v3906_v0 = vpack.c.bf16 %v1336_v57, %v1335_v9  ;;  %v3909_v54 = vpack.c.bf16 %v1332_v27, %v1331_v62  ;;  %vm6889_vm13 = vcmask 261120   ;;  %v3446_v22 = vld [vmem:[%s6814_s1 + $0xb8] sm:$0xff] }
 0x2a2   : > { %v4509_v37 = vunpack.i.h.bf16 %v4507_v5  ;;  %v4508_v31 = vunpack.i.l.bf16 %v4507_v5  ;;  %v4514_v32 = vunpack.i.h.bf16 %v4512_v61  ;;  %v4513_v49 = vunpack.i.l.bf16 %v4512_v61  ;;  %vm6890_vm8 = vmmov %vm6889_vm13 }
 0x2a3   : > { %vm6891_vm5 = vmmov %vm6890_vm8 }
 0x2a4   : > { %3900 = vmatpush1.bf16.msk.msra.mxu1 %vm5232_vm0, %v3898_v16  ;;  %v1373_v12 = vsel %vm531_vm11, %v4508_v31, %v4503_v55  ;;  %v1374_v48 = vsel %vm531_vm11, %v4509_v37, %v4504_v25  ;;  %v1369_v11 = vsel %vm531_vm11, %v4503_v55, %v4508_v31  ;;  %v1370_v15 = vsel %vm531_vm11, %v4504_v25, %v4509_v37  ;;  %vm6892_vm10 = vmmov %vm6891_vm5 }
 0x2a5   : > { %v4517_v28 = vpop.permute.xlu0 %4516  ;;  %3903 = vmatprep.subr.msk.bf16.mxu1 %vm5348_vm4, %v3901_v1  ;;  %v3911_v40 = vpack.c.bf16 %v1374_v48, %v1373_v12  ;;  %v3914_v8 = vpack.c.bf16 %v1370_v15, %v1369_v11 }
 0x2a6   : > { %v4519_v17 = vunpack.i.h.bf16 %v4517_v28  ;;  %v4518_v35 = vunpack.i.l.bf16 %v4517_v28 }
 0x2a8   : > { %3905 = vmatpush1.bf16.msra.mxu1 %v3904_v24  ;;  %v1375_v10 = vsel %vm531_vm11, %v4518_v35, %v4513_v49  ;;  %v1376_v56 = vsel %vm531_vm11, %v4519_v17, %v4514_v32  ;;  %v1371_v44 = vsel %vm531_vm11, %v4513_v49, %v4518_v35  ;;  %v1372_v18 = vsel %vm531_vm11, %v4514_v32, %v4519_v17 }
 0x2a9   : > { %3908 = vmatprep.subr.msk.bf16.mxu1 %vm5348_vm4, %v3906_v0  ;;  %v3917_v58 = vpack.c.bf16 %v1376_v56, %v1375_v10  ;;  %v3920_v21 = vpack.c.bf16 %v1372_v18, %v1371_v44 }
 0x2ac   : > { %3910 = vmatpush1.bf16.msra.mxu1 %v3909_v54 }
 0x2ad   : > { %3913 = vmatprep.subr.msk.bf16.mxu1 %vm5374_vm3, %v3911_v40 }
 0x2af   : > { %1580 = vmatmul.mubr.f32.vlgmr.msra.gmra.mrb[0].mxu1 %v3435_v20 }
 0x2b0   : > { %3916 = vmatpush1.bf16.msk.msra.mxu1 %vm5280_vm14, %v3914_v8  ;;  %1585 = vmatprep.mubr.f32.mxu1 %v3439_v39 }
 0x2b1   : > { %3919 = vmatprep.subr.msk.bf16.mxu1 %vm5374_vm3, %v3917_v58 }
 0x2b2   : > { %v1486_v3 = vpop.permute.xlu1 %1485 }
 0x2b3   : > { %1586 = vmatmul.mubr.f32.gmra.mrb[2].mxu1 %v3438_v43 }
 0x2b4   : > { %3922 = vmatpush1.bf16.msk.msra.mxu1 %vm5280_vm14, %v3920_v21  ;;  %1591 = vmatprep.mubr.f32.mxu1 %v3442_v59 }
 0x2b6   : > { %v1491_v5 = vpop.permute.xlu0 %1490  ;;  %v1496_v49 = vpop.permute.xlu1 %1495 }
 0x2b7   : > { %1592 = vmatmul.mubr.f32.gmra.mrb[4].mxu1 %v3441_v33 }
 0x2b8   : > { %1597 = vmatprep.mubr.f32.mxu1 %v3445_v29 }
 0x2ba   : > { %v1501_v33 = vpop.permute.xlu0 %1500 }
 0x2bb   : > { %1598 = vmatmul.mubr.f32.gmra.mrb[6].mxu1 %v3444_v7 }
 0x2bc   : > { %1668 = vmatprep.mubr.f32.mxu1 %v4961_v41 }
 0x2bf   : > { %3451 = vmatmul.mubr.msk.f32.vlgmr.msra.gmra.mrb[0].mxu1 %vm6889_vm13, %v3437_v46 }
 0x2c0   : > { %1674 = vmatprep.mubr.f32.mxu1 %v4961_v41 }
 0x2c3   : > { %3452 = vmatmul.mubr.msk.f32.gmra.mrb[2].mxu1 %vm6890_vm8, %v3440_v2 }
 0x2c4   : > { %1680 = vmatprep.mubr.f32.mxu1 %v4961_v41 }
 0x2c7   : > { %3453 = vmatmul.mubr.msk.f32.gmra.mrb[4].mxu1 %vm6891_vm5, %v3443_v52 }
 0x2c8   : > { %1686 = vmatprep.mubr.f32.mxu1 %v4961_v41 }
 0x2cb   : > { %3454 = vmatmul.mubr.msk.f32.gmra.mrb[6].mxu1 %vm6892_vm10, %v3446_v22 }
 0x392   : > { %v1670_v53 = vpop.f32.mrb[0].mxu1 }
 0x393   : > { %v4131_v13 = vadd.f32 %v1670_v53, %v1486_v3  ;;  %v1672_v4 = vpop.f32.mrb[1].mxu1 }
 0x394   : > { %v4132_v34 = vadd.f32 %v1672_v4, %v1486_v3 }
 0x395   : > { %v1701_v6 = vmul.f32 0.70710677, %v4131_v13  ;;  %v5901_v40 = vmul.f32 0.5, %v4131_v13 }
 0x396   : > { %v1702_v16 = vmul.f32 0.70710677, %v4132_v34  ;;  %v1676_v26 = vpop.f32.mrb[2].mxu1  ;;  %v5906_v20 = vmul.f32 0.5, %v4132_v34 }
 0x397   : > { %v1725_v1 = vand.u32 2147483647, %v1701_v6  ;;  %v4133_v25 = vadd.f32 %v1676_v26, %v1491_v5  ;;  %v1678_v55 = vpop.f32.mrb[3].mxu1  ;;  %vm1709_vm13 = vcmp.ge.f32.partialorder %v1701_v6, 0.0 }
 0x398   : > { %v1726_v47 = vand.u32 2147483647, %v1702_v16  ;;  %v4134_v9 = vadd.f32 %v1678_v55, %v1491_v5  ;;  %vm1710_vm8 = vcmp.ge.f32.partialorder %v1702_v16, 0.0  ;;  %v5913_v43 = vsel %vm1709_vm13, 1.0, %v4962_v36 }
 0x399   : > { %v1733_v57 = vmul.f32 0.3275911, %v1725_v1  ;;  %v1703_v31 = vmul.f32 0.70710677, %v4133_v25  ;;  %v1829_v48 = vsub.f32 0.0, %v1725_v1  ;;  %v5917_v29 = vsel %vm1710_vm8, 1.0, %v4962_v36 }
 0x39a   : > { %v1734_v37 = vmul.f32 0.3275911, %v1726_v47  ;;  %v5894_v28 = vmul.f32 0.70710677, %v4134_v9  ;;  %v1682_v24 = vpop.f32.mrb[4].mxu1  ;;  %v1830_v44 = vsub.f32 0.0, %v1726_v47 }
 0x39b   : > { %v1741_v61 = vadd.f32 1.0, %v1733_v57  ;;  %v1727_v0 = vand.u32 2147483647, %v1703_v31  ;;  %v1684_v32 = vpop.f32.mrb[5].mxu1  ;;  %v5897_v35 = vadd.f32 %v1682_v24, %v1496_v49  ;;  %v1837_v8 = vmul.f32 %v1829_v48, %v1725_v1 }
 0x39c   : > { %v1742_v62 = vadd.f32 1.0, %v1734_v37  ;;  %v1728_v17 = vand.u32 2147483647, %v5894_v28  ;;  %v5899_v15 = vadd.f32 %v1684_v32, %v1496_v49  ;;  %vm1711_vm5 = vcmp.ge.f32.partialorder %v1703_v31, 0.0 }
 0x39d   : > { %4872 = vrcp.f32 %v1741_v61  ;;  %v1735_v27 = vmul.f32 0.3275911, %v1727_v0  ;;  %v5904_v56 = vmul.f32 0.70710677, %v5897_v35  ;;  %v1831_v59 = vsub.f32 0.0, %v1727_v0 }
 0x39e   : > { %4874 = vrcp.f32 %v1742_v62  ;;  %v1688_v12 = vpop.f32.mrb[6].mxu1  ;;  %v1736_v10 = vmul.f32 0.3275911, %v1728_v17  ;;  %v5909_v39 = vmul.f32 0.70710677, %v5899_v15  ;;  %v5919_v7 = vmul.f32 0.5, %v4133_v25 }
 0x39f   : > { %v1690_v54 = vpop.f32.mrb[7].mxu1  ;;  %v1743_v11 = vadd.f32 1.0, %v1735_v27  ;;  %v1729_v58 = vand.u32 2147483647, %v5904_v56  ;;  %v5921_v2 = vmul.f32 0.5, %v4134_v9  ;;  %v1832_v52 = vsub.f32 0.0, %v1728_v17 }
 0x3a0   : > { %v1744_v18 = vadd.f32 1.0, %v1736_v10  ;;  %v1730_v21 = vand.u32 2147483647, %v5909_v39  ;;  %v5923_v3 = vadd.f32 %v1688_v12, %v1501_v33  ;;  %v1845_v13 = vmul.f32 1.442695, %v1837_v8 }
 0x3a1   : > { %4876 = vrcp.f32 %v1743_v11  ;;  %v1737_v46 = vmul.f32 0.3275911, %v1729_v58  ;;  %v1838_v4 = vmul.f32 %v1830_v44, %v1726_v47  ;;  %v5928_v34 = vsel %vm1711_vm5, 1.0, %v4962_v36 }
 0x3a2   : > { %4878 = vrcp.f32 %v1744_v18  ;;  %v1738_v22 = vmul.f32 0.3275911, %v1730_v21  ;;  %v1839_v26 = vmul.f32 %v1831_v59, %v1727_v0  ;;  %v5933_v25 = vadd.f32 %v1690_v54, %v1501_v33 }
 0x3a3   : > { %v1745_v6 = vadd.f32 1.0, %v1737_v46  ;;  %v1833_v9 = vsub.f32 0.0, %v1729_v58  ;;  %v5937_v57 = vmul.f32 0.70710677, %v5923_v3  ;;  %vm1712_vm10 = vcmp.ge.f32.partialorder %v5894_v28, 0.0 }
 0x3a4   : > { %v1746_v1 = vadd.f32 1.0, %v1738_v22  ;;  %v1840_v37 = vmul.f32 %v1832_v52, %v1728_v17  ;;  %v1847_v61 = vmul.f32 1.442695, %v1838_v4  ;;  %v1849_v32 = vmul.f32 1.442695, %v1839_v26 }
 0x3a5   : > { %4880 = vrcp.f32 %v1745_v6  ;;  %v1731_v24 = vand.u32 2147483647, %v5937_v57  ;;  %v1834_v49 = vsub.f32 0.0, %v1730_v21  ;;  %v5945_v27 = vmul.f32 0.70710677, %v5933_v25 }
 0x3a6   : > { %4882 = vrcp.f32 %v1746_v1  ;;  %v1841_v54 = vmul.f32 %v1833_v9, %v1729_v58  ;;  %v1851_v10 = vmul.f32 1.442695, %v1840_v37  ;;  %v5962_v26 = vsel %vm1712_vm10, 1.0, %v4962_v36 }
 0x3a7   : > { %v5925_v53 = vpop.eup %4872  ;;  %v1739_v17 = vmul.f32 0.3275911, %v1731_v24  ;;  %4884 = vpow2.f32 %v1845_v13  ;;  %v5950_v8 = vand.u32 2147483647, %v5945_v27  ;;  %v1842_v22 = vmul.f32 %v1834_v49, %v1730_v21 }
 0x3a8   : > { %v5930_v5 = vpop.eup %4874  ;;  %v1757_v16 = vmul.f32 1.0614054, %v5925_v53  ;;  %4886 = vpow2.f32 %v1847_v61  ;;  %v1853_v6 = vmul.f32 1.442695, %v1841_v54  ;;  %v1835_v37 = vsub.f32 0.0, %v1731_v24 }
 0x3a9   : > { %v1758_v55 = vmul.f32 1.0614054, %v5930_v5  ;;  %v1747_v33 = vadd.f32 1.0, %v1739_v17  ;;  %v1740_v58 = vmul.f32 0.3275911, %v5950_v8  ;;  %vm1713_vm13 = vcmp.ge.f32.partialorder %v5904_v56, 0.0 }
 0x3aa   : > { %v1765_v47 = vadd.f32 -1.4531521, %v1757_v16  ;;  %v1855_v54 = vmul.f32 1.442695, %v1842_v22  ;;  %vm1714_vm8 = vcmp.ge.f32.partialorder %v5909_v39, 0.0  ;;  %vm1715_vm5 = vcmp.ge.f32.partialorder %v5937_v57, 0.0 }
 0x3ab   : > { %v1766_v31 = vadd.f32 -1.4531521, %v1758_v55  ;;  %v5941_v62 = vpop.eup %4876  ;;  %4888 = vrcp.f32 %v1747_v33  ;;  %v1748_v55 = vadd.f32 1.0, %v1740_v58  ;;  %vm1716_vm10 = vcmp.ge.f32.partialorder %v5945_v27, 0.0 }
 0x3ac   : > { %v1773_v0 = vmul.f32 %v5925_v53, %v1765_v47  ;;  %v1759_v48 = vmul.f32 1.0614054, %v5941_v62  ;;  %v5952_v44 = vpop.eup %4878  ;;  %4890 = vpow2.f32 %v1849_v32  ;;  %v1698_v27 = vmul.f32 0.5, %v5899_v15 }
 0x3ad   : > { %v1774_v12 = vmul.f32 %v5930_v5, %v1766_v31  ;;  %v1760_v52 = vmul.f32 1.0614054, %v5952_v44  ;;  %4892 = vrcp.f32 %v1748_v55 }
 0x3ae   : > { %v1781_v11 = vadd.f32 1.4214138, %v1773_v0  ;;  %v1767_v59 = vadd.f32 -1.4531521, %v1759_v48  ;;  %4894 = vpow2.f32 %v1851_v10 }
 0x3af   : > { %v1782_v18 = vadd.f32 1.4214138, %v1774_v12  ;;  %v1768_v1 = vadd.f32 -1.4531521, %v1760_v52  ;;  %v5964_v9 = vpop.eup %4880  ;;  %4896 = vpow2.f32 %v1853_v6 }
 0x3b0   : > { %v1789_v46 = vmul.f32 %v5925_v53, %v1781_v11  ;;  %v1775_v13 = vmul.f32 %v5941_v62, %v1767_v59  ;;  %v5966_v31 = vpop.eup %4882  ;;  %v1761_v49 = vmul.f32 1.0614054, %v5964_v9  ;;  %4898 = vpow2.f32 %v1855_v54 }
 0x3b1   : > { %v1790_v4 = vmul.f32 %v5930_v5, %v1782_v18  ;;  %v1776_v0 = vmul.f32 %v5952_v44, %v1768_v1  ;;  %v1762_v48 = vmul.f32 1.0614054, %v5966_v31  ;;  %v4885_v52 = vpop.eup %4884 }
 0x3b2   : > { %v1797_v16 = vadd.f32 -0.28449672, %v1789_v46  ;;  %v1783_v21 = vadd.f32 1.4214138, %v1775_v13  ;;  %v1769_v32 = vadd.f32 -1.4531521, %v1761_v49  ;;  %v1843_v46 = vmul.f32 %v1835_v37, %v1731_v24 }
 0x3b3   : > { %v1798_v47 = vadd.f32 -0.28449672, %v1790_v4  ;;  %v1784_v11 = vadd.f32 1.4214138, %v1776_v0  ;;  %v1770_v33 = vadd.f32 -1.4531521, %v1762_v48 }
 0x3b4   : > { %v1805_v61 = vmul.f32 %v5925_v53, %v1797_v16  ;;  %v1791_v12 = vmul.f32 %v5941_v62, %v1783_v21  ;;  %v1777_v13 = vmul.f32 %v5964_v9, %v1769_v32  ;;  %v4887_v16 = vpop.eup %4886  ;;  %v1836_v24 = vsub.f32 0.0, %v5950_v8 }
 0x3b5   : > { %v1806_v28 = vmul.f32 %v5930_v5, %v1798_v47  ;;  %v1792_v4 = vmul.f32 %v5952_v44, %v1784_v11  ;;  %v1778_v10 = vmul.f32 %v5966_v31, %v1770_v33  ;;  %v5981_v37 = vpop.eup %4888  ;;  %v1857_v49 = vmul.f32 1.442695, %v1843_v46 }
 0x3b6   : > { %v1813_v17 = vadd.f32 0.2548296, %v1805_v61  ;;  %v1799_v59 = vadd.f32 -0.28449672, %v1791_v12  ;;  %v1785_v21 = vadd.f32 1.4214138, %v1777_v13  ;;  %v4891_v48 = vpop.eup %4890  ;;  %v1844_v46 = vmul.f32 %v1836_v24, %v5950_v8 }
 0x3b7   : > { %v1814_v18 = vadd.f32 0.2548296, %v1806_v28  ;;  %v1800_v47 = vadd.f32 -0.28449672, %v1792_v4  ;;  %v1786_v0 = vadd.f32 1.4214138, %v1778_v10  ;;  %v5989_v32 = vpop.eup %4892  ;;  %4900 = vpow2.f32 %v1857_v49 }
 0x3b8   : > { %v1821_v58 = vmul.f32 %v5925_v53, %v1813_v17  ;;  %v1807_v22 = vmul.f32 %v5941_v62, %v1799_v59  ;;  %v1763_v12 = vmul.f32 1.0614054, %v5981_v37  ;;  %v1764_v13 = vmul.f32 1.0614054, %v5989_v32 }
 0x3b9   : > { %v1822_v1 = vmul.f32 %v5930_v5, %v1814_v18  ;;  %v1808_v28 = vmul.f32 %v5952_v44, %v1800_v47  ;;  %v1793_v5 = vmul.f32 %v5964_v9, %v1785_v21  ;;  %v1794_v11 = vmul.f32 %v5966_v31, %v1786_v0 }
 0x3ba   : > { %v1861_v55 = vmul.f32 %v4885_v52, %v1821_v58  ;;  %v1815_v61 = vadd.f32 0.2548296, %v1807_v22  ;;  %v1771_v33 = vadd.f32 -1.4531521, %v1763_v12  ;;  %v1772_v8 = vadd.f32 -1.4531521, %v1764_v13 }
 0x3bb   : > { %v1862_v53 = vmul.f32 %v4887_v16, %v1822_v1  ;;  %v1816_v18 = vadd.f32 0.2548296, %v1808_v28  ;;  %v1801_v59 = vadd.f32 -0.28449672, %v1793_v5  ;;  %v1802_v4 = vadd.f32 -0.28449672, %v1794_v11  ;;  %v4895_v16 = vpop.eup %4894 }
 0x3bc   : > { %v1869_v6 = vsub.f32 1.0, %v1861_v55  ;;  %v1823_v17 = vmul.f32 %v5941_v62, %v1815_v61  ;;  %v1779_v22 = vmul.f32 %v5981_v37, %v1771_v33  ;;  %v4897_v21 = vpop.eup %4896  ;;  %v1859_v61 = vmul.f32 1.442695, %v1844_v46 }
 0x3bd   : > { %v1870_v54 = vsub.f32 1.0, %v1862_v53  ;;  %v1824_v62 = vmul.f32 %v5952_v44, %v1816_v18  ;;  %v1809_v1 = vmul.f32 %v5964_v9, %v1801_v59  ;;  %v1810_v47 = vmul.f32 %v5966_v31, %v1802_v4  ;;  %v4899_v0 = vpop.eup %4898 }
 0x3be   : > { %v1877_v52 = vmul.f32 %v1869_v6, %v5913_v43  ;;  %v1863_v58 = vmul.f32 %v4891_v48, %v1823_v17  ;;  %v1787_v53 = vadd.f32 1.4214138, %v1779_v22  ;;  %v1780_v5 = vmul.f32 %v5989_v32, %v1772_v8 }
 0x3bf   : > { %v1878_v10 = vmul.f32 %v1870_v54, %v5917_v29  ;;  %v1864_v43 = vmul.f32 %v4895_v16, %v1824_v62  ;;  %v1817_v24 = vadd.f32 0.2548296, %v1809_v1  ;;  %v1818_v28 = vadd.f32 0.2548296, %v1810_v47 }
 0x3c0   : > { %v1871_v55 = vsub.f32 1.0, %v1863_v58  ;;  %v1885_v6 = vadd.f32 1.0, %v1877_v52  ;;  %v1721_v29 = vsel %vm1713_vm13, 1.0, %v4962_v36  ;;  %v1795_v48 = vmul.f32 %v5981_v37, %v1787_v53 }
 0x3c1   : > { %v1872_v12 = vsub.f32 1.0, %v1864_v43  ;;  %v1825_v49 = vmul.f32 %v5964_v9, %v1817_v24  ;;  %v1886_v54 = vadd.f32 1.0, %v1878_v10  ;;  %v1826_v11 = vmul.f32 %v5966_v31, %v1818_v28 }
 0x3c2   : > { %v1879_v44 = vmul.f32 %v1871_v55, %v5928_v34  ;;  %v1788_v18 = vadd.f32 1.4214138, %v1780_v5  ;;  %v1803_v33 = vadd.f32 -0.28449672, %v1795_v48  ;;  %4902 = vpow2.f32 %v1859_v61 }
 0x3c3   : > { %v1880_v59 = vmul.f32 %v1872_v12, %v5962_v26  ;;  %v1865_v34 = vmul.f32 %v4897_v21, %v1825_v49  ;;  %v6009_v46 = vmul.f32 %v1885_v6, %v5901_v40  ;;  %v1866_v52 = vmul.f32 %v4899_v0, %v1826_v11 }
 0x3c4   : > { %v1887_v17 = vadd.f32 1.0, %v1879_v44  ;;  %v1796_v9 = vmul.f32 %v5989_v32, %v1788_v18  ;;  %v1811_v31 = vmul.f32 %v5981_v37, %v1803_v33  ;;  %v6019_v26 = vmul.f32 %v1886_v54, %v5906_v20  ;;  %v3467_v33 = vld [vmem:[%s6815_s2 + $0x40] sm:$0xff] }
 0x3c5   : > { %v1888_v58 = vadd.f32 1.0, %v1880_v59  ;;  %v1873_v16 = vsub.f32 1.0, %v1865_v34  ;;  %v1874_v1 = vsub.f32 1.0, %v1866_v52  ;;  %v1722_v20 = vsel %vm1714_vm8, 1.0, %v4962_v36  ;;  %v3468_v52 = vld [vmem:[%s6815_s2 + $0x48] sm:$0xff] }
 0x3c6   : > { %v6012_v56 = vmul.f32 %v1887_v17, %v5919_v7  ;;  %v1804_v4 = vadd.f32 -0.28449672, %v1796_v9  ;;  %v4901_v7 = vpop.eup %4900  ;;  %v1819_v62 = vadd.f32 0.2548296, %v1811_v31  ;;  %v1723_v10 = vsel %vm1715_vm5, 1.0, %v4962_v36  ;;  %v3469_v9 = vld [vmem:[%s6815_s2 + $0x50] sm:$0xff] }
 0x3c7   : > { %v6026_v13 = vmul.f32 %v1888_v58, %v5921_v2  ;;  %v1881_v2 = vmul.f32 %v1873_v16, %v1721_v29  ;;  %v1882_v8 = vmul.f32 %v1874_v1, %v1722_v20  ;;  %v1697_v5 = vmul.f32 0.5, %v5897_v35  ;;  %v3470_v58 = vld [vmem:[%s6815_s2 + $0x58] sm:$0xff] }
 0x3c8   : > { %v6023_v40 = vpack.i.bf16 %v6012_v56, %v6009_v46  ;;  %v1812_v39 = vmul.f32 %v5989_v32, %v1804_v4  ;;  %v1827_v57 = vmul.f32 %v5981_v37, %v1819_v62  ;;  %v3971_v61 = vpack.c.bf16 %v6012_v56, %v6009_v46 }
 0x3c9   : > { %v4525_v22 = vpack.i.bf16 %v6026_v13, %v6019_v26  ;;  %v3969_v37 = vpack.c.bf16 %v6026_v13, %v6019_v26  ;;  %v1889_v0 = vadd.f32 1.0, %v1881_v2  ;;  %v1890_v44 = vadd.f32 1.0, %v1882_v8 }
 0x3ca   : > { %4521 = vrot.lane.b32.xlu1 %v6023_v40, %s4952_s18  ;;  %v1820_v55 = vadd.f32 0.2548296, %v1812_v39  ;;  %v1867_v47 = vmul.f32 %v4901_v7, %v1827_v57  ;;  %v1699_v12 = vmul.f32 0.5, %v5923_v3  ;;  %v1724_v29 = vsel %vm1716_vm10, 1.0, %v4962_v36 }
 0x3cb   : > { %4526 = vrot.lane.b32.xlu0 %v4525_v22, %s4952_s18  ;;  %v6047_v48 = vmul.f32 %v1889_v0, %v1697_v5  ;;  %v6051_v17 = vmul.f32 %v1890_v44, %v1698_v27  ;;  %v1700_v11 = vmul.f32 0.5, %v5933_v25  ;;  %v3456_v25 = vld [vmem:[%s6814_s1 + $0xc8] sm:$0xff]  ;;  %vm6893_vm13 = vcmp.lt.s32.totalorder %v5076_v23, 16 }
 0x3cc   : > { %v1828_v21 = vmul.f32 %v5989_v32, %v1820_v55  ;;  %v4903_v43 = vpop.eup %4902  ;;  %v1875_v24 = vsub.f32 1.0, %v1867_v47  ;;  %2415 = vmatprep.mubr.f32.mxu0 %v3456_v25  ;;  %vm6894_vm8 = vmmov %vm6893_vm13 }
 0x3cd   : > { %vm6895_vm5 = vmmov %vm6894_vm8 }
 0x3ce   : > { %v1868_v53 = vmul.f32 %v4903_v43, %v1828_v21  ;;  %v1883_v6 = vmul.f32 %v1875_v24, %v1723_v10  ;;  %vm6896_vm10 = vmmov %vm6895_vm5 }
 0x3d0   : > { %v1876_v28 = vsub.f32 1.0, %v1868_v53  ;;  %v1891_v32 = vadd.f32 1.0, %v1883_v6 }
 0x3d2   : > { %v1884_v49 = vmul.f32 %v1876_v28, %v1724_v29  ;;  %v6049_v54 = vmul.f32 %v1891_v32, %v1699_v12 }
 0x3d4   : > { %v1892_v18 = vadd.f32 1.0, %v1884_v49  ;;  %v4530_v35 = vpack.i.bf16 %v6049_v54, %v6047_v48  ;;  %v3975_v15 = vpack.c.bf16 %v6049_v54, %v6047_v48 }
 0x3d6   : > { %v6056_v59 = vmul.f32 %v1892_v18, %v1700_v11  ;;  %4531 = vrot.lane.b32.xlu1 %v4530_v35, %s4952_s18 }
 0x3d8   : > { %v4540_v3 = vpack.i.bf16 %v6056_v59, %v6051_v17  ;;  %v3973_v34 = vpack.c.bf16 %v6056_v59, %v6051_v17 }
 0x3da   : > { %4541 = vrot.lane.b32.xlu0 %v4540_v3, %s4952_s18  ;;  %4536 = vrot.lane.b32.xlu1 %v6023_v40, %s4953_s19 }
 0x3de   : > { %4546 = vrot.lane.b32.xlu0 %v4525_v22, %s4953_s19  ;;  %4551 = vrot.lane.b32.xlu1 %v4530_v35, %s4953_s19 }
 0x3e2   : > { %4561 = vrot.lane.b32.xlu0 %v4540_v3, %s4953_s19  ;;  %4556 = vrot.lane.b32.xlu1 %v6023_v40, %s4954_s20 }
 0x3e6   : > { %4566 = vrot.lane.b32.xlu0 %v4525_v22, %s4954_s20  ;;  %4571 = vrot.lane.b32.xlu1 %v4530_v35, %s4954_s20 }
 0x3ea   : > { %4581 = vrot.lane.b32.xlu0 %v4540_v3, %s4954_s20  ;;  %4576 = vrot.lane.b32.xlu1 %v6023_v40, %s4955_s21 }
 0x3ee   : > { %4586 = vrot.lane.b32.xlu0 %v4525_v22, %s4955_s21  ;;  %4591 = vrot.lane.b32.xlu1 %v4530_v35, %s4955_s21 }
 0x3f2   : > { %4596 = vrot.lane.b32.xlu0 %v4540_v3, %s4955_s21  ;;  %4601 = vrot.lane.b32.xlu1 %v6023_v40, %s4956_s22 }
 0x3f6   : > { %4606 = vrot.lane.b32.xlu0 %v4525_v22, %s4956_s22  ;;  %4611 = vrot.lane.b32.xlu1 %v4530_v35, %s4956_s22 }
 0x3fa   : > { %4621 = vrot.lane.b32.xlu0 %v4540_v3, %s4956_s22  ;;  %4616 = vrot.lane.b32.xlu1 %v6023_v40, %s4957_s23 }
 0x3fe   : > { %4626 = vrot.lane.b32.xlu0 %v4525_v22, %s4957_s23  ;;  %4631 = vrot.lane.b32.xlu1 %v4530_v35, %s4957_s23 }
 0x402   : > { %4641 = vrot.lane.b32.xlu0 %v4540_v3, %s4957_s23  ;;  %4636 = vrot.lane.b32.xlu1 %v6023_v40, %s4958_s24 }
 0x406   : > { %4646 = vrot.lane.b32.xlu0 %v4525_v22, %s4958_s24  ;;  %4651 = vrot.lane.b32.xlu1 %v4530_v35, %s4958_s24 }
 0x40a   : > { %4656 = vrot.lane.b32.xlu0 %v4540_v3, %s4958_s24  ;;  %4661 = vrot.lane.b32.xlu1 %v6023_v40, %s4959_s25 }
 0x40e   : > { %4666 = vrot.lane.b32.xlu0 %v4525_v22, %s4959_s25  ;;  %4671 = vrot.lane.b32.xlu1 %v4530_v35, %s4959_s25 }
 0x412   : > { %4676 = vrot.lane.b32.xlu0 %v4540_v3, %s4959_s25  ;;  %2321 = vperm.xlu1 %4359, %v3467_v33  }
 0x416   : > { %2326 = vperm.xlu0 %4358, %v3468_v52   ;;  %2331 = vperm.xlu1 %4359, %v3469_v9  }
 0x41a   : > { %2336 = vperm.xlu0 %4358, %v3470_v58  }
 0x43c   : > { %v4522_v31 = vpop.permute.xlu1 %4521 }
 0x43d   : > { %v4524_v4 = vunpack.i.h.bf16 %v4522_v31  ;;  %v4523_v40 = vunpack.i.l.bf16 %v4522_v31  ;;  %v4527_v7 = vpop.permute.xlu0 %4526 }
 0x43e   : > { %v4529_v16 = vunpack.i.h.bf16 %v4527_v7  ;;  %v4528_v62 = vunpack.i.l.bf16 %v4527_v7 }
 0x440   : > { %v1917_v1 = vsel %vm222_vm2, %v4523_v40, %v4528_v62  ;;  %v1918_v39 = vsel %vm222_vm2, %v4524_v4, %v4529_v16  ;;  %v1921_v20 = vsel %vm222_vm2, %v4528_v62, %v4523_v40  ;;  %v1922_v57 = vsel %vm222_vm2, %v4529_v16, %v4524_v4 }
 0x441   : > { %v3923_v22 = vpack.c.bf16 %v1918_v39, %v1917_v1  ;;  %v3926_v10 = vpack.c.bf16 %v1922_v57, %v1921_v20 }
 0x443   : > { %3925 = vmatprep.subr.msk.bf16.mxu0 %vm5113_vm6, %v3923_v22 }
 0x444   : > { %3928 = vmatpush1.bf16.msk.msra.mxu0 %vm5121_vm7, %v3926_v10 }
 0x448   : > { %v4532_v55 = vpop.permute.xlu1 %4531 }
 0x449   : > { %v4534_v2 = vunpack.i.h.bf16 %v4532_v55  ;;  %v4533_v47 = vunpack.i.l.bf16 %v4532_v55 }
 0x44c   : > { %v4542_v8 = vpop.permute.xlu0 %4541  ;;  %v4537_v24 = vpop.permute.xlu1 %4536 }
 0x44d   : > { %v4544_v21 = vunpack.i.h.bf16 %v4542_v8  ;;  %v4543_v43 = vunpack.i.l.bf16 %v4542_v8  ;;  %v4539_v53 = vunpack.i.h.bf16 %v4537_v24  ;;  %v4538_v0 = vunpack.i.l.bf16 %v4537_v24 }
 0x44f   : > { %v1919_v6 = vsel %vm222_vm2, %v4533_v47, %v4543_v43  ;;  %v1920_v44 = vsel %vm222_vm2, %v4534_v2, %v4544_v21  ;;  %v1923_v28 = vsel %vm222_vm2, %v4543_v43, %v4533_v47  ;;  %v1924_v5 = vsel %vm222_vm2, %v4544_v21, %v4534_v2 }
 0x450   : > { %v3929_v12 = vpack.c.bf16 %v1920_v44, %v1919_v6  ;;  %v3932_v32 = vpack.c.bf16 %v1924_v5, %v1923_v28  ;;  %v4547_v29 = vpop.permute.xlu0 %4546  ;;  %v4552_v11 = vpop.permute.xlu1 %4551 }
 0x451   : > { %v4549_v27 = vunpack.i.h.bf16 %v4547_v29  ;;  %v4548_v49 = vunpack.i.l.bf16 %v4547_v29  ;;  %v4554_v18 = vunpack.i.h.bf16 %v4552_v11  ;;  %v4553_v35 = vunpack.i.l.bf16 %v4552_v11 }
 0x452   : > { %3931 = vmatprep.subr.msk.bf16.mxu0 %vm5113_vm6, %v3929_v12 }
 0x453   : > { %v1961_v3 = vsel %vm6893_vm13, %v4548_v49, %v4538_v0  ;;  %v1962_v25 = vsel %vm6894_vm8, %v4549_v27, %v4539_v53  ;;  %3934 = vmatpush1.bf16.msk.msra.mxu0 %vm5121_vm7, %v3932_v32  ;;  %v1957_v33 = vsel %vm6895_vm5, %v4538_v0, %v4548_v49  ;;  %v1958_v52 = vsel %vm6896_vm10, %v4539_v53, %v4549_v27  ;;  %vm6897_vm13 = vmmov %vm6895_vm5 }
 0x454   : > { %v3937_v9 = vpack.c.bf16 %v1962_v25, %v1961_v3  ;;  %v4562_v58 = vpop.permute.xlu0 %4561  ;;  %v3935_v31 = vpack.c.bf16 %v1958_v52, %v1957_v33  ;;  %v4557_v7 = vpop.permute.xlu1 %4556  ;;  %vm6898_vm8 = vmmov %vm6895_vm5 }
 0x455   : > { %v4564_v4 = vunpack.i.h.bf16 %v4562_v58  ;;  %v4563_v40 = vunpack.i.l.bf16 %v4562_v58  ;;  %v4559_v16 = vunpack.i.h.bf16 %v4557_v7  ;;  %v4558_v62 = vunpack.i.l.bf16 %v4557_v7  ;;  %vm6899_vm10 = vmmov %vm6895_vm5 }
 0x456   : > { %3936 = vmatprep.subr.bf16.mxu0 %v3935_v31 }
 0x457   : > { %v1963_v1 = vsel %vm6897_vm13, %v4563_v40, %v4553_v35  ;;  %v1964_v39 = vsel %vm6898_vm8, %v4564_v4, %v4554_v18  ;;  %3939 = vmatpush1.bf16.msk.msra.mxu0 %vm5157_vm9, %v3937_v9  ;;  %v1959_v20 = vsel %vm6895_vm5, %v4553_v35, %v4563_v40  ;;  %v1960_v57 = vsel %vm6899_vm10, %v4554_v18, %v4564_v4 }
 0x458   : > { %v3942_v22 = vpack.c.bf16 %v1964_v39, %v1963_v1  ;;  %v4567_v10 = vpop.permute.xlu0 %4566  ;;  %v3940_v55 = vpack.c.bf16 %v1960_v57, %v1959_v20  ;;  %v4572_v8 = vpop.permute.xlu1 %4571  ;;  %vm6900_vm13 = vcmp.lt.s32.totalorder %v5076_v23, 15 }
 0x459   : > { %v4569_v2 = vunpack.i.h.bf16 %v4567_v10  ;;  %v4568_v47 = vunpack.i.l.bf16 %v4567_v10  ;;  %v4574_v21 = vunpack.i.h.bf16 %v4572_v8  ;;  %v4573_v43 = vunpack.i.l.bf16 %v4572_v8  ;;  %vm6901_vm8 = vmmov %vm6900_vm13 }
 0x45a   : > { %3941 = vmatprep.subr.bf16.mxu0 %v3940_v55  ;;  %vm6902_vm5 = vmmov %vm6901_vm8 }
 0x45b   : > { %v1997_v24 = vsel %vm6900_vm13, %v4558_v62, %v4568_v47  ;;  %v1998_v53 = vsel %vm6901_vm8, %v4559_v16, %v4569_v2  ;;  %v2001_v0 = vsel %vm6902_vm5, %v4568_v47, %v4558_v62  ;;  %vm6903_vm10 = vmmov %vm6902_vm5  ;;  %3944 = vmatpush1.bf16.msk.msra.mxu0 %vm5157_vm9, %v3942_v22 }
 0x45c   : > { %v2002_v6 = vsel %vm6903_vm10, %v4569_v2, %v4559_v16  ;;  %v3945_v44 = vpack.c.bf16 %v1998_v53, %v1997_v24  ;;  %v4582_v5 = vpop.permute.xlu0 %4581  ;;  %v4577_v29 = vpop.permute.xlu1 %4576  ;;  %vm6904_vm13 = vmmov %vm6902_vm5 }
 0x45d   : > { %v3948_v28 = vpack.c.bf16 %v2002_v6, %v2001_v0  ;;  %v4584_v12 = vunpack.i.h.bf16 %v4582_v5  ;;  %v4583_v32 = vunpack.i.l.bf16 %v4582_v5  ;;  %v4579_v27 = vunpack.i.h.bf16 %v4577_v29  ;;  %vm6905_vm8 = vmmov %vm6902_vm5 }
 0x45e   : > { %3947 = vmatprep.subr.msk.bf16.mxu0 %vm5186_vm12, %v3945_v44  ;;  %v4578_v49 = vunpack.i.l.bf16 %v4577_v29  ;;  %vm6906_vm10 = vmmov %vm6902_vm5 }
 0x45f   : > { %v1999_v11 = vsel %vm6904_vm13, %v4573_v43, %v4583_v32  ;;  %v2000_v18 = vsel %vm6905_vm8, %v4574_v21, %v4584_v12  ;;  %v2003_v35 = vsel %vm6902_vm5, %v4583_v32, %v4573_v43  ;;  %v2004_v3 = vsel %vm6906_vm10, %v4584_v12, %v4574_v21  ;;  %3950 = vmatpush1.bf16.msk.msra.mxu0 %vm5207_vm15, %v3948_v28 }
 0x460   : > { %v3951_v25 = vpack.c.bf16 %v2000_v18, %v1999_v11  ;;  %v3954_v33 = vpack.c.bf16 %v2004_v3, %v2003_v35  ;;  %v4587_v52 = vpop.permute.xlu0 %4586  ;;  %v4592_v31 = vpop.permute.xlu1 %4591  ;;  %vm6907_vm13 = vcmp.lt.s32.totalorder %v5076_v23, 1 }
 0x461   : > { %v4589_v9 = vunpack.i.h.bf16 %v4587_v52  ;;  %v4588_v58 = vunpack.i.l.bf16 %v4587_v52  ;;  %v4594_v4 = vunpack.i.h.bf16 %v4592_v31  ;;  %v4593_v40 = vunpack.i.l.bf16 %v4592_v31  ;;  %vm6908_vm8 = vmmov %vm6907_vm13 }
 0x462   : > { %3953 = vmatprep.subr.msk.bf16.mxu0 %vm5186_vm12, %v3951_v25  ;;  %vm6909_vm5 = vmmov %vm6908_vm8 }
 0x463   : > { %v2037_v7 = vsel %vm6907_vm13, %v4578_v49, %v4588_v58  ;;  %v2038_v16 = vsel %vm6908_vm8, %v4579_v27, %v4589_v9  ;;  %v2041_v62 = vsel %vm6909_vm5, %v4588_v58, %v4578_v49  ;;  %vm6910_vm10 = vmmov %vm6909_vm5  ;;  %3956 = vmatpush1.bf16.msk.msra.mxu0 %vm5207_vm15, %v3954_v33 }
 0x464   : > { %v2042_v1 = vsel %vm6910_vm10, %v4589_v9, %v4579_v27  ;;  %v3957_v39 = vpack.c.bf16 %v2038_v16, %v2037_v7  ;;  %v4597_v57 = vpop.permute.xlu0 %4596  ;;  %v4602_v55 = vpop.permute.xlu1 %4601  ;;  %vm6911_vm13 = vmmov %vm6909_vm5 }
 0x465   : > { %v3960_v20 = vpack.c.bf16 %v2042_v1, %v2041_v62  ;;  %v4599_v22 = vunpack.i.h.bf16 %v4597_v57  ;;  %v4598_v10 = vunpack.i.l.bf16 %v4597_v57  ;;  %vm6912_vm8 = vmmov %vm6909_vm5  ;;  %v4604_v6 = vunpack.i.h.bf16 %v4602_v55 }
 0x466   : > { %3959 = vmatprep.subr.msk.bf16.mxu0 %vm5113_vm6, %v3957_v39  ;;  %vm6913_vm10 = vmmov %vm6909_vm5  ;;  %v4603_v44 = vunpack.i.l.bf16 %v4602_v55 }
 0x467   : > { %v2039_v2 = vsel %vm6911_vm13, %v4593_v40, %v4598_v10  ;;  %v2040_v47 = vsel %vm6912_vm8, %v4594_v4, %v4599_v22  ;;  %v2043_v8 = vsel %vm6909_vm5, %v4598_v10, %v4593_v40  ;;  %v2044_v21 = vsel %vm6913_vm10, %v4599_v22, %v4594_v4  ;;  %3962 = vmatpush1.bf16.msk.msra.mxu0 %vm5232_vm0, %v3960_v20 }
 0x468   : > { %v3963_v43 = vpack.c.bf16 %v2040_v47, %v2039_v2  ;;  %v3966_v24 = vpack.c.bf16 %v2044_v21, %v2043_v8  ;;  %v4607_v53 = vpop.permute.xlu0 %4606  ;;  %v4612_v0 = vpop.permute.xlu1 %4611  ;;  %vm6914_vm13 = vcmp.lt.s32.totalorder %v5076_v23, 127 }
 0x469   : > { %v4609_v28 = vunpack.i.h.bf16 %v4607_v53  ;;  %v4608_v5 = vunpack.i.l.bf16 %v4607_v53  ;;  %v4614_v29 = vunpack.i.h.bf16 %v4612_v0  ;;  %v4613_v27 = vunpack.i.l.bf16 %v4612_v0  ;;  %vm6915_vm8 = vmmov %vm6914_vm13 }
 0x46a   : > { %3965 = vmatprep.subr.msk.bf16.mxu0 %vm5113_vm6, %v3963_v43  ;;  %vm6916_vm5 = vmmov %vm6915_vm8 }
 0x46b   : > { %3968 = vmatpush1.bf16.msk.msra.mxu0 %vm5232_vm0, %v3966_v24  ;;  %v2089_v49 = vsel %vm6914_vm13, %v4608_v5, %v4603_v44  ;;  %v2090_v11 = vsel %vm6915_vm8, %v4609_v28, %v4604_v6  ;;  %v2085_v26 = vsel %vm6916_vm5, %v4603_v44, %v4608_v5  ;;  %vm6917_vm10 = vmmov %vm6916_vm5 }
 0x46c   : > { %v4622_v12 = vpop.permute.xlu0 %4621  ;;  %3970 = vmatprep.subr.bf16.mxu0 %v3969_v37  ;;  %v4617_v32 = vpop.permute.xlu1 %4616  ;;  %v2086_v37 = vsel %vm6917_vm10, %v4604_v6, %v4609_v28  ;;  %v3977_v25 = vpack.c.bf16 %v2090_v11, %v2089_v49  ;;  %vm6918_vm13 = vmmov %vm6916_vm5 }
 0x46d   : > { %v4624_v18 = vunpack.i.h.bf16 %v4622_v12  ;;  %v4623_v35 = vunpack.i.l.bf16 %v4622_v12  ;;  %v4619_v33 = vunpack.i.h.bf16 %v4617_v32  ;;  %v4618_v52 = vunpack.i.l.bf16 %v4617_v32  ;;  %vm6919_vm8 = vmmov %vm6916_vm5 }
 0x46e   : > { %v3980_v59 = vpack.c.bf16 %v2086_v37, %v2085_v26  ;;  %vm6920_vm10 = vmmov %vm6916_vm5 }
 0x46f   : > { %3972 = vmatpush1.bf16.msra.mxu0 %v3971_v61  ;;  %v2091_v9 = vsel %vm6918_vm13, %v4623_v35, %v4613_v27  ;;  %v2092_v46 = vsel %vm6919_vm8, %v4624_v18, %v4614_v29  ;;  %v2088_v31 = vsel %vm6920_vm10, %v4614_v29, %v4624_v18  ;;  %vm6921_vm13 = vcmp.lt.s32.totalorder %v5076_v23, 113 }
 0x470   : > { %v4627_v3 = vpop.permute.xlu0 %4626  ;;  %3974 = vmatprep.subr.bf16.mxu0 %v3973_v34  ;;  %v4632_v13 = vpop.permute.xlu1 %4631  ;;  %v2087_v34 = vsel %vm6916_vm5, %v4613_v27, %v4623_v35  ;;  %v3983_v4 = vpack.c.bf16 %v2092_v46, %v2091_v9  ;;  %vm6922_vm8 = vmmov %vm6921_vm13 }
 0x471   : > { %v4629_v56 = vunpack.i.h.bf16 %v4627_v3  ;;  %v4628_v61 = vunpack.i.l.bf16 %v4627_v3  ;;  %v4634_v40 = vunpack.i.h.bf16 %v4632_v13  ;;  %v4633_v7 = vunpack.i.l.bf16 %v4632_v13  ;;  %vm6923_vm5 = vmmov %vm6922_vm8 }
 0x472   : > { %v3986_v1 = vpack.c.bf16 %v2088_v31, %v2087_v34  ;;  %vm6924_vm10 = vmmov %vm6923_vm5 }
 0x473   : > { %3976 = vmatpush1.bf16.msra.mxu0 %v3975_v15  ;;  %v2129_v16 = vsel %vm6921_vm13, %v4628_v61, %v4618_v52  ;;  %v2130_v48 = vsel %vm6922_vm8, %v4629_v56, %v4619_v33  ;;  %v2125_v39 = vsel %vm6923_vm5, %v4618_v52, %v4628_v61  ;;  %v2126_v57 = vsel %vm6924_vm10, %v4619_v33, %v4629_v56  ;;  %vm6925_vm13 = vmmov %vm6923_vm5 }
 0x474   : > { %v4642_v17 = vpop.permute.xlu0 %4641  ;;  %3979 = vmatprep.subr.msk.bf16.mxu0 %vm5186_vm12, %v3977_v25  ;;  %v4637_v58 = vpop.permute.xlu1 %4636  ;;  %v3989_v22 = vpack.c.bf16 %v2130_v48, %v2129_v16  ;;  %vm6926_vm8 = vmmov %vm6923_vm5  ;;  %v3992_v24 = vpack.c.bf16 %v2126_v57, %v2125_v39  ;;  %v3455_v39 = vld [vmem:[%s6814_s1 + $0xc0] sm:$0xff] }
 0x475   : > { %v4644_v54 = vunpack.i.h.bf16 %v4642_v17  ;;  %v4643_v15 = vunpack.i.l.bf16 %v4642_v17  ;;  %v4639_v10 = vunpack.i.h.bf16 %v4637_v58  ;;  %v4638_v55 = vunpack.i.l.bf16 %v4637_v58  ;;  %vm6927_vm10 = vmmov %vm6923_vm5 }
 0x477   : > { %3982 = vmatpush1.bf16.msk.msra.mxu0 %vm5280_vm14, %v3980_v59  ;;  %v2131_v2 = vsel %vm6925_vm13, %v4643_v15, %v4633_v7  ;;  %v2132_v47 = vsel %vm6926_vm8, %v4644_v54, %v4634_v40  ;;  %v2127_v53 = vsel %vm6923_vm5, %v4633_v7, %v4643_v15  ;;  %v2128_v6 = vsel %vm6927_vm10, %v4634_v40, %v4644_v54 }
 0x478   : > { %v4647_v62 = vpop.permute.xlu0 %4646  ;;  %3985 = vmatprep.subr.msk.bf16.mxu0 %vm5186_vm12, %v3983_v4  ;;  %v4652_v20 = vpop.permute.xlu1 %4651  ;;  %v3995_v44 = vpack.c.bf16 %v2132_v47, %v2131_v2  ;;  %vm6928_vm13 = vcmp.lt.s32.totalorder %v5076_v23, 112  ;;  %v3998_v11 = vpack.c.bf16 %v2128_v6, %v2127_v53  ;;  %v3458_v2 = vld [vmem:[%s6814_s1 + $0xd8] sm:$0xff]  ;;  %v3457_v53 = vld [vmem:[%s6814_s1 + $0xd0] sm:$0xff]  ;;  %v3463_v6 = vld [vmem:[%s6814_s1 + $0x100] sm:$0xff] }
 0x479   : > { %v4649_v8 = vunpack.i.h.bf16 %v4647_v62  ;;  %v4648_v21 = vunpack.i.l.bf16 %v4647_v62  ;;  %v4654_v28 = vunpack.i.h.bf16 %v4652_v20  ;;  %v4653_v5 = vunpack.i.l.bf16 %v4652_v20  ;;  %vm6929_vm8 = vmmov %vm6928_vm13  ;;  %v3459_v20 = vld [vmem:[%s6814_s1 + $0xe0] sm:$0xff]  ;;  %v3462_v47 = vld [vmem:[%s6814_s1 + $0xf8] sm:$0xff] }
 0x47a   : > { %vm6930_vm5 = vmmov %vm6929_vm8 }
 0x47b   : > { %3988 = vmatpush1.bf16.msk.msra.mxu0 %vm5280_vm14, %v3986_v1  ;;  %v2169_v12 = vsel %vm6928_vm13, %v4648_v21, %v4638_v55  ;;  %v2170_v32 = vsel %vm6929_vm8, %v4649_v8, %v4639_v10  ;;  %v2165_v18 = vsel %vm6930_vm5, %v4638_v55, %v4648_v21  ;;  %vm6931_vm10 = vmmov %vm6930_vm5  ;;  %v3461_v21 = vld [vmem:[%s6814_s1 + $0xf0] sm:$0xff] }
 0x47c   : > { %v4657_v43 = vpop.permute.xlu0 %4656  ;;  %3991 = vmatprep.subr.msk.bf16.mxu0 %vm5316_vm1, %v3989_v22  ;;  %v4662_v0 = vpop.permute.xlu1 %4661  ;;  %v2166_v35 = vsel %vm6931_vm10, %v4639_v10, %v4649_v8  ;;  %v4001_v3 = vpack.c.bf16 %v2170_v32, %v2169_v12  ;;  %vm6932_vm13 = vmmov %vm6930_vm5 }
 0x47d   : > { %v4659_v29 = vunpack.i.h.bf16 %v4657_v43  ;;  %v4658_v27 = vunpack.i.l.bf16 %v4657_v43  ;;  %v4664_v26 = vunpack.i.h.bf16 %v4662_v0  ;;  %v4663_v13 = vunpack.i.l.bf16 %v4662_v0  ;;  %vm6933_vm8 = vmmov %vm6930_vm5  ;;  %v3465_v43 = vld [vmem:[%s6814_s1 + $0x110] sm:$0xff]  ;;  %v3460_v0 = vld [vmem:[%s6814_s1 + $0xe8] sm:$0xff] }
 0x47e   : > { %v4004_v56 = vpack.c.bf16 %v2166_v35, %v2165_v18  ;;  %vm6934_vm10 = vmmov %vm6930_vm5 }
 0x47f   : > { %3994 = vmatpush1.bf16.msk.msra.mxu0 %vm5232_vm0, %v3992_v24  ;;  %v2171_v37 = vsel %vm6932_vm13, %v4658_v27, %v4653_v5  ;;  %v2172_v25 = vsel %vm6933_vm8, %v4659_v29, %v4654_v28  ;;  %v2167_v61 = vsel %vm6930_vm5, %v4653_v5, %v4658_v27  ;;  %v2168_v17 = vsel %vm6934_vm10, %v4654_v28, %v4659_v29  ;;  %v3464_v24 = vld [vmem:[%s6814_s1 + $0x108] sm:$0xff] }
 0x480   : > { %v4667_v49 = vpop.permute.xlu0 %4666  ;;  %3997 = vmatprep.subr.msk.bf16.mxu0 %vm5316_vm1, %v3995_v44  ;;  %v4672_v9 = vpop.permute.xlu1 %4671  ;;  %v4006_v59 = vpack.c.bf16 %v2172_v25, %v2171_v37  ;;  %v4009_v16 = vpack.c.bf16 %v2168_v17, %v2167_v61  ;;  %vm6935_vm13 = vcmask 261120   ;;  %v3466_v44 = vld [vmem:[%s6814_s1 + $0x118] sm:$0xff] }
 0x481   : > { %v4669_v33 = vunpack.i.h.bf16 %v4667_v49  ;;  %v4668_v52 = vunpack.i.l.bf16 %v4667_v49  ;;  %v4674_v34 = vunpack.i.h.bf16 %v4672_v9  ;;  %v4673_v58 = vunpack.i.l.bf16 %v4672_v9  ;;  %vm6936_vm8 = vmmov %vm6935_vm13 }
 0x482   : > { %vm6937_vm5 = vmmov %vm6936_vm8 }
 0x483   : > { %4000 = vmatpush1.bf16.msk.msra.mxu0 %vm5232_vm0, %v3998_v11  ;;  %v2209_v31 = vsel %vm531_vm11, %v4668_v52, %v4663_v13  ;;  %v2210_v4 = vsel %vm531_vm11, %v4669_v33, %v4664_v26  ;;  %v2205_v48 = vsel %vm531_vm11, %v4663_v13, %v4668_v52  ;;  %v2206_v54 = vsel %vm531_vm11, %v4664_v26, %v4669_v33  ;;  %vm6938_vm10 = vmmov %vm6937_vm5 }
 0x484   : > { %v4677_v46 = vpop.permute.xlu0 %4676  ;;  %4003 = vmatprep.subr.msk.bf16.mxu0 %vm5348_vm4, %v4001_v3  ;;  %v4011_v15 = vpack.c.bf16 %v2210_v4, %v2209_v31  ;;  %v4014_v57 = vpack.c.bf16 %v2206_v54, %v2205_v48 }
 0x485   : > { %v4679_v40 = vunpack.i.h.bf16 %v4677_v46  ;;  %v4678_v7 = vunpack.i.l.bf16 %v4677_v46 }
 0x487   : > { %4005 = vmatpush1.bf16.msra.mxu0 %v4004_v56  ;;  %v2211_v62 = vsel %vm531_vm11, %v4678_v7, %v4673_v58  ;;  %v2212_v1 = vsel %vm531_vm11, %v4679_v40, %v4674_v34  ;;  %v2207_v22 = vsel %vm531_vm11, %v4673_v58, %v4678_v7  ;;  %v2208_v10 = vsel %vm531_vm11, %v4674_v34, %v4679_v40 }
 0x488   : > { %4008 = vmatprep.subr.msk.bf16.mxu0 %vm5348_vm4, %v4006_v59  ;;  %v4017_v55 = vpack.c.bf16 %v2212_v1, %v2211_v62  ;;  %v4020_v8 = vpack.c.bf16 %v2208_v10, %v2207_v22 }
 0x48b   : > { %4010 = vmatpush1.bf16.msra.mxu0 %v4009_v16 }
 0x48c   : > { %4013 = vmatprep.subr.msk.bf16.mxu0 %vm5374_vm3, %v4011_v15 }
 0x48e   : > { %2416 = vmatmul.mubr.f32.vlgmr.msra.gmra.mrb[8].mxu0 %v3455_v39 }
 0x48f   : > { %4016 = vmatpush1.bf16.msk.msra.mxu0 %vm5280_vm14, %v4014_v57  ;;  %2421 = vmatprep.mubr.f32.mxu0 %v3459_v20 }
 0x490   : > { %4019 = vmatprep.subr.msk.bf16.mxu0 %vm5374_vm3, %v4017_v55 }
 0x491   : > { %v2322_v28 = vpop.permute.xlu1 %2321 }
 0x492   : > { %2422 = vmatmul.mubr.f32.gmra.mrb[10].mxu0 %v3458_v2 }
 0x493   : > { %4022 = vmatpush1.bf16.msk.msra.mxu0 %vm5280_vm14, %v4020_v8  ;;  %2427 = vmatprep.mubr.f32.mxu0 %v3462_v47 }
 0x495   : > { %v2327_v49 = vpop.permute.xlu0 %2326  ;;  %v2332_v34 = vpop.permute.xlu1 %2331 }
 0x496   : > { %2428 = vmatmul.mubr.f32.gmra.mrb[12].mxu0 %v3461_v21 }
 0x497   : > { %2433 = vmatprep.mubr.f32.mxu0 %v3465_v43 }
 0x499   : > { %v2337_v21 = vpop.permute.xlu0 %2336 }
 0x49a   : > { %2434 = vmatmul.mubr.f32.gmra.mrb[14].mxu0 %v3464_v24 }
 0x49b   : > { %2504 = vmatprep.mubr.f32.mxu0 %v4961_v41 }
 0x49e   : > { %3471 = vmatmul.mubr.msk.f32.vlgmr.msra.gmra.mrb[8].mxu0 %vm6935_vm13, %v3457_v53 }
 0x49f   : > { %2510 = vmatprep.mubr.f32.mxu0 %v4961_v41 }
 0x4a2   : > { %3472 = vmatmul.mubr.msk.f32.gmra.mrb[10].mxu0 %vm6936_vm8, %v3460_v0 }
 0x4a3   : > { %2516 = vmatprep.mubr.f32.mxu0 %v4961_v41 }
 0x4a6   : > { %3473 = vmatmul.mubr.msk.f32.gmra.mrb[12].mxu0 %vm6937_vm5, %v3463_v6 }
 0x4a7   : > { %2522 = vmatprep.mubr.f32.mxu0 %v4961_v41 }
 0x4aa   : > { %3474 = vmatmul.mubr.msk.f32.gmra.mrb[14].mxu0 %vm6938_vm10, %v3466_v44 }
 0x571   : > { %v2506_v5 = vpop.f32.mrb[8].mxu0 }
 0x572   : > { %v4139_v12 = vadd.f32 %v2506_v5, %v2322_v28  ;;  %v2508_v32 = vpop.f32.mrb[9].mxu0 }
 0x573   : > { %v4140_v29 = vadd.f32 %v2508_v32, %v2322_v28 }
 0x574   : > { %v2537_v27 = vmul.f32 0.70710677, %v4139_v12  ;;  %v6360_v15 = vmul.f32 0.5, %v4139_v12 }
 0x575   : > { %v2538_v11 = vmul.f32 0.70710677, %v4140_v29  ;;  %v2512_v18 = vpop.f32.mrb[10].mxu0  ;;  %v6365_v39 = vmul.f32 0.5, %v4140_v29 }
 0x576   : > { %v2561_v35 = vand.u32 2147483647, %v2537_v27  ;;  %v4141_v3 = vadd.f32 %v2512_v18, %v2327_v49  ;;  %v2514_v26 = vpop.f32.mrb[11].mxu0  ;;  %vm2545_vm13 = vcmp.ge.f32.partialorder %v2537_v27, 0.0 }
 0x577   : > { %v2562_v13 = vand.u32 2147483647, %v2538_v11  ;;  %v4142_v37 = vadd.f32 %v2514_v26, %v2327_v49  ;;  %vm2546_vm8 = vcmp.ge.f32.partialorder %v2538_v11, 0.0  ;;  %v6372_v2 = vsel %vm2545_vm13, 1.0, %v4962_v36 }
 0x578   : > { %v2569_v25 = vmul.f32 0.3275911, %v2561_v35  ;;  %v2539_v52 = vmul.f32 0.70710677, %v4141_v3  ;;  %v2665_v4 = vsub.f32 0.0, %v2561_v35  ;;  %v6376_v43 = vsel %vm2546_vm8, 1.0, %v4962_v36 }
 0x579   : > { %v2570_v33 = vmul.f32 0.3275911, %v2562_v13  ;;  %v6353_v46 = vmul.f32 0.70710677, %v4142_v37  ;;  %v2518_v56 = vpop.f32.mrb[12].mxu0  ;;  %v2666_v22 = vsub.f32 0.0, %v2562_v13 }
 0x57a   : > { %v2577_v9 = vadd.f32 1.0, %v2569_v25  ;;  %v2563_v17 = vand.u32 2147483647, %v2539_v52  ;;  %v2520_v59 = vpop.f32.mrb[13].mxu0  ;;  %v6356_v7 = vadd.f32 %v2518_v56, %v2332_v34  ;;  %v2673_v57 = vmul.f32 %v2665_v4, %v2561_v35 }
 0x57b   : > { %v2578_v61 = vadd.f32 1.0, %v2570_v33  ;;  %v2564_v40 = vand.u32 2147483647, %v6353_v46  ;;  %v6358_v54 = vadd.f32 %v2520_v59, %v2332_v34  ;;  %vm2547_vm5 = vcmp.ge.f32.partialorder %v2539_v52, 0.0 }
 0x57c   : > { %4904 = vrcp.f32 %v2577_v9  ;;  %v2571_v58 = vmul.f32 0.3275911, %v2563_v17  ;;  %v6363_v1 = vmul.f32 0.70710677, %v6356_v7  ;;  %v2667_v47 = vsub.f32 0.0, %v2563_v17 }
 0x57d   : > { %4906 = vrcp.f32 %v2578_v61  ;;  %v2524_v31 = vpop.f32.mrb[14].mxu0  ;;  %v2572_v62 = vmul.f32 0.3275911, %v2564_v40  ;;  %v6368_v20 = vmul.f32 0.70710677, %v6358_v54  ;;  %v6378_v24 = vmul.f32 0.5, %v4141_v3 }
 0x57e   : > { %v2526_v16 = vpop.f32.mrb[15].mxu0  ;;  %v2579_v48 = vadd.f32 1.0, %v2571_v58  ;;  %v2565_v55 = vand.u32 2147483647, %v6363_v1  ;;  %v6380_v0 = vmul.f32 0.5, %v4142_v37  ;;  %v2668_v6 = vsub.f32 0.0, %v2564_v40 }
 0x57f   : > { %v2580_v10 = vadd.f32 1.0, %v2572_v62  ;;  %v2566_v8 = vand.u32 2147483647, %v6368_v20  ;;  %v6382_v28 = vadd.f32 %v2524_v31, %v2337_v21  ;;  %v2681_v12 = vmul.f32 1.442695, %v2673_v57 }
 0x580   : > { %4908 = vrcp.f32 %v2579_v48  ;;  %v2573_v53 = vmul.f32 0.3275911, %v2565_v55  ;;  %v2674_v32 = vmul.f32 %v2666_v22, %v2562_v13  ;;  %v6387_v29 = vsel %vm2547_vm5, 1.0, %v4962_v36 }
 0x581   : > { %4910 = vrcp.f32 %v2580_v10  ;;  %v2574_v44 = vmul.f32 0.3275911, %v2566_v8  ;;  %v2675_v18 = vmul.f32 %v2667_v47, %v2563_v17  ;;  %v6392_v3 = vadd.f32 %v2526_v16, %v2337_v21 }
 0x582   : > { %v2581_v27 = vadd.f32 1.0, %v2573_v53  ;;  %v2669_v37 = vsub.f32 0.0, %v2565_v55  ;;  %v6396_v25 = vmul.f32 0.70710677, %v6382_v28  ;;  %vm2548_vm10 = vcmp.ge.f32.partialorder %v6353_v46, 0.0 }
 0x583   : > { %v2582_v35 = vadd.f32 1.0, %v2574_v44  ;;  %v2676_v33 = vmul.f32 %v2668_v6, %v2564_v40  ;;  %v2683_v9 = vmul.f32 1.442695, %v2674_v32  ;;  %v2685_v59 = vmul.f32 1.442695, %v2675_v18 }
 0x584   : > { %4912 = vrcp.f32 %v2581_v27  ;;  %v2567_v56 = vand.u32 2147483647, %v6396_v25  ;;  %v2670_v34 = vsub.f32 0.0, %v2566_v8  ;;  %v6404_v58 = vmul.f32 0.70710677, %v6392_v3 }
 0x585   : > { %4914 = vrcp.f32 %v2582_v35  ;;  %v2677_v16 = vmul.f32 %v2669_v37, %v2565_v55  ;;  %v2687_v62 = vmul.f32 1.442695, %v2676_v33  ;;  %v6421_v18 = vsel %vm2548_vm10, 1.0, %v4962_v36 }
 0x586   : > { %v6384_v5 = vpop.eup %4904  ;;  %v2575_v40 = vmul.f32 0.3275911, %v2567_v56  ;;  %4916 = vpow2.f32 %v2681_v12  ;;  %v6409_v57 = vand.u32 2147483647, %v6404_v58  ;;  %v2678_v44 = vmul.f32 %v2670_v34, %v2566_v8 }
 0x587   : > { %v6389_v49 = vpop.eup %4906  ;;  %v2593_v11 = vmul.f32 1.0614054, %v6384_v5  ;;  %4918 = vpow2.f32 %v2683_v9  ;;  %v2689_v27 = vmul.f32 1.442695, %v2677_v16  ;;  %v2671_v33 = vsub.f32 0.0, %v2567_v56 }
 0x588   : > { %v2594_v26 = vmul.f32 1.0614054, %v6389_v49  ;;  %v2583_v21 = vadd.f32 1.0, %v2575_v40  ;;  %v2576_v55 = vmul.f32 0.3275911, %v6409_v57  ;;  %vm2549_vm13 = vcmp.ge.f32.partialorder %v6363_v1, 0.0 }
 0x589   : > { %v2601_v13 = vadd.f32 -1.4531521, %v2593_v11  ;;  %v2691_v16 = vmul.f32 1.442695, %v2678_v44  ;;  %vm2550_vm8 = vcmp.ge.f32.partialorder %v6368_v20, 0.0  ;;  %vm2551_vm5 = vcmp.ge.f32.partialorder %v6396_v25, 0.0 }
 0x58a   : > { %v2602_v52 = vadd.f32 -1.4531521, %v2594_v26  ;;  %v6400_v61 = vpop.eup %4908  ;;  %4920 = vrcp.f32 %v2583_v21  ;;  %v2584_v26 = vadd.f32 1.0, %v2576_v55  ;;  %vm2552_vm10 = vcmp.ge.f32.partialorder %v6404_v58, 0.0 }
 0x58b   : > { %v2609_v17 = vmul.f32 %v6384_v5, %v2601_v13  ;;  %v2595_v4 = vmul.f32 1.0614054, %v6400_v61  ;;  %v6411_v22 = vpop.eup %4910  ;;  %4922 = vpow2.f32 %v2685_v59  ;;  %v2534_v58 = vmul.f32 0.5, %v6358_v54 }
 0x58c   : > { %v2610_v31 = vmul.f32 %v6389_v49, %v2602_v52  ;;  %v2596_v6 = vmul.f32 1.0614054, %v6411_v22  ;;  %4924 = vrcp.f32 %v2584_v26 }
 0x58d   : > { %v2617_v48 = vadd.f32 1.4214138, %v2609_v17  ;;  %v2603_v47 = vadd.f32 -1.4531521, %v2595_v4  ;;  %4926 = vpow2.f32 %v2687_v62 }
 0x58e   : > { %v2618_v10 = vadd.f32 1.4214138, %v2610_v31  ;;  %v2604_v35 = vadd.f32 -1.4531521, %v2596_v6  ;;  %v6423_v37 = vpop.eup %4912  ;;  %4928 = vpow2.f32 %v2689_v27 }
 0x58f   : > { %v2625_v53 = vmul.f32 %v6384_v5, %v2617_v48  ;;  %v2611_v12 = vmul.f32 %v6400_v61, %v2603_v47  ;;  %v6425_v52 = vpop.eup %4914  ;;  %v2597_v34 = vmul.f32 1.0614054, %v6423_v37  ;;  %4930 = vpow2.f32 %v2691_v16 }
 0x590   : > { %v2626_v32 = vmul.f32 %v6389_v49, %v2618_v10  ;;  %v2612_v17 = vmul.f32 %v6411_v22, %v2604_v35  ;;  %v2598_v4 = vmul.f32 1.0614054, %v6425_v52  ;;  %v4917_v6 = vpop.eup %4916 }
 0x591   : > { %v2633_v11 = vadd.f32 -0.28449672, %v2625_v53  ;;  %v2619_v8 = vadd.f32 1.4214138, %v2611_v12  ;;  %v2605_v59 = vadd.f32 -1.4531521, %v2597_v34  ;;  %v2679_v53 = vmul.f32 %v2671_v33, %v2567_v56 }
 0x592   : > { %v2634_v13 = vadd.f32 -0.28449672, %v2626_v32  ;;  %v2620_v48 = vadd.f32 1.4214138, %v2612_v17  ;;  %v2606_v21 = vadd.f32 -1.4531521, %v2598_v4 }
 0x593   : > { %v2641_v9 = vmul.f32 %v6384_v5, %v2633_v11  ;;  %v2627_v31 = vmul.f32 %v6400_v61, %v2619_v8  ;;  %v2613_v12 = vmul.f32 %v6423_v37, %v2605_v59  ;;  %v4919_v11 = vpop.eup %4918  ;;  %v2672_v56 = vsub.f32 0.0, %v6409_v57 }
 0x594   : > { %v2642_v46 = vmul.f32 %v6389_v49, %v2634_v13  ;;  %v2628_v32 = vmul.f32 %v6411_v22, %v2620_v48  ;;  %v2614_v62 = vmul.f32 %v6425_v52, %v2606_v21  ;;  %v6440_v33 = vpop.eup %4920  ;;  %v2693_v34 = vmul.f32 1.442695, %v2679_v53 }
 0x595   : > { %v2649_v40 = vadd.f32 0.2548296, %v2641_v9  ;;  %v2635_v47 = vadd.f32 -0.28449672, %v2627_v31  ;;  %v2621_v8 = vadd.f32 1.4214138, %v2613_v12  ;;  %v4923_v4 = vpop.eup %4922  ;;  %v2680_v53 = vmul.f32 %v2672_v56, %v6409_v57 }
 0x596   : > { %v2650_v10 = vadd.f32 0.2548296, %v2642_v46  ;;  %v2636_v13 = vadd.f32 -0.28449672, %v2628_v32  ;;  %v2622_v17 = vadd.f32 1.4214138, %v2614_v62  ;;  %v6448_v59 = vpop.eup %4924  ;;  %4932 = vpow2.f32 %v2693_v34 }
 0x597   : > { %v2657_v55 = vmul.f32 %v6384_v5, %v2649_v40  ;;  %v2643_v44 = vmul.f32 %v6400_v61, %v2635_v47  ;;  %v2599_v31 = vmul.f32 1.0614054, %v6440_v33  ;;  %v2600_v12 = vmul.f32 1.0614054, %v6448_v59 }
 0x598   : > { %v2658_v35 = vmul.f32 %v6389_v49, %v2650_v10  ;;  %v2644_v46 = vmul.f32 %v6411_v22, %v2636_v13  ;;  %v2629_v49 = vmul.f32 %v6423_v37, %v2621_v8  ;;  %v2630_v48 = vmul.f32 %v6425_v52, %v2622_v17 }
 0x599   : > { %v2697_v26 = vmul.f32 %v4917_v6, %v2657_v55  ;;  %v2651_v9 = vadd.f32 0.2548296, %v2643_v44  ;;  %v2607_v21 = vadd.f32 -1.4531521, %v2599_v31  ;;  %v2608_v57 = vadd.f32 -1.4531521, %v2600_v12 }
 0x59a   : > { %v2698_v5 = vmul.f32 %v4919_v11, %v2658_v35  ;;  %v2652_v10 = vadd.f32 0.2548296, %v2644_v46  ;;  %v2637_v47 = vadd.f32 -0.28449672, %v2629_v49  ;;  %v2638_v32 = vadd.f32 -0.28449672, %v2630_v48  ;;  %v4927_v11 = vpop.eup %4926 }
 0x59b   : > { %v2705_v27 = vsub.f32 1.0, %v2697_v26  ;;  %v2659_v40 = vmul.f32 %v6400_v61, %v2651_v9  ;;  %v2615_v44 = vmul.f32 %v6440_v33, %v2607_v21  ;;  %v4929_v8 = vpop.eup %4928  ;;  %v2695_v9 = vmul.f32 1.442695, %v2680_v53 }
 0x59c   : > { %v2706_v16 = vsub.f32 1.0, %v2698_v5  ;;  %v2660_v61 = vmul.f32 %v6411_v22, %v2652_v10  ;;  %v2645_v35 = vmul.f32 %v6423_v37, %v2637_v47  ;;  %v2646_v13 = vmul.f32 %v6425_v52, %v2638_v32  ;;  %v4931_v17 = vpop.eup %4930 }
 0x59d   : > { %v2713_v6 = vmul.f32 %v2705_v27, %v6372_v2  ;;  %v2699_v55 = vmul.f32 %v4923_v4, %v2659_v40  ;;  %v2623_v5 = vadd.f32 1.4214138, %v2615_v44  ;;  %v2616_v49 = vmul.f32 %v6448_v59, %v2608_v57 }
 0x59e   : > { %v2714_v62 = vmul.f32 %v2706_v16, %v6376_v43  ;;  %v2700_v2 = vmul.f32 %v4927_v11, %v2660_v61  ;;  %v2653_v56 = vadd.f32 0.2548296, %v2645_v35  ;;  %v2654_v46 = vadd.f32 0.2548296, %v2646_v13 }
 0x59f   : > { %v2707_v26 = vsub.f32 1.0, %v2699_v55  ;;  %v2721_v27 = vadd.f32 1.0, %v2713_v6  ;;  %v2557_v43 = vsel %vm2549_vm13, 1.0, %v4962_v36  ;;  %v2631_v4 = vmul.f32 %v6440_v33, %v2623_v5 }
 0x5a0   : > { %v2708_v31 = vsub.f32 1.0, %v2700_v2  ;;  %v2661_v34 = vmul.f32 %v6423_v37, %v2653_v56  ;;  %v2722_v16 = vadd.f32 1.0, %v2714_v62  ;;  %v2662_v48 = vmul.f32 %v6425_v52, %v2654_v46 }
 0x5a1   : > { %v2715_v22 = vmul.f32 %v2707_v26, %v6387_v29  ;;  %v2624_v10 = vadd.f32 1.4214138, %v2616_v49  ;;  %v2639_v21 = vadd.f32 -0.28449672, %v2631_v4  ;;  %4934 = vpow2.f32 %v2695_v9 }
 0x5a2   : > { %v2716_v47 = vmul.f32 %v2708_v31, %v6421_v18  ;;  %v2701_v29 = vmul.f32 %v4929_v8, %v2661_v34  ;;  %v6468_v53 = vmul.f32 %v2721_v27, %v6360_v15  ;;  %v2702_v6 = vmul.f32 %v4931_v17, %v2662_v48 }
 0x5a3   : > { %v2723_v40 = vadd.f32 1.0, %v2715_v22  ;;  %v2632_v37 = vmul.f32 %v6448_v59, %v2624_v10  ;;  %v2647_v52 = vmul.f32 %v6440_v33, %v2639_v21  ;;  %v6478_v18 = vmul.f32 %v2722_v16, %v6365_v39  ;;  %v3488_v21 = vld [vmem:[%s6815_s2 + $0x68] sm:$0xff] }
 0x5a4   : > { %v2724_v55 = vadd.f32 1.0, %v2716_v47  ;;  %v2709_v11 = vsub.f32 1.0, %v2701_v29  ;;  %v2710_v35 = vsub.f32 1.0, %v2702_v6  ;;  %v2558_v39 = vsel %vm2550_vm8, 1.0, %v4962_v36  ;;  %v3487_v29 = vld [vmem:[%s6815_s2 + $0x60] sm:$0xff] }
 0x5a5   : > { %v6471_v1 = vmul.f32 %v2723_v40, %v6378_v24  ;;  %v2640_v32 = vadd.f32 -0.28449672, %v2632_v37  ;;  %v4933_v24 = vpop.eup %4932  ;;  %v2655_v61 = vadd.f32 0.2548296, %v2647_v52  ;;  %v2559_v62 = vsel %vm2551_vm5, 1.0, %v4962_v36 }
 0x5a6   : > { %v6485_v12 = vmul.f32 %v2724_v55, %v6380_v0  ;;  %v2717_v0 = vmul.f32 %v2709_v11, %v2557_v43  ;;  %v2718_v57 = vmul.f32 %v2710_v35, %v2558_v39  ;;  %v2533_v49 = vmul.f32 0.5, %v6356_v7 }
 0x5a7   : > { %v6482_v15 = vpack.i.bf16 %v6471_v1, %v6468_v53  ;;  %v2648_v20 = vmul.f32 %v6448_v59, %v2640_v32  ;;  %v2663_v25 = vmul.f32 %v6440_v33, %v2655_v61  ;;  %v4071_v9 = vpack.c.bf16 %v6471_v1, %v6468_v53 }
 0x5a8   : > { %v4685_v44 = vpack.i.bf16 %v6485_v12, %v6478_v18  ;;  %v4069_v33 = vpack.c.bf16 %v6485_v12, %v6478_v18  ;;  %v2725_v17 = vadd.f32 1.0, %v2717_v0  ;;  %v2726_v22 = vadd.f32 1.0, %v2718_v57 }
 0x5a9   : > { %4681 = vrot.lane.b32.xlu1 %v6482_v15, %s4952_s18  ;;  %v2656_v26 = vadd.f32 0.2548296, %v2648_v20  ;;  %v2703_v13 = vmul.f32 %v4933_v24, %v2663_v25  ;;  %v2535_v31 = vmul.f32 0.5, %v6382_v28  ;;  %v2560_v43 = vsel %vm2552_vm10, 1.0, %v4962_v36 }
 0x5aa   : > { %4686 = vrot.lane.b32.xlu0 %v4685_v44, %s4952_s18  ;;  %v6506_v4 = vmul.f32 %v2725_v17, %v2533_v49  ;;  %v6510_v40 = vmul.f32 %v2726_v22, %v2534_v58  ;;  %v2536_v48 = vmul.f32 0.5, %v6392_v3  ;;  %v3476_v3 = vld [vmem:[%s6814_s1 + $0x128] sm:$0xff]  ;;  %vm6939_vm13 = vcmp.lt.s32.totalorder %v5076_v23, 16 }
 0x5ab   : > { %v2664_v8 = vmul.f32 %v6448_v59, %v2656_v26  ;;  %v4935_v2 = vpop.eup %4934  ;;  %v2711_v56 = vsub.f32 1.0, %v2703_v13  ;;  %3249 = vmatprep.mubr.f32.mxu1 %v3476_v3  ;;  %vm6940_vm8 = vmmov %vm6939_vm13 }
 0x5ad   : > { %v2704_v5 = vmul.f32 %v4935_v2, %v2664_v8  ;;  %v2719_v27 = vmul.f32 %v2711_v56, %v2559_v62 }
 0x5af   : > { %v2712_v46 = vsub.f32 1.0, %v2704_v5  ;;  %v2727_v59 = vadd.f32 1.0, %v2719_v27 }
 0x5b1   : > { %v2720_v34 = vmul.f32 %v2712_v46, %v2560_v43  ;;  %v6508_v16 = vmul.f32 %v2727_v59, %v2535_v31 }
 0x5b3   : > { %v2728_v10 = vadd.f32 1.0, %v2720_v34  ;;  %v4690_v7 = vpack.i.bf16 %v6508_v16, %v6506_v4  ;;  %v4075_v36 = vpack.c.bf16 %v6508_v16, %v6506_v4 }
 0x5b5   : > { %v6515_v47 = vmul.f32 %v2728_v10, %v2536_v48  ;;  %4691 = vrot.lane.b32.xlu1 %v4690_v7, %s4952_s18 }
 0x5b7   : > { %v4700_v54 = vpack.i.bf16 %v6515_v47, %v6510_v40  ;;  %v4073_v28 = vpack.c.bf16 %v6515_v47, %v6510_v40 }
 0x5b9   : > { %4701 = vrot.lane.b32.xlu0 %v4700_v54, %s4952_s18  ;;  %4696 = vrot.lane.b32.xlu1 %v6482_v15, %s4953_s19 }
 0x5bd   : > { %4706 = vrot.lane.b32.xlu0 %v4685_v44, %s4953_s19  ;;  %4711 = vrot.lane.b32.xlu1 %v4690_v7, %s4953_s19 }
 0x5c1   : > { %4721 = vrot.lane.b32.xlu0 %v4700_v54, %s4953_s19  ;;  %4716 = vrot.lane.b32.xlu1 %v6482_v15, %s4954_s20 }
 0x5c5   : > { %4726 = vrot.lane.b32.xlu0 %v4685_v44, %s4954_s20  ;;  %4731 = vrot.lane.b32.xlu1 %v4690_v7, %s4954_s20 }
 0x5c9   : > { %4741 = vrot.lane.b32.xlu0 %v4700_v54, %s4954_s20  ;;  %4736 = vrot.lane.b32.xlu1 %v6482_v15, %s4955_s21 }
 0x5cd   : > { %4746 = vrot.lane.b32.xlu0 %v4685_v44, %s4955_s21  ;;  %4751 = vrot.lane.b32.xlu1 %v4690_v7, %s4955_s21 }
 0x5d1   : > { %4756 = vrot.lane.b32.xlu0 %v4700_v54, %s4955_s21  ;;  %4761 = vrot.lane.b32.xlu1 %v6482_v15, %s4956_s22  ;;  %s3498_s21 = sshll.u32 %s6991_s13, 5 }
 0x5d5   : > { %4766 = vrot.lane.b32.xlu0 %v4685_v44, %s4956_s22  ;;  %4771 = vrot.lane.b32.xlu1 %v4690_v7, %s4956_s22 }
 0x5d9   : > { %4781 = vrot.lane.b32.xlu0 %v4700_v54, %s4956_s22  ;;  %4776 = vrot.lane.b32.xlu1 %v6482_v15, %s4957_s23 }
 0x5dd   : > { %4786 = vrot.lane.b32.xlu0 %v4685_v44, %s4957_s23  ;;  %4791 = vrot.lane.b32.xlu1 %v4690_v7, %s4957_s23 }
 0x5e1   : > { %4801 = vrot.lane.b32.xlu0 %v4700_v54, %s4957_s23  ;;  %4796 = vrot.lane.b32.xlu1 %v6482_v15, %s4958_s24 }
 0x5e5   : > { %4806 = vrot.lane.b32.xlu0 %v4685_v44, %s4958_s24  ;;  %4811 = vrot.lane.b32.xlu1 %v4690_v7, %s4958_s24 }
 0x5e9   : > { %4816 = vrot.lane.b32.xlu0 %v4700_v54, %s4958_s24  ;;  %4821 = vrot.lane.b32.xlu1 %v6482_v15, %s4959_s25  ;;  %s170_s24 = scalar_lea.vmem %s6816_s3, %s3498_s21 }
 0x5ed   : > { %4826 = vrot.lane.b32.xlu0 %v4685_v44, %s4959_s25  ;;  %4831 = vrot.lane.b32.xlu1 %v4690_v7, %s4959_s25 }
 0x5f1   : > { %4836 = vrot.lane.b32.xlu0 %v4700_v54, %s4959_s25  ;;  %3157 = vperm.xlu1 %4359, %v3487_v29  }
 0x5f5   : > { %3162 = vperm.xlu0 %4358, %v3488_v21  }
 0x61b   : > { %v4682_v6 = vpop.permute.xlu1 %4681 }
 0x61c   : > { %v4684_v37 = vunpack.i.h.bf16 %v4682_v6  ;;  %v4683_v55 = vunpack.i.l.bf16 %v4682_v6  ;;  %v4687_v52 = vpop.permute.xlu0 %4686 }
 0x61d   : > { %v4689_v32 = vunpack.i.h.bf16 %v4687_v52  ;;  %v4688_v15 = vunpack.i.l.bf16 %v4687_v52 }
 0x61f   : > { %v2753_v24 = vsel %vm222_vm2, %v4683_v55, %v4688_v15  ;;  %v2754_v11 = vsel %vm222_vm2, %v4684_v37, %v4689_v32  ;;  %v2757_v61 = vsel %vm222_vm2, %v4688_v15, %v4683_v55  ;;  %v2758_v35 = vsel %vm222_vm2, %v4689_v32, %v4684_v37 }
 0x620   : > { %v4023_v20 = vpack.c.bf16 %v2754_v11, %v2753_v24  ;;  %v4026_v39 = vpack.c.bf16 %v2758_v35, %v2757_v61 }
 0x622   : > { %4025 = vmatprep.subr.msk.bf16.mxu1 %vm5113_vm6, %v4023_v20 }
 0x623   : > { %4028 = vmatpush1.bf16.msk.msra.mxu1 %vm5121_vm7, %v4026_v39 }
 0x627   : > { %v4692_v25 = vpop.permute.xlu1 %4691 }
 0x628   : > { %v4694_v44 = vunpack.i.h.bf16 %v4692_v25  ;;  %v4693_v62 = vunpack.i.l.bf16 %v4692_v25 }
 0x62b   : > { %v4702_v26 = vpop.permute.xlu0 %4701  ;;  %v4697_v57 = vpop.permute.xlu1 %4696 }
 0x62c   : > { %v4704_v0 = vunpack.i.h.bf16 %v4702_v26  ;;  %v4703_v13 = vunpack.i.l.bf16 %v4702_v26  ;;  %v4699_v8 = vunpack.i.h.bf16 %v4697_v57  ;;  %v4698_v2 = vunpack.i.l.bf16 %v4697_v57 }
 0x62e   : > { %v2755_v56 = vsel %vm222_vm2, %v4693_v62, %v4703_v13  ;;  %v2756_v5 = vsel %vm222_vm2, %v4694_v44, %v4704_v0  ;;  %v2759_v17 = vsel %vm222_vm2, %v4703_v13, %v4693_v62  ;;  %v2760_v27 = vsel %vm222_vm2, %v4704_v0, %v4694_v44  ;;  %vm6941_vm2 = vmmov %vm6940_vm8 }
 0x62f   : > { %v4029_v22 = vpack.c.bf16 %v2756_v5, %v2755_v56  ;;  %v4032_v46 = vpack.c.bf16 %v2760_v27, %v2759_v17  ;;  %v4707_v49 = vpop.permute.xlu0 %4706  ;;  %v4712_v43 = vpop.permute.xlu1 %4711  ;;  %vm6942_vm5 = vmmov %vm6941_vm2 }
 0x630   : > { %v4709_v31 = vunpack.i.h.bf16 %v4707_v49  ;;  %v4708_v59 = vunpack.i.l.bf16 %v4707_v49  ;;  %v4714_v58 = vunpack.i.h.bf16 %v4712_v43  ;;  %v4713_v34 = vunpack.i.l.bf16 %v4712_v43  ;;  %vm6943_vm10 = vmmov %vm6941_vm2 }
 0x631   : > { %4031 = vmatprep.subr.msk.bf16.mxu1 %vm5113_vm6, %v4029_v22 }
 0x632   : > { %v2797_v48 = vsel %vm6939_vm13, %v4708_v59, %v4698_v2  ;;  %v2798_v10 = vsel %vm6940_vm8, %v4709_v31, %v4699_v8  ;;  %4034 = vmatpush1.bf16.msk.msra.mxu1 %vm5121_vm7, %v4032_v46  ;;  %v2793_v7 = vsel %vm6941_vm2, %v4698_v2, %v4708_v59  ;;  %v2794_v54 = vsel %vm6942_vm5, %v4699_v8, %v4709_v31  ;;  %vm6944_vm7 = vmmov %vm6941_vm2 }
 0x633   : > { %v4037_v3 = vpack.c.bf16 %v2798_v10, %v2797_v48  ;;  %v4722_v29 = vpop.permute.xlu0 %4721  ;;  %v4035_v21 = vpack.c.bf16 %v2794_v54, %v2793_v7  ;;  %v4717_v55 = vpop.permute.xlu1 %4716  ;;  %vm6945_vm13 = vmmov %vm6941_vm2 }
 0x634   : > { %v4724_v6 = vunpack.i.h.bf16 %v4722_v29  ;;  %v4723_v37 = vunpack.i.l.bf16 %v4722_v29  ;;  %v4719_v52 = vunpack.i.h.bf16 %v4717_v55  ;;  %v4718_v32 = vunpack.i.l.bf16 %v4717_v55  ;;  %vm6946_vm8 = vmmov %vm6941_vm2 }
 0x635   : > { %4036 = vmatprep.subr.bf16.mxu1 %v4035_v21  ;;  %vm6947_vm2 = vcmp.lt.s32.totalorder %v5076_v23, 15 }
 0x636   : > { %v2799_v15 = vsel %vm6943_vm10, %v4723_v37, %v4713_v34  ;;  %v2800_v51 = vsel %vm6944_vm7, %v4724_v6, %v4714_v58  ;;  %4039 = vmatpush1.bf16.msk.msra.mxu1 %vm5157_vm9, %v4037_v3  ;;  %v2795_v24 = vsel %vm6945_vm13, %v4713_v34, %v4723_v37  ;;  %v2796_v11 = vsel %vm6946_vm8, %v4714_v58, %v4724_v6  ;;  %vm6948_vm5 = vmmov %vm6947_vm2 }
 0x637   : > { %v4042_v61 = vpack.c.bf16 %v2800_v51, %v2799_v15  ;;  %v4727_v35 = vpop.permute.xlu0 %4726  ;;  %v4040_v20 = vpack.c.bf16 %v2796_v11, %v2795_v24  ;;  %v4732_v44 = vpop.permute.xlu1 %4731  ;;  %vm6949_vm10 = vmmov %vm6947_vm2 }
 0x638   : > { %v4729_v39 = vunpack.i.h.bf16 %v4727_v35  ;;  %v4728_v25 = vunpack.i.l.bf16 %v4727_v35  ;;  %v4734_v62 = vunpack.i.h.bf16 %v4732_v44  ;;  %v4733_v26 = vunpack.i.l.bf16 %v4732_v44  ;;  %vm6950_vm7 = vmmov %vm6947_vm2 }
 0x639   : > { %4041 = vmatprep.subr.bf16.mxu1 %v4040_v20  ;;  %vm6951_vm13 = vmmov %vm6947_vm2 }
 0x63a   : > { %v2833_v0 = vsel %vm6947_vm2, %v4718_v32, %v4728_v25  ;;  %v2834_v13 = vsel %vm6948_vm5, %v4719_v52, %v4729_v39  ;;  %v2837_v57 = vsel %vm6949_vm10, %v4728_v25, %v4718_v32  ;;  %v2838_v8 = vsel %vm6950_vm7, %v4729_v39, %v4719_v52  ;;  %4044 = vmatpush1.bf16.msk.msra.mxu1 %vm5157_vm9, %v4042_v61  ;;  %vm6952_vm8 = vmmov %vm6947_vm2 }
 0x63b   : > { %v4045_v2 = vpack.c.bf16 %v2834_v13, %v2833_v0  ;;  %v4048_v56 = vpack.c.bf16 %v2838_v8, %v2837_v57  ;;  %v4742_v5 = vpop.permute.xlu0 %4741  ;;  %v4737_v22 = vpop.permute.xlu1 %4736  ;;  %vm6953_vm9 = vmmov %vm6947_vm2  ;;  %vm6954_vm5 = vcmp.lt.s32.totalorder %v5076_v23, 1 }
 0x63c   : > { %v4744_v17 = vunpack.i.h.bf16 %v4742_v5  ;;  %v4743_v27 = vunpack.i.l.bf16 %v4742_v5  ;;  %v4739_v46 = vunpack.i.h.bf16 %v4737_v22  ;;  %v4738_v49 = vunpack.i.l.bf16 %v4737_v22  ;;  %vm6955_vm10 = vmmov %vm6954_vm5 }
 0x63d   : > { %4047 = vmatprep.subr.msk.bf16.mxu1 %vm5186_vm12, %v4045_v2  ;;  %vm6956_vm7 = vmmov %vm6954_vm5 }
 0x63e   : > { %v2835_v31 = vsel %vm6951_vm13, %v4733_v26, %v4743_v27  ;;  %v2836_v59 = vsel %vm6952_vm8, %v4734_v62, %v4744_v17  ;;  %v2839_v30 = vsel %vm6947_vm2, %v4743_v27, %v4733_v26  ;;  %v2840_v43 = vsel %vm6953_vm9, %v4744_v17, %v4734_v62  ;;  %4050 = vmatpush1.bf16.msk.msra.mxu1 %vm5207_vm15, %v4048_v56  ;;  %vm6957_vm13 = vmmov %vm6954_vm5 }
 0x63f   : > { %v4051_v58 = vpack.c.bf16 %v2836_v59, %v2835_v31  ;;  %v4054_v34 = vpack.c.bf16 %v2840_v43, %v2839_v30  ;;  %v4747_v48 = vpop.permute.xlu0 %4746  ;;  %v4752_v54 = vpop.permute.xlu1 %4751  ;;  %vm6958_vm8 = vmmov %vm6954_vm5 }
 0x640   : > { %v4749_v10 = vunpack.i.h.bf16 %v4747_v48  ;;  %v4748_v7 = vunpack.i.l.bf16 %v4747_v48  ;;  %v4754_v3 = vunpack.i.h.bf16 %v4752_v54  ;;  %v4753_v29 = vunpack.i.l.bf16 %v4752_v54  ;;  %vm6959_vm2 = vmmov %vm6954_vm5 }
 0x641   : > { %4053 = vmatprep.subr.msk.bf16.mxu1 %vm5186_vm12, %v4051_v58  ;;  %vm6960_vm9 = vmmov %vm6959_vm2 }
 0x642   : > { %v2873_v21 = vsel %vm6954_vm5, %v4738_v49, %v4748_v7  ;;  %v2874_v6 = vsel %vm6955_vm10, %v4739_v46, %v4749_v10  ;;  %v2877_v37 = vsel %vm6956_vm7, %v4748_v7, %v4738_v49  ;;  %v2878_v55 = vsel %vm6957_vm13, %v4749_v10, %v4739_v46  ;;  %4056 = vmatpush1.bf16.msk.msra.mxu1 %vm5207_vm15, %v4054_v34  ;;  %vm6961_vm15 = vmmov %vm6959_vm2 }
 0x643   : > { %v4057_v52 = vpack.c.bf16 %v2874_v6, %v2873_v21  ;;  %v4060_v32 = vpack.c.bf16 %v2878_v55, %v2877_v37  ;;  %v4757_v15 = vpop.permute.xlu0 %4756  ;;  %v4762_v11 = vpop.permute.xlu1 %4761  ;;  %vm6962_vm5 = vcmp.lt.s32.totalorder %v5076_v23, 127 }
 0x644   : > { %v4759_v51 = vunpack.i.h.bf16 %v4757_v15  ;;  %v4758_v24 = vunpack.i.l.bf16 %v4757_v15  ;;  %v4764_v26 = vunpack.i.h.bf16 %v4762_v11  ;;  %v4763_v0 = vunpack.i.l.bf16 %v4762_v11  ;;  %vm6964_vm10 = vmmov %vm6962_vm5 }
 0x645   : > { %4059 = vmatprep.subr.msk.bf16.mxu1 %vm5113_vm6, %v4057_v52  ;;  %vm6965_vm7 = vmmov %vm6962_vm5 }
 0x646   : > { %v2875_v61 = vsel %vm6958_vm8, %v4753_v29, %v4758_v24  ;;  %v2876_v35 = vsel %vm6959_vm2, %v4754_v3, %v4759_v51  ;;  %v2879_v20 = vsel %vm6960_vm9, %v4758_v24, %v4753_v29  ;;  %v2880_v60 = vsel %vm6961_vm15, %v4759_v51, %v4754_v3  ;;  %4062 = vmatpush1.bf16.msk.msra.mxu1 %vm5232_vm0, %v4060_v32  ;;  %vm6966_vm13 = vmmov %vm6962_vm5 }
 0x647   : > { %v4063_v39 = vpack.c.bf16 %v2876_v35, %v2875_v61  ;;  %v4066_v25 = vpack.c.bf16 %v2880_v60, %v2879_v20  ;;  %v4767_v44 = vpop.permute.xlu0 %4766  ;;  %v4772_v62 = vpop.permute.xlu1 %4771  ;;  %vm6967_vm8 = vmmov %vm6962_vm5  ;;  %vm6970_vm15 = vcmp.lt.s32.totalorder %v5076_v23, 113 }
 0x648   : > { %v4769_v13 = vunpack.i.h.bf16 %v4767_v44  ;;  %v4768_v57 = vunpack.i.l.bf16 %v4767_v44  ;;  %v4774_v56 = vunpack.i.h.bf16 %v4772_v62  ;;  %v4773_v5 = vunpack.i.l.bf16 %v4772_v62  ;;  %vm6968_vm2 = vmmov %vm6962_vm5 }
 0x649   : > { %4065 = vmatprep.subr.msk.bf16.mxu1 %vm5113_vm6, %v4063_v39  ;;  %vm6963_vm6 = vmmov %vm6962_vm5 }
 0x64a   : > { %4068 = vmatpush1.bf16.msk.msra.mxu1 %vm5232_vm0, %v4066_v25  ;;  %v2925_v17 = vsel %vm6962_vm5, %v4768_v57, %v4763_v0  ;;  %v2926_v45 = vsel %vm6963_vm6, %v4769_v13, %v4764_v26  ;;  %v2921_v18 = vsel %vm6964_vm10, %v4763_v0, %v4768_v57  ;;  %vm6969_vm9 = vmmov %vm6968_vm2 }
 0x64b   : > { %v4782_v8 = vpop.permute.xlu0 %4781  ;;  %4070 = vmatprep.subr.bf16.mxu1 %v4069_v33  ;;  %v4777_v2 = vpop.permute.xlu1 %4776  ;;  %v2922_v33 = vsel %vm6965_vm7, %v4764_v26, %v4769_v13  ;;  %v4077_v49 = vpack.c.bf16 %v2926_v45, %v2925_v17  ;;  %vm6971_vm5 = vmmov %vm6970_vm15 }
 0x64c   : > { %v4784_v27 = vunpack.i.h.bf16 %v4782_v8  ;;  %v4783_v22 = vunpack.i.l.bf16 %v4782_v8  ;;  %v4779_v31 = vunpack.i.h.bf16 %v4777_v2  ;;  %v4778_v59 = vunpack.i.l.bf16 %v4777_v2  ;;  %vm6972_vm6 = vmmov %vm6971_vm5 }
 0x64d   : > { %v4080_v47 = vpack.c.bf16 %v2922_v33, %v2921_v18  ;;  %vm6973_vm10 = vmmov %vm6971_vm5 }
 0x64e   : > { %4072 = vmatpush1.bf16.msra.mxu1 %v4071_v9  ;;  %v2927_v30 = vsel %vm6966_vm13, %v4783_v22, %v4773_v5  ;;  %v2928_v53 = vsel %vm6967_vm8, %v4784_v27, %v4774_v56  ;;  %v2924_v58 = vsel %vm6969_vm9, %v4774_v56, %v4784_v27  ;;  %vm6974_vm7 = vmmov %vm6971_vm5 }
 0x64f   : > { %v4787_v46 = vpop.permute.xlu0 %4786  ;;  %4074 = vmatprep.subr.bf16.mxu1 %v4073_v28  ;;  %v4792_v12 = vpop.permute.xlu1 %4791  ;;  %v2923_v28 = vsel %vm6968_vm2, %v4773_v5, %v4783_v22  ;;  %v4083_v34 = vpack.c.bf16 %v2928_v53, %v2927_v30  ;;  %vm6975_vm13 = vmmov %vm6971_vm5  ;;  %vm6978_vm2 = vcmp.lt.s32.totalorder %v5076_v23, 112  ;;  %v3481_v23 = vld [vmem:[%s6814_s1 + $0x150] sm:$0xff] }
 0x650   : > { %v4789_v1 = vunpack.i.h.bf16 %v4787_v46  ;;  %v4788_v9 = vunpack.i.l.bf16 %v4787_v46  ;;  %v4794_v48 = vunpack.i.h.bf16 %v4792_v12  ;;  %v4793_v10 = vunpack.i.l.bf16 %v4792_v12  ;;  %vm6977_vm8 = vmmov %vm6971_vm5 }
 0x651   : > { %v4086_v3 = vpack.c.bf16 %v2924_v58, %v2923_v28  ;;  %vm6979_vm9 = vmmov %vm6978_vm2 }
 0x652   : > { %4076 = vmatpush1.bf16.msra.mxu1 %v4075_v36  ;;  %v2965_v7 = vsel %vm6970_vm15, %v4788_v9, %v4778_v59  ;;  %v2966_v4 = vsel %vm6971_vm5, %v4789_v1, %v4779_v31  ;;  %v2961_v29 = vsel %vm6972_vm6, %v4778_v59, %v4788_v9  ;;  %v2962_v6 = vsel %vm6973_vm10, %v4779_v31, %v4789_v1  ;;  %vm6980_vm15 = vmmov %vm6978_vm2 }
 0x653   : > { %v4802_v40 = vpop.permute.xlu0 %4801  ;;  %4079 = vmatprep.subr.msk.bf16.mxu1 %vm5186_vm12, %v4077_v49  ;;  %v4797_v43 = vpop.permute.xlu1 %4796  ;;  %v4089_v37 = vpack.c.bf16 %v2966_v4, %v2965_v7  ;;  %v4092_v11 = vpack.c.bf16 %v2962_v6, %v2961_v29  ;;  %vm6982_vm6 = vmmov %vm6978_vm2  ;;  %v3485_v29 = vld [vmem:[%s6814_s1 + $0x170] sm:$0xff]  ;;  %v3483_v6 = vld [vmem:[%s6814_s1 + $0x160] sm:$0xff] }
 0x654   : > { %v4804_v16 = vunpack.i.h.bf16 %v4802_v40  ;;  %v4803_v36 = vunpack.i.l.bf16 %v4802_v40  ;;  %v4799_v55 = vunpack.i.h.bf16 %v4797_v43  ;;  %v4798_v52 = vunpack.i.l.bf16 %v4797_v43  ;;  %vm6983_vm10 = vmmov %vm6978_vm2 }
 0x656   : > { %4082 = vmatpush1.bf16.msk.msra.mxu1 %vm5280_vm14, %v4080_v47  ;;  %v2967_v32 = vsel %vm6974_vm7, %v4803_v36, %v4793_v10  ;;  %v2968_v15 = vsel %vm6975_vm13, %v4804_v16, %v4794_v48  ;;  %v2964_v20 = vsel %vm6977_vm8, %v4794_v48, %v4804_v16  ;;  %v3479_v48 = vld [vmem:[%s6814_s1 + $0x140] sm:$0xff] }
 0x657   : > { %v4807_v54 = vpop.permute.xlu0 %4806  ;;  %4085 = vmatprep.subr.msk.bf16.mxu1 %vm5186_vm12, %v4083_v34  ;;  %v4812_v21 = vpop.permute.xlu1 %4811  ;;  %vm6976_vm12 = vmmov %vm6971_vm5  ;;  %v4095_v60 = vpack.c.bf16 %v2968_v15, %v2967_v32 }
 0x658   : > { %v4809_v51 = vunpack.i.h.bf16 %v4807_v54  ;;  %v4808_v50 = vunpack.i.l.bf16 %v4807_v54  ;;  %v2963_v61 = vsel %vm6976_vm12, %v4793_v10, %v4803_v36  ;;  %v4814_v39 = vunpack.i.h.bf16 %v4812_v21  ;;  %vm6981_vm5 = vmmov %vm6978_vm2  ;;  %v3478_v36 = vld [vmem:[%s6814_s1 + $0x138] sm:$0xff] }
 0x659   : > { %v4813_v25 = vunpack.i.l.bf16 %v4812_v21  ;;  %v4098_v57 = vpack.c.bf16 %v2964_v20, %v2963_v61  ;;  %v3482_v54 = vld [vmem:[%s6814_s1 + $0x158] sm:$0xff]  ;;  %v3480_v21 = vld [vmem:[%s6814_s1 + $0x148] sm:$0xff] }
 0x65a   : > { %4088 = vmatpush1.bf16.msk.msra.mxu1 %vm5280_vm14, %v4086_v3  ;;  %v3005_v44 = vsel %vm6978_vm2, %v4808_v50, %v4798_v52  ;;  %v3006_v62 = vsel %vm6979_vm9, %v4809_v51, %v4799_v55  ;;  %v3001_v8 = vsel %vm6980_vm15, %v4798_v52, %v4808_v50  ;;  %v3002_v2 = vsel %vm6981_vm5, %v4799_v55, %v4809_v51 }
 0x65b   : > { %v4817_v24 = vpop.permute.xlu0 %4816  ;;  %4091 = vmatprep.subr.msk.bf16.mxu1 %vm5316_vm1, %v4089_v37  ;;  %v4822_v35 = vpop.permute.xlu1 %4821  ;;  %v4101_v56 = vpack.c.bf16 %v3006_v62, %v3005_v44  ;;  %v4104_v12 = vpack.c.bf16 %v3002_v2, %v3001_v8  ;;  %v3486_v37 = vld [vmem:[%s6814_s1 + $0x178] sm:$0xff] }
 0x65c   : > { %v4819_v26 = vunpack.i.h.bf16 %v4817_v24  ;;  %v4818_v0 = vunpack.i.l.bf16 %v4817_v24  ;;  %v4824_v5 = vunpack.i.h.bf16 %v4822_v35  ;;  %v4823_v17 = vunpack.i.l.bf16 %v4822_v35 }
 0x65e   : > { %4094 = vmatpush1.bf16.msk.msra.mxu1 %vm5232_vm0, %v4092_v11  ;;  %v3007_v45 = vsel %vm6982_vm6, %v4818_v0, %v4813_v25  ;;  %v3008_v27 = vsel %vm6983_vm10, %v4819_v26, %v4814_v39 }
 0x65f   : > { %v4827_v13 = vpop.permute.xlu0 %4826  ;;  %4097 = vmatprep.subr.msk.bf16.mxu1 %vm5316_vm1, %v4095_v60  ;;  %v4832_v42 = vpop.permute.xlu1 %4831  ;;  %vm6984_vm1 = vmmov %vm6978_vm2  ;;  %v4106_v31 = vpack.c.bf16 %v3008_v27, %v3007_v45 }
 0x660   : > { %v4829_v22 = vunpack.i.h.bf16 %v4827_v13  ;;  %v4828_v46 = vunpack.i.l.bf16 %v4827_v13  ;;  %v3003_v33 = vsel %vm6984_vm1, %v4813_v25, %v4818_v0  ;;  %vm6985_vm7 = vmmov %vm6984_vm1  ;;  %v4834_v59 = vunpack.i.h.bf16 %v4832_v42 }
 0x661   : > { %v3004_v49 = vsel %vm6985_vm7, %v4814_v39, %v4819_v26  ;;  %v4833_v30 = vunpack.i.l.bf16 %v4832_v42 }
 0x662   : > { %4100 = vmatpush1.bf16.msk.msra.mxu1 %vm5232_vm0, %v4098_v57  ;;  %v3045_v53 = vsel %vm531_vm11, %v4828_v46, %v4823_v17  ;;  %v3046_v38 = vsel %vm531_vm11, %v4829_v22, %v4824_v5  ;;  %v4109_v40 = vpack.c.bf16 %v3004_v49, %v3003_v33  ;;  %v3041_v47 = vsel %vm531_vm11, %v4823_v17, %v4828_v46 }
 0x663   : > { %v4837_v18 = vpop.permute.xlu0 %4836  ;;  %4103 = vmatprep.subr.msk.bf16.mxu1 %vm5348_vm4, %v4101_v56  ;;  %v3042_v28 = vsel %vm531_vm11, %v4824_v5, %v4829_v22  ;;  %v4111_v43 = vpack.c.bf16 %v3046_v38, %v3045_v53 }
 0x664   : > { %v4839_v1 = vunpack.i.h.bf16 %v4837_v18  ;;  %v4838_v9 = vunpack.i.l.bf16 %v4837_v18  ;;  %v4114_v10 = vpack.c.bf16 %v3042_v28, %v3041_v47 }
 0x666   : > { %4105 = vmatpush1.bf16.msra.mxu1 %v4104_v12  ;;  %v3047_v58 = vsel %vm531_vm11, %v4838_v9, %v4833_v30  ;;  %v3048_v34 = vsel %vm531_vm11, %v4839_v1, %v4834_v59  ;;  %v3043_v7 = vsel %vm531_vm11, %v4833_v30, %v4838_v9  ;;  %v3044_v4 = vsel %vm531_vm11, %v4834_v59, %v4839_v1 }
 0x667   : > { %4108 = vmatprep.subr.msk.bf16.mxu1 %vm5348_vm4, %v4106_v31  ;;  %v4117_v16 = vpack.c.bf16 %v3048_v34, %v3047_v58  ;;  %v4120_v3 = vpack.c.bf16 %v3044_v4, %v3043_v7 }
 0x66a   : > { %4110 = vmatpush1.bf16.msra.mxu1 %v4109_v40 }
 0x66b   : > { %4113 = vmatprep.subr.msk.bf16.mxu1 %vm5374_vm3, %v4111_v43 }
 0x66d   : > { %3250 = vmatmul.mubr.f32.vlgmr.msra.gmra.mrb[8].mxu1 %v3475_v63 }
 0x66e   : > { %4116 = vmatpush1.bf16.msk.msra.mxu1 %vm5280_vm14, %v4114_v10  ;;  %3255 = vmatprep.mubr.f32.mxu1 %v3479_v48 }
 0x66f   : > { %4119 = vmatprep.subr.msk.bf16.mxu1 %vm5374_vm3, %v4117_v16 }
 0x670   : > { %v3158_v51 = vpop.permute.xlu1 %3157 }
 0x671   : > { %3256 = vmatmul.mubr.f32.gmra.mrb[10].mxu1 %v3478_v36 }
 0x672   : > { %4122 = vmatpush1.bf16.msk.msra.mxu1 %vm5280_vm14, %v4120_v3  ;;  %3261 = vmatprep.mubr.f32.mxu1 %v3482_v54  ;;  %vm6986_vm14 = vcmask 261120  }
 0x673   : > { %vm6987_vm0 = vmmov %vm6986_vm14 }
 0x674   : > { %vm6988_vm4 = vmmov %vm6987_vm0  ;;  %v3163_v35 = vpop.permute.xlu0 %3162 }
 0x675   : > { %3262 = vmatmul.mubr.f32.gmra.mrb[12].mxu1 %v3481_v23  ;;  %vm6989_vm3 = vmmov %vm6987_vm0 }
 0x676   : > { %3265 = vmatprep.mubr.f32.mxu1 %v3485_v29 }
 0x679   : > { %3266 = vmatmul.mubr.f32.gmra.mrb[14].mxu1 %v3484_v19 }
 0x67a   : > { %3334 = vmatprep.mubr.f32.mxu1 %v4961_v41 }
 0x67d   : > { %3491 = vmatmul.mubr.msk.f32.vlgmr.msra.gmra.mrb[8].mxu1 %vm6986_vm14, %v3477_v14 }
 0x67e   : > { %3340 = vmatprep.mubr.f32.mxu1 %v4961_v41 }
 0x681   : > { %3492 = vmatmul.mubr.msk.f32.gmra.mrb[10].mxu1 %vm6987_vm0, %v3480_v21 }
 0x682   : > { %3346 = vmatprep.mubr.f32.mxu1 %v4961_v41 }
 0x685   : > { %3493 = vmatmul.mubr.msk.f32.gmra.mrb[16].mxu1 %vm6988_vm4, %v3483_v6 }
 0x686   : > { %3350 = vmatprep.mubr.f32.mxu1 %v4961_v41 }
 0x689   : > { %3494 = vmatmul.mubr.msk.f32.gmra.mrb[18].mxu1 %vm6989_vm3, %v3486_v37 }
 0x748   : > { %v3263_v55 = vpop.f32.mrb[12].mxu1 }
 0x749   : > { %v3264_v52 = vpop.f32.mrb[13].mxu1 }
 0x74c   : > { %v3267_v32 = vpop.f32.mrb[14].mxu1 }
 0x74d   : > { %v3268_v15 = vpop.f32.mrb[15].mxu1 }
 0x750   : > { %v3336_v50 = vpop.f32.mrb[8].mxu1 }
 0x751   : > { %v4147_v24 = vadd.f32 %v3336_v50, %v3158_v51  ;;  %v3338_v11 = vpop.f32.mrb[9].mxu1 }
 0x752   : > { %v4148_v61 = vadd.f32 %v3338_v11, %v3158_v51 }
 0x753   : > { %4936 = vtanh.f32 %v4147_v24 }
 0x754   : > { %4938 = vtanh.f32 %v4148_v61  ;;  %v3342_v41 = vpop.f32.mrb[10].mxu1 }
 0x755   : > { %v4149_v20 = vadd.f32 %v3342_v41, %v3163_v35  ;;  %v3344_v60 = vpop.f32.mrb[11].mxu1 }
 0x756   : > { %v4150_v39 = vadd.f32 %v3344_v60, %v3163_v35 }
 0x757   : > { %4940 = vtanh.f32 %v4149_v20 }
 0x758   : > { %4942 = vtanh.f32 %v4150_v39  ;;  %v3348_v25 = vpop.f32.mrb[16].mxu1 }
 0x759   : > { %v3349_v44 = vpop.f32.mrb[17].mxu1 }
 0x75c   : > { %v3352_v62 = vpop.f32.mrb[18].mxu1 }
 0x75d   : > { %v4937_v26 = vpop.eup %4936  ;;  %v3353_v0 = vpop.f32.mrb[19].mxu1 }
 0x75e   : > { %v4939_v13 = vpop.eup %4938  ;;  %v3359_v57 = vmul.f32 0.5, %v4937_v26 }
 0x75f   : > { %v3360_v8 = vmul.f32 0.5, %v4939_v13 }
 0x760   : > { %3363 = vst [vmem:[%s170_s24] sm:$0xff] %v3359_v57 }
 0x761   : > { %v4941_v2 = vpop.eup %4940  ;;  %3364 = vst [vmem:[%s170_s24 + $0x8] sm:$0xff] %v3360_v8 }
 0x762   : > { %v4943_v56 = vpop.eup %4942  ;;  %v3361_v5 = vmul.f32 0.5, %v4941_v2 }
 0x763   : > { %v3362_v17 = vmul.f32 0.5, %v4943_v56 }
 0x764   : > { %3365 = vst [vmem:[%s170_s24 + $0x10] sm:$0xff] %v3361_v5 }
 0x765   : > { %3366 = vst [vmem:[%s170_s24 + $0x18] sm:$0xff] %v3362_v17 }
 0x766 PF: > { %s13_s12 = sadd.s32 1, %s4950_s12  }
 0x767   : > { %p10_p4 = scmp.ge.s32.totalorder %s13_s12, 4  }
 0x769   :  { %12 = sbr.rel (!%p10_p4) target bundleno = 1 (0x1), region = 68 }

</bundles_post_ra>
